<compile_context>
chip_gen: v7x
topology: tpu7x:2x2x1
jax: 0.10.0
libtpu: 0.0.40
codegen_flags: <defaults>
</compile_context>

<pallas_src>
import itertools

import jax
import jax.numpy as jnp
from jax.experimental import pallas as pl
from jax.experimental.pallas import tpu as pltpu

LEAKY_SLOPE = 0.01      # nn.LeakyReLU default negative_slope
GN_EPS = 1e-5           # nn.GroupNorm default eps
# MXU operand dtype for the conv matmuls (accumulation is always f32 and GroupNorm
# statistics are always f32).  bf16 is MXU-native; end-to-end worst-case deviation vs
# the f32 reference is ~2-3e-2.  Set to jnp.float32 for strict accuracy.
MM_DTYPE = jnp.bfloat16


def _round_up(x, m):
    return (x + m - 1) // m * m


def _pick_batch_block(n, max_b=4):
    # Largest divisor of n (<= max_b) that still leaves >= 2 grid steps, so per-step
    # overhead is amortized without idling the second TensorCore on v7x.
    best = 1
    for b in range(2, min(n, max_b) + 1):
        if n % b == 0 and n // b >= 2:
            best = b
    return best


# ---------------------------------------------------------------------------
# Fused bottleneck kernel (one grid step == b_blk samples, everything in VMEM)
# ---------------------------------------------------------------------------
def _make_bottleneck_kernel(b_blk, c1p, pp, ppw, lm, taps, inv_cnt1, inv_cnt3):

    def gn_act(h, mask, gmat, gamma, beta, inv_count, residual=None, zero_pad=False):
        # GroupNorm stats: reduce over lanes FIRST (cheap XLU lane reductions), then a
        # tiny (C,C)x(C,1) 0/1 "same group" matmul broadcasts group sums per channel.
        hm = h * mask                                              # (C, PP)
        ch1 = jnp.sum(hm, axis=1, keepdims=True)                   # (C, 1)
        ch2 = jnp.sum(hm * h, axis=1, keepdims=True)               # (C, 1)
        gs1 = jnp.dot(gmat, ch1, preferred_element_type=jnp.float32)   # (C, 1)
        gs2 = jnp.dot(gmat, ch2, preferred_element_type=jnp.float32)   # (C, 1)
        mean = gs1 * inv_count
        # one-pass E[x^2]-mean^2 can go slightly negative from cancellation -> clamp
        var = jnp.maximum(gs2 * inv_count - mean * mean, 0.0)
        a = gamma * jax.lax.rsqrt(var + GN_EPS)                    # (C, 1)
        d = beta - mean * a                                        # (C, 1)
        y = h * a + d
        if residual is not None:
            y = y + residual
        y = jnp.where(y >= 0, y, LEAKY_SLOPE * y)                  # LeakyReLU
        if zero_pad:
            y = y * mask                                           # zero the halo
        return y

    def kernel(x_ref, mask_ref, w1_ref, w2_ref, w3_ref,
               g1_ref, b1_ref, g2_ref, b2_ref, g3_ref, b3_ref,
               gm12_ref, gm3_ref, o_ref, pad_ref):
        mask = mask_ref[...]            # (1, PP)  1.0 at interior voxels, else 0.0

        # zero the halo margins of the staging buffer once per grid step (lane-aligned)
        pad_ref[:, 0:lm] = jnp.zeros((c1p, lm), MM_DTYPE)
        pad_ref[:, lm + pp:ppw] = jnp.zeros((c1p, ppw - lm - pp), MM_DTYPE)

        for b in range(b_blk):          # static unroll over the batch block
            x = x_ref[b]                # (C_in, PP) f32, padded-flat spatial on lanes

            # ---- conv1 (1x1x1) + GN1 + LReLU (halo zeroed == conv2 zero padding) ----
            h1 = jnp.dot(w1_ref[...], x.astype(MM_DTYPE),
                         preferred_element_type=jnp.float32)       # (C1P, PP)
            h1 = gn_act(h1, mask, gm12_ref[...], g1_ref[...], b1_ref[...], inv_cnt1,
                        zero_pad=True)

            # ---- conv2 (3x3x3, pad=1): stage h1 once (bf16), 27 accumulating dots
            #      against statically shifted windows -- no im2col materialization ----
            pad_ref[:, lm:lm + pp] = h1.astype(MM_DTYPE)
            h2 = None
            for t, s in enumerate(taps):                            # static unroll
                part = jnp.dot(w2_ref[t], pad_ref[:, lm + s:lm + s + pp],
                               preferred_element_type=jnp.float32)  # (C1P, PP)
                h2 = part if h2 is None else h2 + part
            h2 = gn_act(h2, mask, gm12_ref[...], g2_ref[...], b2_ref[...], inv_cnt1)

            # ---- conv3 (1x1x1) + GN3 + residual add + LReLU ----
            h3 = jnp.dot(w3_ref[...], h2.astype(MM_DTYPE),
                         preferred_element_type=jnp.float32)        # (C3, PP)
            y = gn_act(h3, mask, gm3_ref[...], g3_ref[...], b3_ref[...], inv_cnt3,
                       residual=x)
            o_ref[b] = y

    return kernel


# ---------------------------------------------------------------------------
# Wrapper: layout change once at entry/exit, weights pre-packed, single pallas_call
# ---------------------------------------------------------------------------
def bottleneck_forward(x, params, num_groups=2):
    n, c_in, d, h, w = x.shape
    w1, w2, w3 = params["w1"], params["w2"], params["w3"]
    c1 = w1.shape[0]
    c3 = w3.shape[0]
    assert c_in == c3, "identity residual requires in_c == channels*expansion"
    assert c1 % num_groups == 0 and c3 % num_groups == 0

    dp, hp, wp = d + 2, h + 2, w + 2          # zero-padded spatial (conv2 pad=1)
    p_flat = dp * hp * wp
    pp = _round_up(p_flat, 128)               # lane-padded flat spatial per sample
    c1p = _round_up(c1, 8)                    # bottleneck channels padded to 8 sublanes
    max_shift = hp * wp + wp + 1              # |(kd-1)*Hp*Wp + (kh-1)*Wp + (kw-1)|max
    lm = _round_up(max_shift, 128)            # halo margin in the shift buffer
    ppw = lm + pp + lm
    s_spatial = d * h * w
    taps = tuple((kd - 1) * hp * wp + (kh - 1) * wp + (kw - 1)
                 for kd, kh, kw in itertools.product(range(3), repeat=3))
    inv_cnt1 = 1.0 / float((c1 // num_groups) * s_spatial)
    inv_cnt3 = 1.0 / float((c3 // num_groups) * s_spatial)
    b_blk = _pick_batch_block(n)

    # --- single entry layout change: NCDHW -> [N, C, padded-flat spatial] ---
    xp = jnp.pad(x.astype(jnp.float32), ((0, 0), (0, 0), (1, 1), (1, 1), (1, 1)))
    xf = jnp.pad(xp.reshape(n, c_in, p_flat), ((0, 0), (0, 0), (0, pp - p_flat)))

    # interior-voxel mask in the padded-flat layout
    mask = jnp.pad(jnp.ones((d, h, w), jnp.float32), ((1, 1),) * 3)
    mask = jnp.pad(mask.reshape(1, p_flat), ((0, 0), (0, pp - p_flat)))

    # --- weights: channels-on-sublanes matmul layout, bottleneck C padded to 8 ---
    w1m = jnp.pad(w1.reshape(c1, c_in), ((0, c1p - c1), (0, 0))).astype(MM_DTYPE)
    w2p = jnp.pad(w2, ((0, c1p - c1), (0, c1p - c1), (0, 0), (0, 0), (0, 0)))
    # per-tap (OUT, IN) matrices; tap index t = (kd*3+kh)*3+kw matches `taps` order
    w2t = jnp.transpose(w2p, (2, 3, 4, 0, 1)).reshape(27, c1p, c1p).astype(MM_DTYPE)
    w3m = jnp.pad(w3.reshape(c3, c1), ((0, 0), (0, c1p - c1))).astype(MM_DTYPE)

    def col_vec(v, c_pad):
        return jnp.pad(v, (0, c_pad - v.shape[0])).reshape(c_pad, 1).astype(jnp.float32)

    g1, b1 = col_vec(params["g1"], c1p), col_vec(params["b1"], c1p)
    g2, b2 = col_vec(params["g2"], c1p), col_vec(params["b2"], c1p)
    g3, b3 = col_vec(params["g3"], c3), col_vec(params["b3"], c3)

    def group_mat(c_real, c_pad):
        cg = c_real // num_groups
        gid = jnp.arange(c_pad) // cg
        real = jnp.arange(c_pad) < c_real
        m = (gid[:, None] == gid[None, :]) & real[:, None] & real[None, :]
        return m.astype(jnp.float32)

    gm12 = group_mat(c1, c1p)     # shared by GN1 / GN2
    gm3 = group_mat(c3, c3)

    kernel = _make_bottleneck_kernel(b_blk, c1p, pp, ppw, lm, taps, inv_cnt1, inv_cnt3)
    full2 = lambda i: (0, 0)
    full3 = lambda i: (0, 0, 0)

    out_flat = pl.pallas_call(
        kernel,
        out_shape=jax.ShapeDtypeStruct((n, c3, pp), jnp.float32),
        grid=(n // b_blk,),
        in_specs=[
            pl.BlockSpec((b_blk, c_in, pp), lambda i: (i, 0, 0)),   # x (also residual)
            pl.BlockSpec((1, pp), full2),                           # interior mask
            pl.BlockSpec((c1p, c_in), full2),                       # w1
            pl.BlockSpec((27, c1p, c1p), full3),                    # w2 (per-tap mats)
            pl.BlockSpec((c3, c1p), full2),                         # w3
            pl.BlockSpec((c1p, 1), full2), pl.BlockSpec((c1p, 1), full2),  # g1, b1
            pl.BlockSpec((c1p, 1), full2), pl.BlockSpec((c1p, 1), full2),  # g2, b2
            pl.BlockSpec((c3, 1), full2), pl.BlockSpec((c3, 1), full2),    # g3, b3
            pl.BlockSpec((c1p, c1p), full2),                        # group matrix GN1/GN2
            pl.BlockSpec((c3, c3), full2),                          # group matrix GN3
        ],
        out_specs=pl.BlockSpec((b_blk, c3, pp), lambda i: (i, 0, 0)),
        scratch_shapes=[
            pltpu.VMEM((c1p, ppw), MM_DTYPE),       # halo'd GN1 output (bf16 staging)
        ],
        compiler_params=pltpu.CompilerParams(
            dimension_semantics=("parallel",),      # batch blocks across TCs (v7x)
            vmem_limit_bytes=48 * 1024 * 1024,      # safe on v7x 64 MiB, ample elsewhere
        ),
    )(xf, mask, w1m, w2t, w3m, g1, b1, g2, b2, g3, b3, gm12, gm3)

    # --- single exit layout change: padded-flat -> NCDHW interior ---
    out = out_flat[:, :, :p_flat].reshape(n, c3, dp, hp, wp)
    return out[:, :, 1:1 + d, 1:1 + h, 1:1 + w]


# ---------------------------------------------------------------------------
# Pure-JAX f32 reference (correctness check only)
# ---------------------------------------------------------------------------
def _lrelu(x):
    return jnp.where(x >= 0, x, LEAKY_SLOPE * x)


def _ref_groupnorm(x, gamma, beta, g):
    n, c, d, h, w = x.shape
    xg = x.reshape(n, g, -1)
    mean = xg.mean(axis=2, keepdims=True)
    var = ((xg - mean) ** 2).mean(axis=2, keepdims=True)
    xn = ((xg - mean) / jnp.sqrt(var + GN_EPS)).reshape(n, c, d, h, w)
    return xn * gamma.reshape(1, c, 1, 1, 1) + beta.reshape(1, c, 1, 1, 1)


def _ref_conv(x, w, pad):
    return jax.lax.conv_general_dilated(
        x, w, window_strides=(1, 1, 1), padding=pad,
        dimension_numbers=("NCDHW", "OIDHW", "NCDHW"))


def bottleneck_ref(x, p, g=2):
    out = _lrelu(_ref_groupnorm(_ref_conv(x, p["w1"], "VALID"), p["g1"], p["b1"], g))
    out = _lrelu(_ref_groupnorm(
        _ref_conv(out, p["w2"], [(1, 1), (1, 1), (1, 1)]), p["g2"], p["b2"], g))
    out = _ref_groupnorm(_ref_conv(out, p["w3"], "VALID"), p["g3"], p["b3"], g)
    return _lrelu(out + x)


# ---------------------------------------------------------------------------
if __name__ == "__main__":
    # Bottleneck(in_c=16, channels=4) -> out channels = channels*expansion = 16
    N, IN_C, CH, D, H, W = 2, 16, 4, 8, 8, 8
    EXP = 4
    NUM_GROUPS = 2

    key = jax.random.PRNGKey(0)
    k_x, k1, k2, k3, kg1, kg2, kg3 = jax.random.split(key, 7)

    x = jax.random.normal(k_x, (N, IN_C, D, H, W), dtype=jnp.float32)

    params = {
        "w1": 0.1 * jax.random.normal(k1, (CH, IN_C, 1, 1, 1), jnp.float32),
        "w2": 0.1 * jax.random.normal(k2, (CH, CH, 3, 3, 3), jnp.float32),
        "w3": 0.1 * jax.random.normal(k3, (CH * EXP, CH, 1, 1, 1), jnp.float32),
        "g1": 1.0 + 0.1 * jax.random.normal(kg1, (CH,), jnp.float32),
        "b1": jnp.zeros((CH,), jnp.float32),
        "g2": 1.0 + 0.1 * jax.random.normal(kg2, (CH,), jnp.float32),
        "b2": jnp.zeros((CH,), jnp.float32),
        "g3": 1.0 + 0.1 * jax.random.normal(kg3, (CH * EXP,), jnp.float32),
        "b3": jnp.zeros((CH * EXP,), jnp.float32),
    }

    out = jax.jit(bottleneck_forward)(x, params)
    out = jax.block_until_ready(out)

    ref = jax.block_until_ready(bottleneck_ref(x, params, NUM_GROUPS))
    assert out.shape == (N, CH * EXP, D, H, W)
    max_err = float(jnp.max(jnp.abs(out - ref)))
    # bf16 MXU operands (f32 accumulation) vs f32 reference: expected max |err| ~2-3e-2.
    assert jnp.allclose(out, ref, rtol=2e-2, atol=5e-2), max_err

    print("KERNEL_OK")
</pallas_src>

<mosaic_0001>
module attributes {stable_mosaic.version = 11 : i64} {
  func.func @kernel(%arg0: i32, %arg1: memref<1x16x1024xf32, #tpu.memory_space<vmem>>, %arg2: memref<1x1024xf32, #tpu.memory_space<vmem>>, %arg3: memref<8x16xbf16, #tpu.memory_space<vmem>>, %arg4: memref<27x8x8xbf16, #tpu.memory_space<vmem>>, %arg5: memref<16x8xbf16, #tpu.memory_space<vmem>>, %arg6: memref<8x1xf32, #tpu.memory_space<vmem>>, %arg7: memref<8x1xf32, #tpu.memory_space<vmem>>, %arg8: memref<8x1xf32, #tpu.memory_space<vmem>>, %arg9: memref<8x1xf32, #tpu.memory_space<vmem>>, %arg10: memref<16x1xf32, #tpu.memory_space<vmem>>, %arg11: memref<16x1xf32, #tpu.memory_space<vmem>>, %arg12: memref<8x8xf32, #tpu.memory_space<vmem>>, %arg13: memref<16x16xf32, #tpu.memory_space<vmem>>, %arg14: memref<1x16x1024xf32, #tpu.memory_space<vmem>>, %arg15: memref<8x1280xbf16, #tpu.memory_space<vmem>>) attributes {dimension_semantics = [#tpu.dimension_semantics<parallel>], iteration_bounds = array<i64: 2>, scalar_prefetch = 0 : i64, scratch_operands = 1 : i64, tpu.core_type = #tpu.core_type<tc>, window_params = [{transform_indices = @transform_0, window_bounds = array<i64: 1, 16, 1024>}, {pipeline_mode = #tpu.pipeline_mode<synchronous>, transform_indices = @transform_1, window_bounds = array<i64: 1, 1024>}, {pipeline_mode = #tpu.pipeline_mode<synchronous>, transform_indices = @transform_2, window_bounds = array<i64: 8, 16>}, {pipeline_mode = #tpu.pipeline_mode<synchronous>, transform_indices = @transform_3, window_bounds = array<i64: 27, 8, 8>}, {pipeline_mode = #tpu.pipeline_mode<synchronous>, transform_indices = @transform_4, window_bounds = array<i64: 16, 8>}, {pipeline_mode = #tpu.pipeline_mode<synchronous>, transform_indices = @transform_5, window_bounds = array<i64: 8, 1>}, {pipeline_mode = #tpu.pipeline_mode<synchronous>, transform_indices = @transform_6, window_bounds = array<i64: 8, 1>}, {pipeline_mode = #tpu.pipeline_mode<synchronous>, transform_indices = @transform_7, window_bounds = array<i64: 8, 1>}, {pipeline_mode = #tpu.pipeline_mode<synchronous>, transform_indices = @transform_8, window_bounds = array<i64: 8, 1>}, {pipeline_mode = #tpu.pipeline_mode<synchronous>, transform_indices = @transform_9, window_bounds = array<i64: 16, 1>}, {pipeline_mode = #tpu.pipeline_mode<synchronous>, transform_indices = @transform_10, window_bounds = array<i64: 16, 1>}, {pipeline_mode = #tpu.pipeline_mode<synchronous>, transform_indices = @transform_11, window_bounds = array<i64: 8, 8>}, {pipeline_mode = #tpu.pipeline_mode<synchronous>, transform_indices = @transform_12, window_bounds = array<i64: 16, 16>}, {transform_indices = @transform_13, window_bounds = array<i64: 1, 16, 1024>}]} {
    %c0 = arith.constant 0 : index
    %c0_0 = arith.constant 0 : index
    %0 = vector.load %arg2[%c0, %c0_0] : memref<1x1024xf32, #tpu.memory_space<vmem>>, vector<1x1024xf32>
    %cst = arith.constant 0.000000e+00 : bf16
    %1 = vector.broadcast %cst : bf16 to vector<8x128xbf16>
    %c0_1 = arith.constant 0 : index
    %c0_2 = arith.constant 0 : index
    %2 = vector.load %arg15[%c0_1, %c0_2] : memref<8x1280xbf16, #tpu.memory_space<vmem>>, vector<8x128xbf16>
    tpu.vector_store %arg15[%c0_1, %c0_2], %1 {strides = array<i32>} : memref<8x1280xbf16, #tpu.memory_space<vmem>>, vector<8x128xbf16>,
    %cst_3 = arith.constant 0.000000e+00 : bf16
    %3 = vector.broadcast %cst_3 : bf16 to vector<8x128xbf16>
    %c0_4 = arith.constant 0 : index
    %c1152 = arith.constant 1152 : index
    %4 = vector.load %arg15[%c0_4, %c1152] : memref<8x1280xbf16, #tpu.memory_space<vmem>>, vector<8x128xbf16>
    tpu.vector_store %arg15[%c0_4, %c1152], %3 {strides = array<i32>} : memref<8x1280xbf16, #tpu.memory_space<vmem>>, vector<8x128xbf16>,
    %c0_5 = arith.constant 0 : index
    %c0_6 = arith.constant 0 : index
    %c0_7 = arith.constant 0 : index
    %5 = vector.load %arg1[%c0_5, %c0_6, %c0_7] : memref<1x16x1024xf32, #tpu.memory_space<vmem>>, vector<1x16x1024xf32>
    %6 = vector.shape_cast %5 : vector<1x16x1024xf32> to vector<16x1024xf32>
    %c0_8 = arith.constant 0 : index
    %c0_9 = arith.constant 0 : index
    %7 = vector.load %arg3[%c0_8, %c0_9] : memref<8x16xbf16, #tpu.memory_space<vmem>>, vector<8x16xbf16>
    %8 = arith.truncf %6 : vector<16x1024xf32> to vector<16x1024xbf16>
    %cst_10 = arith.constant dense<0.000000e+00> : vector<8x1024xf32>
    %9 = tpu.matmul %7, %8, %cst_10 {dimension_numbers = #tpu.dot_dimension_numbers<[1], [0], [0], [1], [0, 0, 1, 1], [], []>} : vector<8x16xbf16>, vector<16x1024xbf16>, vector<8x1024xf32> -> vector<8x1024xf32>
    %c0_11 = arith.constant 0 : index
    %c0_12 = arith.constant 0 : index
    %10 = vector.load %arg12[%c0_11, %c0_12] : memref<8x8xf32, #tpu.memory_space<vmem>>, vector<8x8xf32>
    %c0_13 = arith.constant 0 : index
    %c0_14 = arith.constant 0 : index
    %11 = vector.load %arg6[%c0_13, %c0_14] : memref<8x1xf32, #tpu.memory_space<vmem>>, vector<8x1xf32>
    %c0_15 = arith.constant 0 : index
    %c0_16 = arith.constant 0 : index
    %12 = vector.load %arg7[%c0_15, %c0_16] : memref<8x1xf32, #tpu.memory_space<vmem>>, vector<8x1xf32>
    %13 = vector.broadcast %0 : vector<1x1024xf32> to vector<8x1024xf32>
    %14 = arith.mulf %9, %13 : vector<8x1024xf32>
    %cst_17 = arith.constant dense<0.000000e+00> : vector<8xf32>
    %15 = vector.multi_reduction <add>, %14, %cst_17 [1] : vector<8x1024xf32> to vector<8xf32>
    %16 = vector.shape_cast %15 : vector<8xf32> to vector<8x1xf32>
    %17 = arith.mulf %14, %9 : vector<8x1024xf32>
    %cst_18 = arith.constant dense<0.000000e+00> : vector<8xf32>
    %18 = vector.multi_reduction <add>, %17, %cst_18 [1] : vector<8x1024xf32> to vector<8xf32>
    %19 = vector.shape_cast %18 : vector<8xf32> to vector<8x1xf32>
    %cst_19 = arith.constant dense<0.000000e+00> : vector<8x1xf32>
    %20 = tpu.matmul %10, %16, %cst_19 {dimension_numbers = #tpu.dot_dimension_numbers<[1], [0], [0], [1], [0, 0, 1, 1], [], []>} : vector<8x8xf32>, vector<8x1xf32>, vector<8x1xf32> -> vector<8x1xf32>
    %cst_20 = arith.constant dense<0.000000e+00> : vector<8x1xf32>
    %21 = tpu.matmul %10, %19, %cst_20 {dimension_numbers = #tpu.dot_dimension_numbers<[1], [0], [0], [1], [0, 0, 1, 1], [], []>} : vector<8x8xf32>, vector<8x1xf32>, vector<8x1xf32> -> vector<8x1xf32>
    %cst_21 = arith.constant 9.765625E-4 : f32
    %22 = vector.broadcast %cst_21 : f32 to vector<8x1xf32>
    %23 = arith.mulf %20, %22 : vector<8x1xf32>
    %cst_22 = arith.constant 9.765625E-4 : f32
    %24 = vector.broadcast %cst_22 : f32 to vector<8x1xf32>
    %25 = arith.mulf %21, %24 : vector<8x1xf32>
    %26 = arith.mulf %23, %23 : vector<8x1xf32>
    %27 = arith.subf %25, %26 : vector<8x1xf32>
    %cst_23 = arith.constant 0.000000e+00 : f32
    %28 = vector.broadcast %cst_23 : f32 to vector<8x1xf32>
    %29 = arith.maximumf %27, %28 : vector<8x1xf32>
    %cst_24 = arith.constant 9.99999974E-6 : f32
    %30 = vector.broadcast %cst_24 : f32 to vector<8x1xf32>
    %31 = arith.addf %29, %30 : vector<8x1xf32>
    %32 = math.rsqrt %31 : vector<8x1xf32>
    %33 = arith.mulf %11, %32 : vector<8x1xf32>
    %34 = arith.mulf %23, %33 : vector<8x1xf32>
    %35 = arith.subf %12, %34 : vector<8x1xf32>
    %36 = vector.broadcast %33 : vector<8x1xf32> to vector<8x1024xf32>
    %37 = arith.mulf %9, %36 : vector<8x1024xf32>
    %38 = vector.broadcast %35 : vector<8x1xf32> to vector<8x1024xf32>
    %39 = arith.addf %37, %38 : vector<8x1024xf32>
    %cst_25 = arith.constant 0.000000e+00 : f32
    %40 = vector.broadcast %cst_25 : f32 to vector<8x1024xf32>
    %41 = arith.cmpf oge, %39, %40 : vector<8x1024xf32>
    %cst_26 = arith.constant 0.00999999977 : f32
    %42 = vector.broadcast %cst_26 : f32 to vector<8x1024xf32>
    %43 = arith.mulf %42, %39 : vector<8x1024xf32>
    %44 = arith.select %41, %39, %43 : vector<8x1024xi1>, vector<8x1024xf32>
    %45 = vector.broadcast %0 : vector<1x1024xf32> to vector<8x1024xf32>
    %46 = arith.mulf %44, %45 : vector<8x1024xf32>
    %47 = arith.truncf %46 : vector<8x1024xf32> to vector<8x1024xbf16>
    %c0_27 = arith.constant 0 : index
    %c128 = arith.constant 128 : index
    %48 = vector.load %arg15[%c0_27, %c128] : memref<8x1280xbf16, #tpu.memory_space<vmem>>, vector<8x1024xbf16>
    tpu.vector_store %arg15[%c0_27, %c128], %47 {strides = array<i32>} : memref<8x1280xbf16, #tpu.memory_space<vmem>>, vector<8x1024xbf16>,
    %c0_28 = arith.constant 0 : index
    %c0_29 = arith.constant 0 : index
    %c0_30 = arith.constant 0 : index
    %49 = vector.load %arg4[%c0_28, %c0_29, %c0_30] : memref<27x8x8xbf16, #tpu.memory_space<vmem>>, vector<1x8x8xbf16>
    %50 = vector.shape_cast %49 : vector<1x8x8xbf16> to vector<8x8xbf16>
    %c0_31 = arith.constant 0 : index
    %c17 = arith.constant 17 : index
    %51 = vector.load %arg15[%c0_31, %c17] : memref<8x1280xbf16, #tpu.memory_space<vmem>>, vector<8x1024xbf16>
    %cst_32 = arith.constant dense<0.000000e+00> : vector<8x1024xf32>
    %52 = tpu.matmul %50, %51, %cst_32 {dimension_numbers = #tpu.dot_dimension_numbers<[1], [0], [0], [1], [0, 0, 1, 1], [], []>} : vector<8x8xbf16>, vector<8x1024xbf16>, vector<8x1024xf32> -> vector<8x1024xf32>
    %c1 = arith.constant 1 : index
    %c0_33 = arith.constant 0 : index
    %c0_34 = arith.constant 0 : index
    %53 = vector.load %arg4[%c1, %c0_33, %c0_34] : memref<27x8x8xbf16, #tpu.memory_space<vmem>>, vector<1x8x8xbf16>
    %54 = vector.shape_cast %53 : vector<1x8x8xbf16> to vector<8x8xbf16>
    %c0_35 = arith.constant 0 : index
    %c18 = arith.constant 18 : index
    %55 = vector.load %arg15[%c0_35, %c18] : memref<8x1280xbf16, #tpu.memory_space<vmem>>, vector<8x1024xbf16>
    %cst_36 = arith.constant dense<0.000000e+00> : vector<8x1024xf32>
    %56 = tpu.matmul %54, %55, %cst_36 {dimension_numbers = #tpu.dot_dimension_numbers<[1], [0], [0], [1], [0, 0, 1, 1], [], []>} : vector<8x8xbf16>, vector<8x1024xbf16>, vector<8x1024xf32> -> vector<8x1024xf32>
    %57 = arith.addf %52, %56 : vector<8x1024xf32>
    %c2 = arith.constant 2 : index
    %c0_37 = arith.constant 0 : index
    %c0_38 = arith.constant 0 : index
    %58 = vector.load %arg4[%c2, %c0_37, %c0_38] : memref<27x8x8xbf16, #tpu.memory_space<vmem>>, vector<1x8x8xbf16>
    %59 = vector.shape_cast %58 : vector<1x8x8xbf16> to vector<8x8xbf16>
    %c0_39 = arith.constant 0 : index
    %c19 = arith.constant 19 : index
    %60 = vector.load %arg15[%c0_39, %c19] : memref<8x1280xbf16, #tpu.memory_space<vmem>>, vector<8x1024xbf16>
    %cst_40 = arith.constant dense<0.000000e+00> : vector<8x1024xf32>
    %61 = tpu.matmul %59, %60, %cst_40 {dimension_numbers = #tpu.dot_dimension_numbers<[1], [0], [0], [1], [0, 0, 1, 1], [], []>} : vector<8x8xbf16>, vector<8x1024xbf16>, vector<8x1024xf32> -> vector<8x1024xf32>
    %62 = arith.addf %57, %61 : vector<8x1024xf32>
    %c3 = arith.constant 3 : index
    %c0_41 = arith.constant 0 : index
    %c0_42 = arith.constant 0 : index
    %63 = vector.load %arg4[%c3, %c0_41, %c0_42] : memref<27x8x8xbf16, #tpu.memory_space<vmem>>, vector<1x8x8xbf16>
    %64 = vector.shape_cast %63 : vector<1x8x8xbf16> to vector<8x8xbf16>
    %c0_43 = arith.constant 0 : index
    %c27 = arith.constant 27 : index
    %65 = vector.load %arg15[%c0_43, %c27] : memref<8x1280xbf16, #tpu.memory_space<vmem>>, vector<8x1024xbf16>
    %cst_44 = arith.constant dense<0.000000e+00> : vector<8x1024xf32>
    %66 = tpu.matmul %64, %65, %cst_44 {dimension_numbers = #tpu.dot_dimension_numbers<[1], [0], [0], [1], [0, 0, 1, 1], [], []>} : vector<8x8xbf16>, vector<8x1024xbf16>, vector<8x1024xf32> -> vector<8x1024xf32>
    %67 = arith.addf %62, %66 : vector<8x1024xf32>
    %c4 = arith.constant 4 : index
    %c0_45 = arith.constant 0 : index
    %c0_46 = arith.constant 0 : index
    %68 = vector.load %arg4[%c4, %c0_45, %c0_46] : memref<27x8x8xbf16, #tpu.memory_space<vmem>>, vector<1x8x8xbf16>
    %69 = vector.shape_cast %68 : vector<1x8x8xbf16> to vector<8x8xbf16>
    %c0_47 = arith.constant 0 : index
    %c28 = arith.constant 28 : index
    %70 = vector.load %arg15[%c0_47, %c28] : memref<8x1280xbf16, #tpu.memory_space<vmem>>, vector<8x1024xbf16>
    %cst_48 = arith.constant dense<0.000000e+00> : vector<8x1024xf32>
    %71 = tpu.matmul %69, %70, %cst_48 {dimension_numbers = #tpu.dot_dimension_numbers<[1], [0], [0], [1], [0, 0, 1, 1], [], []>} : vector<8x8xbf16>, vector<8x1024xbf16>, vector<8x1024xf32> -> vector<8x1024xf32>
    %72 = arith.addf %67, %71 : vector<8x1024xf32>
    %c5 = arith.constant 5 : index
    %c0_49 = arith.constant 0 : index
    %c0_50 = arith.constant 0 : index
    %73 = vector.load %arg4[%c5, %c0_49, %c0_50] : memref<27x8x8xbf16, #tpu.memory_space<vmem>>, vector<1x8x8xbf16>
    %74 = vector.shape_cast %73 : vector<1x8x8xbf16> to vector<8x8xbf16>
    %c0_51 = arith.constant 0 : index
    %c29 = arith.constant 29 : index
    %75 = vector.load %arg15[%c0_51, %c29] : memref<8x1280xbf16, #tpu.memory_space<vmem>>, vector<8x1024xbf16>
    %cst_52 = arith.constant dense<0.000000e+00> : vector<8x1024xf32>
    %76 = tpu.matmul %74, %75, %cst_52 {dimension_numbers = #tpu.dot_dimension_numbers<[1], [0], [0], [1], [0, 0, 1, 1], [], []>} : vector<8x8xbf16>, vector<8x1024xbf16>, vector<8x1024xf32> -> vector<8x1024xf32>
    %77 = arith.addf %72, %76 : vector<8x1024xf32>
    %c6 = arith.constant 6 : index
    %c0_53 = arith.constant 0 : index
    %c0_54 = arith.constant 0 : index
    %78 = vector.load %arg4[%c6, %c0_53, %c0_54] : memref<27x8x8xbf16, #tpu.memory_space<vmem>>, vector<1x8x8xbf16>
    %79 = vector.shape_cast %78 : vector<1x8x8xbf16> to vector<8x8xbf16>
    %c0_55 = arith.constant 0 : index
    %c37 = arith.constant 37 : index
    %80 = vector.load %arg15[%c0_55, %c37] : memref<8x1280xbf16, #tpu.memory_space<vmem>>, vector<8x1024xbf16>
    %cst_56 = arith.constant dense<0.000000e+00> : vector<8x1024xf32>
    %81 = tpu.matmul %79, %80, %cst_56 {dimension_numbers = #tpu.dot_dimension_numbers<[1], [0], [0], [1], [0, 0, 1, 1], [], []>} : vector<8x8xbf16>, vector<8x1024xbf16>, vector<8x1024xf32> -> vector<8x1024xf32>
    %82 = arith.addf %77, %81 : vector<8x1024xf32>
    %c7 = arith.constant 7 : index
    %c0_57 = arith.constant 0 : index
    %c0_58 = arith.constant 0 : index
    %83 = vector.load %arg4[%c7, %c0_57, %c0_58] : memref<27x8x8xbf16, #tpu.memory_space<vmem>>, vector<1x8x8xbf16>
    %84 = vector.shape_cast %83 : vector<1x8x8xbf16> to vector<8x8xbf16>
    %c0_59 = arith.constant 0 : index
    %c38 = arith.constant 38 : index
    %85 = vector.load %arg15[%c0_59, %c38] : memref<8x1280xbf16, #tpu.memory_space<vmem>>, vector<8x1024xbf16>
    %cst_60 = arith.constant dense<0.000000e+00> : vector<8x1024xf32>
    %86 = tpu.matmul %84, %85, %cst_60 {dimension_numbers = #tpu.dot_dimension_numbers<[1], [0], [0], [1], [0, 0, 1, 1], [], []>} : vector<8x8xbf16>, vector<8x1024xbf16>, vector<8x1024xf32> -> vector<8x1024xf32>
    %87 = arith.addf %82, %86 : vector<8x1024xf32>
    %c8 = arith.constant 8 : index
    %c0_61 = arith.constant 0 : index
    %c0_62 = arith.constant 0 : index
    %88 = vector.load %arg4[%c8, %c0_61, %c0_62] : memref<27x8x8xbf16, #tpu.memory_space<vmem>>, vector<1x8x8xbf16>
    %89 = vector.shape_cast %88 : vector<1x8x8xbf16> to vector<8x8xbf16>
    %c0_63 = arith.constant 0 : index
    %c39 = arith.constant 39 : index
    %90 = vector.load %arg15[%c0_63, %c39] : memref<8x1280xbf16, #tpu.memory_space<vmem>>, vector<8x1024xbf16>
    %cst_64 = arith.constant dense<0.000000e+00> : vector<8x1024xf32>
    %91 = tpu.matmul %89, %90, %cst_64 {dimension_numbers = #tpu.dot_dimension_numbers<[1], [0], [0], [1], [0, 0, 1, 1], [], []>} : vector<8x8xbf16>, vector<8x1024xbf16>, vector<8x1024xf32> -> vector<8x1024xf32>
    %92 = arith.addf %87, %91 : vector<8x1024xf32>
    %c9 = arith.constant 9 : index
    %c0_65 = arith.constant 0 : index
    %c0_66 = arith.constant 0 : index
    %93 = vector.load %arg4[%c9, %c0_65, %c0_66] : memref<27x8x8xbf16, #tpu.memory_space<vmem>>, vector<1x8x8xbf16>
    %94 = vector.shape_cast %93 : vector<1x8x8xbf16> to vector<8x8xbf16>
    %c0_67 = arith.constant 0 : index
    %c117 = arith.constant 117 : index
    %95 = vector.load %arg15[%c0_67, %c117] : memref<8x1280xbf16, #tpu.memory_space<vmem>>, vector<8x1024xbf16>
    %cst_68 = arith.constant dense<0.000000e+00> : vector<8x1024xf32>
    %96 = tpu.matmul %94, %95, %cst_68 {dimension_numbers = #tpu.dot_dimension_numbers<[1], [0], [0], [1], [0, 0, 1, 1], [], []>} : vector<8x8xbf16>, vector<8x1024xbf16>, vector<8x1024xf32> -> vector<8x1024xf32>
    %97 = arith.addf %92, %96 : vector<8x1024xf32>
    %c10 = arith.constant 10 : index
    %c0_69 = arith.constant 0 : index
    %c0_70 = arith.constant 0 : index
    %98 = vector.load %arg4[%c10, %c0_69, %c0_70] : memref<27x8x8xbf16, #tpu.memory_space<vmem>>, vector<1x8x8xbf16>
    %99 = vector.shape_cast %98 : vector<1x8x8xbf16> to vector<8x8xbf16>
    %c0_71 = arith.constant 0 : index
    %c118 = arith.constant 118 : index
    %100 = vector.load %arg15[%c0_71, %c118] : memref<8x1280xbf16, #tpu.memory_space<vmem>>, vector<8x1024xbf16>
    %cst_72 = arith.constant dense<0.000000e+00> : vector<8x1024xf32>
    %101 = tpu.matmul %99, %100, %cst_72 {dimension_numbers = #tpu.dot_dimension_numbers<[1], [0], [0], [1], [0, 0, 1, 1], [], []>} : vector<8x8xbf16>, vector<8x1024xbf16>, vector<8x1024xf32> -> vector<8x1024xf32>
    %102 = arith.addf %97, %101 : vector<8x1024xf32>
    %c11 = arith.constant 11 : index
    %c0_73 = arith.constant 0 : index
    %c0_74 = arith.constant 0 : index
    %103 = vector.load %arg4[%c11, %c0_73, %c0_74] : memref<27x8x8xbf16, #tpu.memory_space<vmem>>, vector<1x8x8xbf16>
    %104 = vector.shape_cast %103 : vector<1x8x8xbf16> to vector<8x8xbf16>
    %c0_75 = arith.constant 0 : index
    %c119 = arith.constant 119 : index
    %105 = vector.load %arg15[%c0_75, %c119] : memref<8x1280xbf16, #tpu.memory_space<vmem>>, vector<8x1024xbf16>
    %cst_76 = arith.constant dense<0.000000e+00> : vector<8x1024xf32>
    %106 = tpu.matmul %104, %105, %cst_76 {dimension_numbers = #tpu.dot_dimension_numbers<[1], [0], [0], [1], [0, 0, 1, 1], [], []>} : vector<8x8xbf16>, vector<8x1024xbf16>, vector<8x1024xf32> -> vector<8x1024xf32>
    %107 = arith.addf %102, %106 : vector<8x1024xf32>
    %c12 = arith.constant 12 : index
    %c0_77 = arith.constant 0 : index
    %c0_78 = arith.constant 0 : index
    %108 = vector.load %arg4[%c12, %c0_77, %c0_78] : memref<27x8x8xbf16, #tpu.memory_space<vmem>>, vector<1x8x8xbf16>
    %109 = vector.shape_cast %108 : vector<1x8x8xbf16> to vector<8x8xbf16>
    %c0_79 = arith.constant 0 : index
    %c127 = arith.constant 127 : index
    %110 = vector.load %arg15[%c0_79, %c127] : memref<8x1280xbf16, #tpu.memory_space<vmem>>, vector<8x1024xbf16>
    %cst_80 = arith.constant dense<0.000000e+00> : vector<8x1024xf32>
    %111 = tpu.matmul %109, %110, %cst_80 {dimension_numbers = #tpu.dot_dimension_numbers<[1], [0], [0], [1], [0, 0, 1, 1], [], []>} : vector<8x8xbf16>, vector<8x1024xbf16>, vector<8x1024xf32> -> vector<8x1024xf32>
    %112 = arith.addf %107, %111 : vector<8x1024xf32>
    %c13 = arith.constant 13 : index
    %c0_81 = arith.constant 0 : index
    %c0_82 = arith.constant 0 : index
    %113 = vector.load %arg4[%c13, %c0_81, %c0_82] : memref<27x8x8xbf16, #tpu.memory_space<vmem>>, vector<1x8x8xbf16>
    %114 = vector.shape_cast %113 : vector<1x8x8xbf16> to vector<8x8xbf16>
    %c0_83 = arith.constant 0 : index
    %c128_84 = arith.constant 128 : index
    %115 = vector.load %arg15[%c0_83, %c128_84] : memref<8x1280xbf16, #tpu.memory_space<vmem>>, vector<8x1024xbf16>
    %cst_85 = arith.constant dense<0.000000e+00> : vector<8x1024xf32>
    %116 = tpu.matmul %114, %115, %cst_85 {dimension_numbers = #tpu.dot_dimension_numbers<[1], [0], [0], [1], [0, 0, 1, 1], [], []>} : vector<8x8xbf16>, vector<8x1024xbf16>, vector<8x1024xf32> -> vector<8x1024xf32>
    %117 = arith.addf %112, %116 : vector<8x1024xf32>
    %c14 = arith.constant 14 : index
    %c0_86 = arith.constant 0 : index
    %c0_87 = arith.constant 0 : index
    %118 = vector.load %arg4[%c14, %c0_86, %c0_87] : memref<27x8x8xbf16, #tpu.memory_space<vmem>>, vector<1x8x8xbf16>
    %119 = vector.shape_cast %118 : vector<1x8x8xbf16> to vector<8x8xbf16>
    %c0_88 = arith.constant 0 : index
    %c129 = arith.constant 129 : index
    %120 = vector.load %arg15[%c0_88, %c129] : memref<8x1280xbf16, #tpu.memory_space<vmem>>, vector<8x1024xbf16>
    %cst_89 = arith.constant dense<0.000000e+00> : vector<8x1024xf32>
    %121 = tpu.matmul %119, %120, %cst_89 {dimension_numbers = #tpu.dot_dimension_numbers<[1], [0], [0], [1], [0, 0, 1, 1], [], []>} : vector<8x8xbf16>, vector<8x1024xbf16>, vector<8x1024xf32> -> vector<8x1024xf32>
    %122 = arith.addf %117, %121 : vector<8x1024xf32>
    %c15 = arith.constant 15 : index
    %c0_90 = arith.constant 0 : index
    %c0_91 = arith.constant 0 : index
    %123 = vector.load %arg4[%c15, %c0_90, %c0_91] : memref<27x8x8xbf16, #tpu.memory_space<vmem>>, vector<1x8x8xbf16>
    %124 = vector.shape_cast %123 : vector<1x8x8xbf16> to vector<8x8xbf16>
    %c0_92 = arith.constant 0 : index
    %c137 = arith.constant 137 : index
    %125 = vector.load %arg15[%c0_92, %c137] : memref<8x1280xbf16, #tpu.memory_space<vmem>>, vector<8x1024xbf16>
    %cst_93 = arith.constant dense<0.000000e+00> : vector<8x1024xf32>
    %126 = tpu.matmul %124, %125, %cst_93 {dimension_numbers = #tpu.dot_dimension_numbers<[1], [0], [0], [1], [0, 0, 1, 1], [], []>} : vector<8x8xbf16>, vector<8x1024xbf16>, vector<8x1024xf32> -> vector<8x1024xf32>
    %127 = arith.addf %122, %126 : vector<8x1024xf32>
    %c16 = arith.constant 16 : index
    %c0_94 = arith.constant 0 : index
    %c0_95 = arith.constant 0 : index
    %128 = vector.load %arg4[%c16, %c0_94, %c0_95] : memref<27x8x8xbf16, #tpu.memory_space<vmem>>, vector<1x8x8xbf16>
    %129 = vector.shape_cast %128 : vector<1x8x8xbf16> to vector<8x8xbf16>
    %c0_96 = arith.constant 0 : index
    %c138 = arith.constant 138 : index
    %130 = vector.load %arg15[%c0_96, %c138] : memref<8x1280xbf16, #tpu.memory_space<vmem>>, vector<8x1024xbf16>
    %cst_97 = arith.constant dense<0.000000e+00> : vector<8x1024xf32>
    %131 = tpu.matmul %129, %130, %cst_97 {dimension_numbers = #tpu.dot_dimension_numbers<[1], [0], [0], [1], [0, 0, 1, 1], [], []>} : vector<8x8xbf16>, vector<8x1024xbf16>, vector<8x1024xf32> -> vector<8x1024xf32>
    %132 = arith.addf %127, %131 : vector<8x1024xf32>
    %c17_98 = arith.constant 17 : index
    %c0_99 = arith.constant 0 : index
    %c0_100 = arith.constant 0 : index
    %133 = vector.load %arg4[%c17_98, %c0_99, %c0_100] : memref<27x8x8xbf16, #tpu.memory_space<vmem>>, vector<1x8x8xbf16>
    %134 = vector.shape_cast %133 : vector<1x8x8xbf16> to vector<8x8xbf16>
    %c0_101 = arith.constant 0 : index
    %c139 = arith.constant 139 : index
    %135 = vector.load %arg15[%c0_101, %c139] : memref<8x1280xbf16, #tpu.memory_space<vmem>>, vector<8x1024xbf16>
    %cst_102 = arith.constant dense<0.000000e+00> : vector<8x1024xf32>
    %136 = tpu.matmul %134, %135, %cst_102 {dimension_numbers = #tpu.dot_dimension_numbers<[1], [0], [0], [1], [0, 0, 1, 1], [], []>} : vector<8x8xbf16>, vector<8x1024xbf16>, vector<8x1024xf32> -> vector<8x1024xf32>
    %137 = arith.addf %132, %136 : vector<8x1024xf32>
    %c18_103 = arith.constant 18 : index
    %c0_104 = arith.constant 0 : index
    %c0_105 = arith.constant 0 : index
    %138 = vector.load %arg4[%c18_103, %c0_104, %c0_105] : memref<27x8x8xbf16, #tpu.memory_space<vmem>>, vector<1x8x8xbf16>
    %139 = vector.shape_cast %138 : vector<1x8x8xbf16> to vector<8x8xbf16>
    %c0_106 = arith.constant 0 : index
    %c217 = arith.constant 217 : index
    %140 = vector.load %arg15[%c0_106, %c217] : memref<8x1280xbf16, #tpu.memory_space<vmem>>, vector<8x1024xbf16>
    %cst_107 = arith.constant dense<0.000000e+00> : vector<8x1024xf32>
    %141 = tpu.matmul %139, %140, %cst_107 {dimension_numbers = #tpu.dot_dimension_numbers<[1], [0], [0], [1], [0, 0, 1, 1], [], []>} : vector<8x8xbf16>, vector<8x1024xbf16>, vector<8x1024xf32> -> vector<8x1024xf32>
    %142 = arith.addf %137, %141 : vector<8x1024xf32>
    %c19_108 = arith.constant 19 : index
    %c0_109 = arith.constant 0 : index
    %c0_110 = arith.constant 0 : index
    %143 = vector.load %arg4[%c19_108, %c0_109, %c0_110] : memref<27x8x8xbf16, #tpu.memory_space<vmem>>, vector<1x8x8xbf16>
    %144 = vector.shape_cast %143 : vector<1x8x8xbf16> to vector<8x8xbf16>
    %c0_111 = arith.constant 0 : index
    %c218 = arith.constant 218 : index
    %145 = vector.load %arg15[%c0_111, %c218] : memref<8x1280xbf16, #tpu.memory_space<vmem>>, vector<8x1024xbf16>
    %cst_112 = arith.constant dense<0.000000e+00> : vector<8x1024xf32>
    %146 = tpu.matmul %144, %145, %cst_112 {dimension_numbers = #tpu.dot_dimension_numbers<[1], [0], [0], [1], [0, 0, 1, 1], [], []>} : vector<8x8xbf16>, vector<8x1024xbf16>, vector<8x1024xf32> -> vector<8x1024xf32>
    %147 = arith.addf %142, %146 : vector<8x1024xf32>
    %c20 = arith.constant 20 : index
    %c0_113 = arith.constant 0 : index
    %c0_114 = arith.constant 0 : index
    %148 = vector.load %arg4[%c20, %c0_113, %c0_114] : memref<27x8x8xbf16, #tpu.memory_space<vmem>>, vector<1x8x8xbf16>
    %149 = vector.shape_cast %148 : vector<1x8x8xbf16> to vector<8x8xbf16>
    %c0_115 = arith.constant 0 : index
    %c219 = arith.constant 219 : index
    %150 = vector.load %arg15[%c0_115, %c219] : memref<8x1280xbf16, #tpu.memory_space<vmem>>, vector<8x1024xbf16>
    %cst_116 = arith.constant dense<0.000000e+00> : vector<8x1024xf32>
    %151 = tpu.matmul %149, %150, %cst_116 {dimension_numbers = #tpu.dot_dimension_numbers<[1], [0], [0], [1], [0, 0, 1, 1], [], []>} : vector<8x8xbf16>, vector<8x1024xbf16>, vector<8x1024xf32> -> vector<8x1024xf32>
    %152 = arith.addf %147, %151 : vector<8x1024xf32>
    %c21 = arith.constant 21 : index
    %c0_117 = arith.constant 0 : index
    %c0_118 = arith.constant 0 : index
    %153 = vector.load %arg4[%c21, %c0_117, %c0_118] : memref<27x8x8xbf16, #tpu.memory_space<vmem>>, vector<1x8x8xbf16>
    %154 = vector.shape_cast %153 : vector<1x8x8xbf16> to vector<8x8xbf16>
    %c0_119 = arith.constant 0 : index
    %c227 = arith.constant 227 : index
    %155 = vector.load %arg15[%c0_119, %c227] : memref<8x1280xbf16, #tpu.memory_space<vmem>>, vector<8x1024xbf16>
    %cst_120 = arith.constant dense<0.000000e+00> : vector<8x1024xf32>
    %156 = tpu.matmul %154, %155, %cst_120 {dimension_numbers = #tpu.dot_dimension_numbers<[1], [0], [0], [1], [0, 0, 1, 1], [], []>} : vector<8x8xbf16>, vector<8x1024xbf16>, vector<8x1024xf32> -> vector<8x1024xf32>
    %157 = arith.addf %152, %156 : vector<8x1024xf32>
    %c22 = arith.constant 22 : index
    %c0_121 = arith.constant 0 : index
    %c0_122 = arith.constant 0 : index
    %158 = vector.load %arg4[%c22, %c0_121, %c0_122] : memref<27x8x8xbf16, #tpu.memory_space<vmem>>, vector<1x8x8xbf16>
    %159 = vector.shape_cast %158 : vector<1x8x8xbf16> to vector<8x8xbf16>
    %c0_123 = arith.constant 0 : index
    %c228 = arith.constant 228 : index
    %160 = vector.load %arg15[%c0_123, %c228] : memref<8x1280xbf16, #tpu.memory_space<vmem>>, vector<8x1024xbf16>
    %cst_124 = arith.constant dense<0.000000e+00> : vector<8x1024xf32>
    %161 = tpu.matmul %159, %160, %cst_124 {dimension_numbers = #tpu.dot_dimension_numbers<[1], [0], [0], [1], [0, 0, 1, 1], [], []>} : vector<8x8xbf16>, vector<8x1024xbf16>, vector<8x1024xf32> -> vector<8x1024xf32>
    %162 = arith.addf %157, %161 : vector<8x1024xf32>
    %c23 = arith.constant 23 : index
    %c0_125 = arith.constant 0 : index
    %c0_126 = arith.constant 0 : index
    %163 = vector.load %arg4[%c23, %c0_125, %c0_126] : memref<27x8x8xbf16, #tpu.memory_space<vmem>>, vector<1x8x8xbf16>
    %164 = vector.shape_cast %163 : vector<1x8x8xbf16> to vector<8x8xbf16>
    %c0_127 = arith.constant 0 : index
    %c229 = arith.constant 229 : index
    %165 = vector.load %arg15[%c0_127, %c229] : memref<8x1280xbf16, #tpu.memory_space<vmem>>, vector<8x1024xbf16>
    %cst_128 = arith.constant dense<0.000000e+00> : vector<8x1024xf32>
    %166 = tpu.matmul %164, %165, %cst_128 {dimension_numbers = #tpu.dot_dimension_numbers<[1], [0], [0], [1], [0, 0, 1, 1], [], []>} : vector<8x8xbf16>, vector<8x1024xbf16>, vector<8x1024xf32> -> vector<8x1024xf32>
    %167 = arith.addf %162, %166 : vector<8x1024xf32>
    %c24 = arith.constant 24 : index
    %c0_129 = arith.constant 0 : index
    %c0_130 = arith.constant 0 : index
    %168 = vector.load %arg4[%c24, %c0_129, %c0_130] : memref<27x8x8xbf16, #tpu.memory_space<vmem>>, vector<1x8x8xbf16>
    %169 = vector.shape_cast %168 : vector<1x8x8xbf16> to vector<8x8xbf16>
    %c0_131 = arith.constant 0 : index
    %c237 = arith.constant 237 : index
    %170 = vector.load %arg15[%c0_131, %c237] : memref<8x1280xbf16, #tpu.memory_space<vmem>>, vector<8x1024xbf16>
    %cst_132 = arith.constant dense<0.000000e+00> : vector<8x1024xf32>
    %171 = tpu.matmul %169, %170, %cst_132 {dimension_numbers = #tpu.dot_dimension_numbers<[1], [0], [0], [1], [0, 0, 1, 1], [], []>} : vector<8x8xbf16>, vector<8x1024xbf16>, vector<8x1024xf32> -> vector<8x1024xf32>
    %172 = arith.addf %167, %171 : vector<8x1024xf32>
    %c25 = arith.constant 25 : index
    %c0_133 = arith.constant 0 : index
    %c0_134 = arith.constant 0 : index
    %173 = vector.load %arg4[%c25, %c0_133, %c0_134] : memref<27x8x8xbf16, #tpu.memory_space<vmem>>, vector<1x8x8xbf16>
    %174 = vector.shape_cast %173 : vector<1x8x8xbf16> to vector<8x8xbf16>
    %c0_135 = arith.constant 0 : index
    %c238 = arith.constant 238 : index
    %175 = vector.load %arg15[%c0_135, %c238] : memref<8x1280xbf16, #tpu.memory_space<vmem>>, vector<8x1024xbf16>
    %cst_136 = arith.constant dense<0.000000e+00> : vector<8x1024xf32>
    %176 = tpu.matmul %174, %175, %cst_136 {dimension_numbers = #tpu.dot_dimension_numbers<[1], [0], [0], [1], [0, 0, 1, 1], [], []>} : vector<8x8xbf16>, vector<8x1024xbf16>, vector<8x1024xf32> -> vector<8x1024xf32>
    %177 = arith.addf %172, %176 : vector<8x1024xf32>
    %c26 = arith.constant 26 : index
    %c0_137 = arith.constant 0 : index
    %c0_138 = arith.constant 0 : index
    %178 = vector.load %arg4[%c26, %c0_137, %c0_138] : memref<27x8x8xbf16, #tpu.memory_space<vmem>>, vector<1x8x8xbf16>
    %179 = vector.shape_cast %178 : vector<1x8x8xbf16> to vector<8x8xbf16>
    %c0_139 = arith.constant 0 : index
    %c239 = arith.constant 239 : index
    %180 = vector.load %arg15[%c0_139, %c239] : memref<8x1280xbf16, #tpu.memory_space<vmem>>, vector<8x1024xbf16>
    %cst_140 = arith.constant dense<0.000000e+00> : vector<8x1024xf32>
    %181 = tpu.matmul %179, %180, %cst_140 {dimension_numbers = #tpu.dot_dimension_numbers<[1], [0], [0], [1], [0, 0, 1, 1], [], []>} : vector<8x8xbf16>, vector<8x1024xbf16>, vector<8x1024xf32> -> vector<8x1024xf32>
    %182 = arith.addf %177, %181 : vector<8x1024xf32>
    %c0_141 = arith.constant 0 : index
    %c0_142 = arith.constant 0 : index
    %183 = vector.load %arg12[%c0_141, %c0_142] : memref<8x8xf32, #tpu.memory_space<vmem>>, vector<8x8xf32>
    %c0_143 = arith.constant 0 : index
    %c0_144 = arith.constant 0 : index
    %184 = vector.load %arg8[%c0_143, %c0_144] : memref<8x1xf32, #tpu.memory_space<vmem>>, vector<8x1xf32>
    %c0_145 = arith.constant 0 : index
    %c0_146 = arith.constant 0 : index
    %185 = vector.load %arg9[%c0_145, %c0_146] : memref<8x1xf32, #tpu.memory_space<vmem>>, vector<8x1xf32>
    %186 = vector.broadcast %0 : vector<1x1024xf32> to vector<8x1024xf32>
    %187 = arith.mulf %182, %186 : vector<8x1024xf32>
    %cst_147 = arith.constant dense<0.000000e+00> : vector<8xf32>
    %188 = vector.multi_reduction <add>, %187, %cst_147 [1] : vector<8x1024xf32> to vector<8xf32>
    %189 = vector.shape_cast %188 : vector<8xf32> to vector<8x1xf32>
    %190 = arith.mulf %187, %182 : vector<8x1024xf32>
    %cst_148 = arith.constant dense<0.000000e+00> : vector<8xf32>
    %191 = vector.multi_reduction <add>, %190, %cst_148 [1] : vector<8x1024xf32> to vector<8xf32>
    %192 = vector.shape_cast %191 : vector<8xf32> to vector<8x1xf32>
    %cst_149 = arith.constant dense<0.000000e+00> : vector<8x1xf32>
    %193 = tpu.matmul %183, %189, %cst_149 {dimension_numbers = #tpu.dot_dimension_numbers<[1], [0], [0], [1], [0, 0, 1, 1], [], []>} : vector<8x8xf32>, vector<8x1xf32>, vector<8x1xf32> -> vector<8x1xf32>
    %cst_150 = arith.constant dense<0.000000e+00> : vector<8x1xf32>
    %194 = tpu.matmul %183, %192, %cst_150 {dimension_numbers = #tpu.dot_dimension_numbers<[1], [0], [0], [1], [0, 0, 1, 1], [], []>} : vector<8x8xf32>, vector<8x1xf32>, vector<8x1xf32> -> vector<8x1xf32>
    %cst_151 = arith.constant 9.765625E-4 : f32
    %195 = vector.broadcast %cst_151 : f32 to vector<8x1xf32>
    %196 = arith.mulf %193, %195 : vector<8x1xf32>
    %cst_152 = arith.constant 9.765625E-4 : f32
    %197 = vector.broadcast %cst_152 : f32 to vector<8x1xf32>
    %198 = arith.mulf %194, %197 : vector<8x1xf32>
    %199 = arith.mulf %196, %196 : vector<8x1xf32>
    %200 = arith.subf %198, %199 : vector<8x1xf32>
    %cst_153 = arith.constant 0.000000e+00 : f32
    %201 = vector.broadcast %cst_153 : f32 to vector<8x1xf32>
    %202 = arith.maximumf %200, %201 : vector<8x1xf32>
    %cst_154 = arith.constant 9.99999974E-6 : f32
    %203 = vector.broadcast %cst_154 : f32 to vector<8x1xf32>
    %204 = arith.addf %202, %203 : vector<8x1xf32>
    %205 = math.rsqrt %204 : vector<8x1xf32>
    %206 = arith.mulf %184, %205 : vector<8x1xf32>
    %207 = arith.mulf %196, %206 : vector<8x1xf32>
    %208 = arith.subf %185, %207 : vector<8x1xf32>
    %209 = vector.broadcast %206 : vector<8x1xf32> to vector<8x1024xf32>
    %210 = arith.mulf %182, %209 : vector<8x1024xf32>
    %211 = vector.broadcast %208 : vector<8x1xf32> to vector<8x1024xf32>
    %212 = arith.addf %210, %211 : vector<8x1024xf32>
    %cst_155 = arith.constant 0.000000e+00 : f32
    %213 = vector.broadcast %cst_155 : f32 to vector<8x1024xf32>
    %214 = arith.cmpf oge, %212, %213 : vector<8x1024xf32>
    %cst_156 = arith.constant 0.00999999977 : f32
    %215 = vector.broadcast %cst_156 : f32 to vector<8x1024xf32>
    %216 = arith.mulf %215, %212 : vector<8x1024xf32>
    %217 = arith.select %214, %212, %216 : vector<8x1024xi1>, vector<8x1024xf32>
    %c0_157 = arith.constant 0 : index
    %c0_158 = arith.constant 0 : index
    %218 = vector.load %arg5[%c0_157, %c0_158] : memref<16x8xbf16, #tpu.memory_space<vmem>>, vector<16x8xbf16>
    %219 = arith.truncf %217 : vector<8x1024xf32> to vector<8x1024xbf16>
    %cst_159 = arith.constant dense<0.000000e+00> : vector<16x1024xf32>
    %220 = tpu.matmul %218, %219, %cst_159 {dimension_numbers = #tpu.dot_dimension_numbers<[1], [0], [0], [1], [0, 0, 1, 1], [], []>} : vector<16x8xbf16>, vector<8x1024xbf16>, vector<16x1024xf32> -> vector<16x1024xf32>
    %c0_160 = arith.constant 0 : index
    %c0_161 = arith.constant 0 : index
    %221 = vector.load %arg13[%c0_160, %c0_161] : memref<16x16xf32, #tpu.memory_space<vmem>>, vector<16x16xf32>
    %c0_162 = arith.constant 0 : index
    %c0_163 = arith.constant 0 : index
    %222 = vector.load %arg10[%c0_162, %c0_163] : memref<16x1xf32, #tpu.memory_space<vmem>>, vector<16x1xf32>
    %c0_164 = arith.constant 0 : index
    %c0_165 = arith.constant 0 : index
    %223 = vector.load %arg11[%c0_164, %c0_165] : memref<16x1xf32, #tpu.memory_space<vmem>>, vector<16x1xf32>
    %224 = vector.broadcast %0 : vector<1x1024xf32> to vector<16x1024xf32>
    %225 = arith.mulf %220, %224 : vector<16x1024xf32>
    %cst_166 = arith.constant dense<0.000000e+00> : vector<16xf32>
    %226 = vector.multi_reduction <add>, %225, %cst_166 [1] : vector<16x1024xf32> to vector<16xf32>
    %227 = vector.shape_cast %226 : vector<16xf32> to vector<16x1xf32>
    %228 = arith.mulf %225, %220 : vector<16x1024xf32>
    %cst_167 = arith.constant dense<0.000000e+00> : vector<16xf32>
    %229 = vector.multi_reduction <add>, %228, %cst_167 [1] : vector<16x1024xf32> to vector<16xf32>
    %230 = vector.shape_cast %229 : vector<16xf32> to vector<16x1xf32>
    %cst_168 = arith.constant dense<0.000000e+00> : vector<16x1xf32>
    %231 = tpu.matmul %221, %227, %cst_168 {dimension_numbers = #tpu.dot_dimension_numbers<[1], [0], [0], [1], [0, 0, 1, 1], [], []>} : vector<16x16xf32>, vector<16x1xf32>, vector<16x1xf32> -> vector<16x1xf32>
    %cst_169 = arith.constant dense<0.000000e+00> : vector<16x1xf32>
    %232 = tpu.matmul %221, %230, %cst_169 {dimension_numbers = #tpu.dot_dimension_numbers<[1], [0], [0], [1], [0, 0, 1, 1], [], []>} : vector<16x16xf32>, vector<16x1xf32>, vector<16x1xf32> -> vector<16x1xf32>
    %cst_170 = arith.constant 2.44140625E-4 : f32
    %233 = vector.broadcast %cst_170 : f32 to vector<16x1xf32>
    %234 = arith.mulf %231, %233 : vector<16x1xf32>
    %cst_171 = arith.constant 2.44140625E-4 : f32
    %235 = vector.broadcast %cst_171 : f32 to vector<16x1xf32>
    %236 = arith.mulf %232, %235 : vector<16x1xf32>
    %237 = arith.mulf %234, %234 : vector<16x1xf32>
    %238 = arith.subf %236, %237 : vector<16x1xf32>
    %cst_172 = arith.constant 0.000000e+00 : f32
    %239 = vector.broadcast %cst_172 : f32 to vector<16x1xf32>
    %240 = arith.maximumf %238, %239 : vector<16x1xf32>
    %cst_173 = arith.constant 9.99999974E-6 : f32
    %241 = vector.broadcast %cst_173 : f32 to vector<16x1xf32>
    %242 = arith.addf %240, %241 : vector<16x1xf32>
    %243 = math.rsqrt %242 : vector<16x1xf32>
    %244 = arith.mulf %222, %243 : vector<16x1xf32>
    %245 = arith.mulf %234, %244 : vector<16x1xf32>
    %246 = arith.subf %223, %245 : vector<16x1xf32>
    %247 = vector.broadcast %244 : vector<16x1xf32> to vector<16x1024xf32>
    %248 = arith.mulf %220, %247 : vector<16x1024xf32>
    %249 = vector.broadcast %246 : vector<16x1xf32> to vector<16x1024xf32>
    %250 = arith.addf %248, %249 : vector<16x1024xf32>
    %251 = arith.addf %250, %6 : vector<16x1024xf32>
    %cst_174 = arith.constant 0.000000e+00 : f32
    %252 = vector.broadcast %cst_174 : f32 to vector<16x1024xf32>
    %253 = arith.cmpf oge, %251, %252 : vector<16x1024xf32>
    %cst_175 = arith.constant 0.00999999977 : f32
    %254 = vector.broadcast %cst_175 : f32 to vector<16x1024xf32>
    %255 = arith.mulf %254, %251 : vector<16x1024xf32>
    %256 = arith.select %253, %251, %255 : vector<16x1024xi1>, vector<16x1024xf32>
    %c0_176 = arith.constant 0 : index
    %c0_177 = arith.constant 0 : index
    %c0_178 = arith.constant 0 : index
    %257 = vector.load %arg14[%c0_176, %c0_177, %c0_178] : memref<1x16x1024xf32, #tpu.memory_space<vmem>>, vector<1x16x1024xf32>
    %258 = vector.shape_cast %257 : vector<1x16x1024xf32> to vector<16x1024xf32>
    %259 = vector.shape_cast %256 : vector<16x1024xf32> to vector<1x16x1024xf32>
    tpu.vector_store %arg14[%c0_176, %c0_177, %c0_178], %259 {strides = array<i32>} : memref<1x16x1024xf32, #tpu.memory_space<vmem>>, vector<1x16x1024xf32>,
    return
  }
  func.func @transform_0(%arg0: i32) -> (i32, i32, i32) {
    %c0_i32 = arith.constant 0 : i32
    %c0_i32_0 = arith.constant 0 : i32
    %c0_i32_1 = arith.constant 0 : i32
    return %arg0, %c0_i32, %c0_i32_0 : i32, i32, i32
  }
  func.func @transform_1(%arg0: i32) -> (i32, i32) {
    %c0_i32 = arith.constant 0 : i32
    %c0_i32_0 = arith.constant 0 : i32
    %c0_i32_1 = arith.constant 0 : i32
    return %c0_i32, %c0_i32_0 : i32, i32
  }
  func.func @transform_2(%arg0: i32) -> (i32, i32) {
    %c0_i32 = arith.constant 0 : i32
    %c0_i32_0 = arith.constant 0 : i32
    %c0_i32_1 = arith.constant 0 : i32
    return %c0_i32, %c0_i32_0 : i32, i32
  }
  func.func @transform_3(%arg0: i32) -> (i32, i32, i32) {
    %c0_i32 = arith.constant 0 : i32
    %c0_i32_0 = arith.constant 0 : i32
    %c0_i32_1 = arith.constant 0 : i32
    %c0_i32_2 = arith.constant 0 : i32
    return %c0_i32, %c0_i32_0, %c0_i32_1 : i32, i32, i32
  }
  func.func @transform_4(%arg0: i32) -> (i32, i32) {
    %c0_i32 = arith.constant 0 : i32
    %c0_i32_0 = arith.constant 0 : i32
    %c0_i32_1 = arith.constant 0 : i32
    return %c0_i32, %c0_i32_0 : i32, i32
  }
  func.func @transform_5(%arg0: i32) -> (i32, i32) {
    %c0_i32 = arith.constant 0 : i32
    %c0_i32_0 = arith.constant 0 : i32
    %c0_i32_1 = arith.constant 0 : i32
    return %c0_i32, %c0_i32_0 : i32, i32
  }
  func.func @transform_6(%arg0: i32) -> (i32, i32) {
    %c0_i32 = arith.constant 0 : i32
    %c0_i32_0 = arith.constant 0 : i32
    %c0_i32_1 = arith.constant 0 : i32
    return %c0_i32, %c0_i32_0 : i32, i32
  }
  func.func @transform_7(%arg0: i32) -> (i32, i32) {
    %c0_i32 = arith.constant 0 : i32
    %c0_i32_0 = arith.constant 0 : i32
    %c0_i32_1 = arith.constant 0 : i32
    return %c0_i32, %c0_i32_0 : i32, i32
  }
  func.func @transform_8(%arg0: i32) -> (i32, i32) {
    %c0_i32 = arith.constant 0 : i32
    %c0_i32_0 = arith.constant 0 : i32
    %c0_i32_1 = arith.constant 0 : i32
    return %c0_i32, %c0_i32_0 : i32, i32
  }
  func.func @transform_9(%arg0: i32) -> (i32, i32) {
    %c0_i32 = arith.constant 0 : i32
    %c0_i32_0 = arith.constant 0 : i32
    %c0_i32_1 = arith.constant 0 : i32
    return %c0_i32, %c0_i32_0 : i32, i32
  }
  func.func @transform_10(%arg0: i32) -> (i32, i32) {
    %c0_i32 = arith.constant 0 : i32
    %c0_i32_0 = arith.constant 0 : i32
    %c0_i32_1 = arith.constant 0 : i32
    return %c0_i32, %c0_i32_0 : i32, i32
  }
  func.func @transform_11(%arg0: i32) -> (i32, i32) {
    %c0_i32 = arith.constant 0 : i32
    %c0_i32_0 = arith.constant 0 : i32
    %c0_i32_1 = arith.constant 0 : i32
    return %c0_i32, %c0_i32_0 : i32, i32
  }
  func.func @transform_12(%arg0: i32) -> (i32, i32) {
    %c0_i32 = arith.constant 0 : i32
    %c0_i32_0 = arith.constant 0 : i32
    %c0_i32_1 = arith.constant 0 : i32
    return %c0_i32, %c0_i32_0 : i32, i32
  }
  func.func @transform_13(%arg0: i32) -> (i32, i32, i32) {
    %c0_i32 = arith.constant 0 : i32
    %c0_i32_0 = arith.constant 0 : i32
    %c0_i32_1 = arith.constant 0 : i32
    return %arg0, %c0_i32, %c0_i32_0 : i32, i32, i32
  }
}

</mosaic_0001>

<bundles_post_ra>
// kernel: bottleneck_forward.1
= control target key start
LH: loop header
LB: loop body
LE: loop exit
PB: predicated region body
PF: predicated region fallthrough
CT: control target
= control target key end

     0   :  { %s9031_s25 = smov 0   ;;  %s10766_s0 = inlined_call_operand.vmem [shape: f32[2,16,1024], index: 0, kind: input, shape index: {}]   ;;  %s10767_s1 = inlined_call_operand.vmem [shape: f32[1,1024], index: 1, kind: input, shape index: {}]   ;;  %s10768_s2 = inlined_call_operand.vmem [shape: bf16[8,16], index: 2, kind: input, shape index: {}]   ;;  %s10769_s3 = inlined_call_operand.vmem [shape: bf16[27,8,8], index: 3, kind: input, shape index: {}]   ;;  %s10770_s4 = inlined_call_operand.vmem [shape: bf16[16,8], index: 4, kind: input, shape index: {}]   ;;  %s10771_s5 = inlined_call_operand.vmem [shape: f32[8,1], index: 5, kind: input, shape index: {}]   ;;  %s10772_s6 = inlined_call_operand.vmem [shape: f32[8,1], index: 6, kind: input, shape index: {}]   ;;  %s10773_s7 = inlined_call_operand.vmem [shape: f32[8,1], index: 7, kind: input, shape index: {}]   ;;  %s10774_s8 = inlined_call_operand.vmem [shape: f32[8,1], index: 8, kind: input, shape index: {}]   ;;  %s10775_s9 = inlined_call_operand.vmem [shape: f32[16,1], index: 9, kind: input, shape index: {}]   ;;  %s10776_s10 = inlined_call_operand.vmem [shape: f32[16,1], index: 10, kind: input, shape index: {}]   ;;  %s10777_s11 = inlined_call_operand.vmem [shape: f32[8,8], index: 11, kind: input, shape index: {}]   ;;  %s10778_s12 = inlined_call_operand.vmem [shape: f32[16,16], index: 12, kind: input, shape index: {}]   ;;  %s10779_s13 = inlined_call_operand.vmem [shape: f32[2,16,1024], index: 13, kind: output, shape index: {}]  }
   0x1 LB: > { %s8048_s26 = sadd.s32 4294967295, %s8930_s25   ;;  %p8052_p0 = scmp.ge.s32.totalorder %s8930_s25, 1  ;;  %s8930_s25 = sphi %s9031_s25, %s23_s25  }
   0x2   : > { %p387_p1 = scmp.lt.s32.totalorder %s8930_s25, 3 }
   0x4   : > { %p388_p2 = pnand %p8052_p0, %p387_p1 }
   0x5   : > { %p431_p3 = scmp.lt.s32.totalorder (!%p388_p2), %s8048_s26, 1  ;;  %v8932_v0 = vmov (!%p388_p2), 0   ;;  %v461_v12 = vld [vmem:[%s10768_s2] sm:$0xf] (!%p388_p2)  ;;  %vm470_vm0 = vcmask (!%p388_p2), 130048   ;;  %v8933_v26 = vmov (!%p388_p2), 0.0   ;;  %v642_v27 = vlaneseq (!%p388_p2) }
   0x6   : > { %391 = sbr.rel (%p388_p2) target bundleno = 2889 (0xb49), region = 72  ;;  %506 = vmatprep.mubr.bf16.mxu0 (!%p388_p2), %v8932_v0  ;;  %443 = vst [vmem:[#allocation2] sm:$0xf] (!%p388_p2), %v8932_v0  ;;  %444 = vst [vmem:[#allocation2 + $0x24] sm:$0xf] (!%p388_p2), %v8932_v0  ;;  %547 = vmatprep.mubr.bf16.mxu1 (!%p388_p2), %v8932_v0  ;;  %v442_v30 = vld [vmem:[%s10767_s1] sm:$0xff] (!%p388_p2) }
   0x7   : > { %8869 = vset.pattern.permute.xlu1 (!%p388_p2), %v8932_v0  ;;  %8870 = vset.pattern.permute.xlu0 (!%p388_p2), %v8932_v0  ;;  %v643_v28 = vshrl.u32 (!%p388_p2), %v642_v27, 7  ;;  %vm8934_vm1 = vmmov (!%p388_p2), 0   ;;  %vm716_vm2 = vcmask (!%p388_p2), 64512   ;;  %s8935_s24 = smov (!%p388_p2), 127   ;;  %s8936_s28 = smov (!%p388_p2), 118   ;;  %vm1013_vm11 = vcmask (!%p388_p2), 900096  }
   0x8   : > { %s8937_s29 = smov (!%p388_p2), 119   ;;  %s8938_s14 = smov (!%p388_p2), 39   ;;  %vm1025_vm12 = vcmask (!%p388_p2), 1043456   ;;  %vm1232_vm13 = vcmask (!%p388_p2), 908288   ;;  %vm1452_vm14 = vcmask (!%p388_p2), 891904   ;;  %vm1680_vm15 = vcmask (!%p388_p2), 826368  }
   0x9   : > { %v644_v29 = vsub.s32 (!%p388_p2), 0, %v643_v28  ;;  %v648_v31 = vsub.s32 (!%p388_p2), 1, %v643_v28  ;;  %v652_v32 = vsub.s32 (!%p388_p2), 2, %v643_v28  ;;  %v656_v33 = vsub.s32 (!%p388_p2), 3, %v643_v28  ;;  %s8939_s15 = smov (!%p388_p2), 117   ;;  %s8940_s16 = smov (!%p388_p2), 110  }
   0xa   : > { %v660_v42 = vsub.s32 (!%p388_p2), 4, %v643_v28  ;;  %v664_v47 = vsub.s32 (!%p388_p2), 5, %v643_v28  ;;  %v668_v51 = vsub.s32 (!%p388_p2), 6, %v643_v28  ;;  %v672_v58 = vsub.s32 (!%p388_p2), 7, %v643_v28  ;;  %s8941_s17 = smov (!%p388_p2), 111   ;;  %s8942_s18 = smov (!%p388_p2), 109  }
   0xb   : > { %v9085_v34 = vrot.slane (!%p388_p2), %v442_v30, %v644_v29  ;;  %v9087_v35 = vrot.slane (!%p388_p2), %v442_v30, %v648_v31  ;;  %v9089_v36 = vrot.slane (!%p388_p2), %v442_v30, %v652_v32  ;;  %v9093_v38 = vrot.slane (!%p388_p2), %v442_v30, %v656_v33  ;;  %s8943_s19 = smov (!%p388_p2), 101   ;;  %s8944_s20 = smov (!%p388_p2), 100  }
   0xc   : > { %v9112_v57 = vrot.slane (!%p388_p2), %v442_v30, %v660_v42  ;;  %v9114_v61 = vrot.slane (!%p388_p2), %v442_v30, %v664_v47  ;;  %v9116_v62 = vrot.slane (!%p388_p2), %v442_v30, %v668_v51  ;;  %v639_v51 = vld [vmem:[%s10771_s5] sm:$0xff] (!%p388_p2)  ;;  %s8945_s21 = smov (!%p388_p2), 99   ;;  %s8946_s22 = smov (!%p388_p2), 91  }
   0xd   : > { %s10781_s26 = smov (!%p431_p3, %s8048_s26), 1  ;;  %s8947_s23 = smov 90  }
   0xe   : > { %s8352_s27 = sshll.u32 %s10781_s26, 7 }
   0xf   : > { %s9053_s30 = scalar_lea.vmem %s10766_s0, %s8352_s27 }
  0x10   : > { %v446_v1 = vld [vmem:[%s9053_s30 + $0x8] sm:$0xff]  ;;  %v445_v3 = vld [vmem:[%s9053_s30] sm:$0xff]  ;;  %v448_v6 = vld [vmem:[%s9053_s30 + $0x18] sm:$0xff] }
  0x11   : > { %v454_v2 = vld [vmem:[%s9053_s30 + $0x48] sm:$0xff]  ;;  %v453_v5 = vld [vmem:[%s9053_s30 + $0x40] sm:$0xff]  ;;  %v456_v7 = vld [vmem:[%s9053_s30 + $0x58] sm:$0xff] }
  0x12   : > { %v463_v4 = vpack.c.bf16 %v454_v2, %v446_v1  ;;  %v462_v8 = vpack.c.bf16 %v453_v5, %v445_v3  ;;  %v465_v9 = vpack.c.bf16 %v456_v7, %v448_v6  ;;  %v447_v10 = vld [vmem:[%s9053_s30 + $0x10] sm:$0xff]  ;;  %v450_v13 = vld [vmem:[%s9053_s30 + $0x28] sm:$0xff]  ;;  %v449_v16 = vld [vmem:[%s9053_s30 + $0x20] sm:$0xff]  ;;  %v9127_v7 = vrot.slane %v442_v30, %v672_v58 }
  0x13   : > { %v455_v11 = vld [vmem:[%s9053_s30 + $0x50] sm:$0xff]  ;;  %v458_v15 = vld [vmem:[%s9053_s30 + $0x68] sm:$0xff]  ;;  %v457_v17 = vld [vmem:[%s9053_s30 + $0x60] sm:$0xff] }
  0x14   : > { %474 = vmatprep.subr.bf16.mxu0 %v463_v4  ;;  %v464_v14 = vpack.c.bf16 %v455_v11, %v447_v10  ;;  %515 = vmatprep.subr.bf16.mxu1 %v465_v9  ;;  %v467_v18 = vpack.c.bf16 %v458_v15, %v450_v13  ;;  %v466_v19 = vpack.c.bf16 %v457_v17, %v449_v16  ;;  %v452_v20 = vld [vmem:[%s9053_s30 + $0x38] sm:$0xff]  ;;  %v451_v22 = vld [vmem:[%s9053_s30 + $0x30] sm:$0xff]  ;;  %v638_v30 = vld [vmem:[%s10777_s11] sm:$0xff] }
  0x15   : > { %475 = vmatpush1.bf16.msra.mxu0 %v462_v8  ;;  %v460_v21 = vld [vmem:[%s9053_s30 + $0x78] sm:$0xff]  ;;  %v459_v24 = vld [vmem:[%s9053_s30 + $0x70] sm:$0xff]  ;;  %v9158_v58 = vld [vmem:[#allocation2 + $0x24] ss:$0 sps:$4 sm:$0xff]  }
  0x16   : > { %516 = vmatpush1.bf16.msra.mxu1 %v464_v14  ;;  %v469_v23 = vpack.c.bf16 %v460_v21, %v452_v20  ;;  %556 = vmatprep.subr.bf16.mxu0 %v467_v18  ;;  %v468_v25 = vpack.c.bf16 %v459_v24, %v451_v22 }
  0x18   : > { %8057 = vmatmul.mubr.msk.bf16.vlgmr.msra.gmra.mrb[0].mxu0 %vm470_vm0, %v461_v12  ;;  %597 = vmatprep.subr.bf16.mxu1 %v469_v23 }
  0x19   : > { %8058 = vmatmul.mubr.msk.bf16.vlgmr.msra.gmra.mrb[0].mxu1 %vm470_vm0, %v461_v12  ;;  %557 = vmatpush1.bf16.msra.mxu0 %v466_v19 }
  0x1a   : > { %598 = vmatpush1.bf16.msra.mxu1 %v468_v25  ;;  %588 = vmatprep.mubr.bf16.mxu0 %v8932_v0 }
  0x1b   : > { %629 = vmatprep.mubr.bf16.mxu1 %v8932_v0  ;;  %8374 = vmatprep.subr.mxu0 %v8933_v26 }
  0x1c   : > { %8379 = vmatprep.subr.mxu1 %v8933_v26 }
  0x20   : > { %8059 = vmatmul.mubr.msk.bf16.vlgmr.msra.gmra.mrb[4].mxu0 %vm470_vm0, %v461_v12 }
  0x21   : > { %8060 = vmatmul.mubr.msk.bf16.vlgmr.msra.gmra.mrb[4].mxu1 %vm470_vm0, %v461_v12  ;;  %8376 = vmatprep.mubr.msk.f32.mxu0 %vm8934_vm1, %v8933_v26 }
  0x22   : > { %8381 = vmatprep.mubr.msk.f32.mxu1 %vm8934_vm1, %v8933_v26 }
  0xeb   : > { %v9091_v37 = vpop.f32.mrb[0].mxu0 }
  0xec   : > { %v682_v39 = vmul.f32 %v9085_v34, %v9091_v37  ;;  %v9097_v40 = vpop.f32.mrb[1].mxu0  ;;  %v9099_v41 = vpop.f32.mrb[0].mxu1 }
  0xed   : > { %v683_v43 = vmul.f32 %v9087_v35, %v9097_v40  ;;  %v684_v44 = vmul.f32 %v9089_v36, %v9099_v41  ;;  %v512_v45 = vpop.f32.mrb[2].mxu0  ;;  %v9105_v46 = vpop.f32.mrb[1].mxu1 }
  0xee   : > { %v699_v48 = vmul.f32 %v682_v39, %v9091_v37  ;;  %v513_v49 = vpop.f32.mrb[3].mxu0  ;;  %v553_v50 = vpop.f32.mrb[2].mxu1  ;;  %v685_v55 = vmul.f32 %v9093_v38, %v9105_v46 }
  0xef   : > { %v690_v52 = vadd.f32 %v683_v43, %v682_v39  ;;  %v700_v53 = vmul.f32 %v683_v43, %v9097_v40  ;;  %v701_v54 = vmul.f32 %v684_v44, %v9099_v41  ;;  %v554_v56 = vpop.f32.mrb[3].mxu1 }
  0xf0   : > { %v702_v2 = vmul.f32 %v685_v55, %v9105_v46 }
  0xf1   : > { %v707_v59 = vadd.f32 %v700_v53, %v699_v48  ;;  %v691_v60 = vadd.f32 %v690_v52, %v684_v44 }
  0xf3   : > { %v708_v63 = vadd.f32 %v707_v59, %v701_v54  ;;  %v692_v1 = vadd.f32 %v691_v60, %v685_v55  ;;  %v9119_v3 = vpop.f32.mrb[4].mxu0  ;;  %v640_v54 = vld [vmem:[%s10772_s6] sm:$0xff] }
  0xf4   : > { %v686_v4 = vmul.f32 %v9112_v57, %v9119_v3  ;;  %v9123_v5 = vpop.f32.mrb[5].mxu0  ;;  %v9125_v6 = vpop.f32.mrb[4].mxu1 }
  0xf5   : > { %v709_v8 = vadd.f32 %v708_v63, %v702_v2  ;;  %v687_v9 = vmul.f32 %v9114_v61, %v9123_v5  ;;  %v594_v10 = vpop.f32.mrb[6].mxu0  ;;  %v9131_v11 = vpop.f32.mrb[5].mxu1  ;;  %v688_v14 = vmul.f32 %v9116_v62, %v9125_v6 }
  0xf6   : > { %v693_v12 = vadd.f32 %v692_v1, %v686_v4  ;;  %v703_v13 = vmul.f32 %v686_v4, %v9119_v3  ;;  %v595_v15 = vpop.f32.mrb[7].mxu0  ;;  %v635_v16 = vpop.f32.mrb[6].mxu1  ;;  %v689_v20 = vmul.f32 %v9127_v7, %v9131_v11 }
  0xf7   : > { %v704_v17 = vmul.f32 %v687_v9, %v9123_v5  ;;  %v636_v18 = vpop.f32.mrb[7].mxu1  ;;  %v705_v22 = vmul.f32 %v688_v14, %v9125_v6 }
  0xf8   : > { %v710_v19 = vadd.f32 %v709_v8, %v703_v13  ;;  %v694_v21 = vadd.f32 %v693_v12, %v687_v9  ;;  %v706_v27 = vmul.f32 %v689_v20, %v9131_v11 }
  0xfa   : > { %v695_v23 = vadd.f32 %v694_v21, %v688_v14  ;;  %v711_v24 = vadd.f32 %v710_v19, %v704_v17 }
  0xfc   : > { %v696_v25 = vadd.f32 %v695_v23, %v689_v20  ;;  %v712_v28 = vadd.f32 %v711_v24, %v705_v22 }
  0xfe   : > { %697 = vadd.xlane.f32.xlu0 %v696_v25  ;;  %v713_v29 = vadd.f32 %v712_v28, %v706_v27 }
 0x102   : > { %714 = vadd.xlane.f32.xlu0 %v713_v29 }
 0x118   : > { %4211 = vrot.lane.b32.xlu0 %v9158_v58, %s8935_s24 }
 0x11c   : > { %4667 = vrot.lane.b32.xlu0 %v9158_v58, %s8936_s28 }
 0x120   : > { %5123 = vrot.lane.b32.xlu0 %v9158_v58, %s8938_s14 }
 0x18b   : > { %v698_v31 = vpop.xlane.xlu0 %697 }
 0x18c   : > { %8375 = vmatpush3.msra.mxu0 %v698_v31 }
 0x18d   : > { %8377 = vmatmul.mubr.msk.f32.vlgmr.msra.gmra.mrb[8].mxu0 %vm716_vm2, %v638_v30 }
 0x18e   : > { %1082 = vmatprep.mubr.bf16.mxu0 %v8932_v0 }
 0x18f   : > { %v715_v32 = vpop.xlane.xlu0 %714 }
 0x190   : > { %8380 = vmatpush3.msra.mxu1 %v715_v32 }
 0x191   : > { %8382 = vmatmul.mubr.msk.f32.vlgmr.msra.gmra.mrb[8].mxu1 %vm716_vm2, %v638_v30 }
 0x192   : > { %1123 = vmatprep.mubr.bf16.mxu1 %v8932_v0 }
 0x260   : > { %v786_v33 = vpop.f32.mrb[8].mxu0 }
 0x261   : > { %v860_v39 = vmul.f32 0.0009765625, %v786_v33  ;;  %v8378_v42 = vpop.f32.mrb[9].mxu0 }
 0x263   : > { %v862_v43 = vmul.f32 %v860_v39, %v860_v39 }
 0x264   : > { %v856_v44 = vpop.f32.mrb[8].mxu1 }
 0x265   : > { %v861_v45 = vmul.f32 0.0009765625, %v856_v44  ;;  %v8383_v47 = vpop.f32.mrb[9].mxu1 }
 0x267   : > { %v863_v48 = vsub.f32 %v861_v45, %v862_v43 }
 0x269   : > { %v864_v49 = vmax.f32 %v863_v48, 0.0 }
 0x26b   : > { %v865_v50 = vadd.f32 1e-05, %v864_v49 }
 0x26d   : > { %8890 = vrsqrt.f32 %v865_v50 }
 0x277   : > { %v8891_v52 = vpop.eup %8890 }
 0x278   : > { %v867_v53 = vmul.f32 %v8891_v52, %v639_v51 }
 0x27a   : > { %872 = vperm.xlu1 %8869, %v867_v53   ;;  %v868_v55 = vmul.f32 %v867_v53, %v860_v39 }
 0x27c   : > { %v869_v56 = vsub.f32 %v640_v54, %v868_v55 }
 0x27e   : > { %885 = vperm.xlu1 %8869, %v869_v56  }
 0x282   : > { %4439 = vrot.lane.b32.xlu1 %v9158_v58, %s8937_s29 }
 0x286   : > { %4895 = vrot.lane.b32.xlu1 %v9158_v58, %s8939_s15 }
 0x2f9   : > { %v873_v59 = vpop.permute.xlu1 %872 }
 0x2fa   : > { %v875_v60 = vmul.f32 %v873_v59, %v9091_v37  ;;  %v876_v63 = vmul.f32 %v873_v59, %v9097_v40  ;;  %v877_v1 = vmul.f32 %v873_v59, %v9099_v41  ;;  %v878_v2 = vmul.f32 %v873_v59, %v9105_v46 }
 0x2fb   : > { %v879_v4 = vmul.f32 %v873_v59, %v9119_v3  ;;  %v880_v8 = vmul.f32 %v873_v59, %v9123_v5  ;;  %v881_v9 = vmul.f32 %v873_v59, %v9125_v6  ;;  %v882_v10 = vmul.f32 %v873_v59, %v9131_v11 }
 0x2fd   : > { %v886_v12 = vpop.permute.xlu1 %885 }
 0x2fe   : > { %v888_v13 = vadd.f32 %v886_v12, %v875_v60  ;;  %v889_v14 = vadd.f32 %v886_v12, %v876_v63  ;;  %v890_v15 = vadd.f32 %v886_v12, %v877_v1  ;;  %v891_v16 = vadd.f32 %v886_v12, %v878_v2 }
 0x2ff   : > { %v892_v37 = vadd.f32 %v886_v12, %v879_v4  ;;  %v893_v17 = vadd.f32 %v886_v12, %v880_v8  ;;  %v894_v40 = vadd.f32 %v886_v12, %v881_v9  ;;  %v895_v18 = vadd.f32 %v886_v12, %v882_v10  ;;  %v9286_v8 = vpop.permute.xlu0 %4211 }
 0x300   : > { %vm896_vm3 = vcmp.ge.f32.partialorder %v888_v13, 0.0  ;;  %vm897_vm4 = vcmp.ge.f32.partialorder %v889_v14, 0.0  ;;  %vm898_vm5 = vcmp.ge.f32.partialorder %v890_v15, 0.0  ;;  %vm899_vm6 = vcmp.ge.f32.partialorder %v891_v16, 0.0 }
 0x301   : > { %vm900_vm7 = vcmp.ge.f32.partialorder %v892_v37, 0.0  ;;  %vm901_vm8 = vcmp.ge.f32.partialorder %v893_v17, 0.0  ;;  %vm902_vm9 = vcmp.ge.f32.partialorder %v894_v40, 0.0  ;;  %vm903_vm10 = vcmp.ge.f32.partialorder %v895_v18, 0.0  ;;  %v9293_v10 = vpop.permute.xlu1 %4439 }
 0x302   : > { %v904_v41 = vmul.f32 0.01, %v888_v13  ;;  %v905_v46 = vmul.f32 0.01, %v889_v14  ;;  %v906_v3 = vmul.f32 0.01, %v890_v15 }
 0x303   : > { %v907_v5 = vmul.f32 0.01, %v891_v16  ;;  %v908_v6 = vmul.f32 0.01, %v892_v37  ;;  %v909_v11 = vmul.f32 0.01, %v893_v17  ;;  %v9291_v9 = vpop.permute.xlu0 %4667 }
 0x304   : > { %v910_v19 = vmul.f32 0.01, %v894_v40  ;;  %v911_v20 = vmul.f32 0.01, %v895_v18  ;;  %v912_v21 = vsel %vm896_vm3, %v888_v13, %v904_v41  ;;  %v913_v22 = vsel %vm897_vm4, %v889_v14, %v905_v46 }
 0x305   : > { %v914_v23 = vsel %vm898_vm5, %v890_v15, %v906_v3  ;;  %v915_v24 = vsel %vm899_vm6, %v891_v16, %v907_v5  ;;  %v916_v25 = vsel %vm900_vm7, %v892_v37, %v908_v6  ;;  %v917_v27 = vsel %vm901_vm8, %v893_v17, %v909_v11  ;;  %v9303_v13 = vpop.permute.xlu1 %4895  ;;  %v8067_v3 = vld [vmem:[%s10769_s3 + $0x4] sm:$0xf] }
 0x306   : > { %v918_v28 = vsel %vm902_vm9, %v894_v40, %v910_v19  ;;  %v919_v29 = vsel %vm903_vm10, %v895_v18, %v911_v20  ;;  %v9187_v30 = vmul.f32 %v912_v21, %v9085_v34  ;;  %v9190_v31 = vmul.f32 %v913_v22, %v9087_v35 }
 0x307   : > { %v9193_v32 = vmul.f32 %v914_v23, %v9089_v36  ;;  %v9196_v33 = vmul.f32 %v915_v24, %v9093_v38  ;;  %v9199_v39 = vmul.f32 %v916_v25, %v9112_v57  ;;  %v9202_v42 = vmul.f32 %v917_v27, %v9114_v61  ;;  %v9301_v12 = vpop.permute.xlu0 %5123 }
 0x308   : > { %v9205_v43 = vmul.f32 %v918_v28, %v9116_v62  ;;  %v9208_v44 = vmul.f32 %v919_v29, %v9127_v7  ;;  %v8354_v45 = vpack.c.bf16 %v9190_v31, %v9187_v30  ;;  %vm1908_vm3 = vcmask 818176  }
 0x309   : > { %v8355_v47 = vpack.c.bf16 %v9196_v33, %v9193_v32  ;;  %v8356_v48 = vpack.c.bf16 %v9202_v42, %v9199_v39  ;;  %vm2136_vm4 = vcmask 809984   ;;  %vm2364_vm5 = vcmask 744448  }
 0x30a   : > { %v8357_v49 = vpack.c.bf16 %v9208_v44, %v9205_v43  ;;  %960 = vst [vmem:[#allocation2 + $0x4] sm:$0xff] %v8354_v45  ;;  %vm2592_vm6 = vcmask 736256   ;;  %vm2820_vm7 = vcmask 728064   ;;  %vm3048_vm8 = vcmask 89088  }
 0x30b   : > { %961 = vst [vmem:[#allocation2 + $0xc] sm:$0xff] %v8355_v47  ;;  %962 = vst [vmem:[#allocation2 + $0x14] sm:$0xff] %v8356_v48  ;;  %vm3276_vm9 = vcmask 80896   ;;  %vm3504_vm10 = vcmask 72704  }
 0x30c   : > { %963 = vst [vmem:[#allocation2 + $0x1c] sm:$0xff] %v8357_v49 }
 0x311   : > { %v965_v50 = vld [vmem:[#allocation2] sm:$0xff] }
 0x312   : > { %v9218_v51 = vcombine.low %v965_v50, %v965_v50  ;;  %v9220_v52 = vcombine.high %v965_v50, %v965_v50  ;;  %v966_v53 = vld [vmem:[#allocation2 + $0x8] sm:$0xff]  ;;  %v967_v60 = vld [vmem:[#allocation2 + $0x10] sm:$0xff] }
 0x313   : > { %v968_v54 = vld [vmem:[#allocation2 + $0x18] sm:$0xff]  ;;  %v9224_v55 = vcombine.low %v966_v53, %v966_v53  ;;  %v9230_v59 = vcombine.high %v966_v53, %v966_v53  ;;  %v9234_v63 = vcombine.low %v967_v60, %v967_v60  ;;  %v9238_v1 = vcombine.high %v967_v60, %v967_v60  ;;  %v9246_v4 = vld [vmem:[#allocation2 + $0x20] ss:$0 sps:$4 sm:$0xff]  }
 0x314   : > { %997 = vrot.lane.b32.xlu1 %v9220_v52, %s8940_s16  ;;  %995 = vrot.lane.b32.xlu0 %v9218_v51, %s8940_s16  ;;  %v9226_v56 = vcombine.high %v968_v54, %v968_v54  ;;  %v9242_v2 = vcombine.low %v968_v54, %v968_v54 }
 0x318   : > { %999 = vrot.lane.b32.xlu1 %v9224_v55, %s8940_s16  ;;  %1009 = vrot.lane.b32.xlu0 %v9226_v56, %s8940_s16 }
 0x31c   : > { %1001 = vrot.lane.b32.xlu1 %v9230_v59, %s8940_s16  ;;  %1214 = vrot.lane.b32.xlu0 %v9218_v51, %s8941_s17 }
 0x320   : > { %1003 = vrot.lane.b32.xlu1 %v9234_v63, %s8940_s16  ;;  %1218 = vrot.lane.b32.xlu0 %v9224_v55, %s8941_s17 }
 0x324   : > { %1005 = vrot.lane.b32.xlu1 %v9238_v1, %s8940_s16  ;;  %1222 = vrot.lane.b32.xlu0 %v9234_v63, %s8941_s17 }
 0x328   : > { %1007 = vrot.lane.b32.xlu1 %v9242_v2, %s8940_s16  ;;  %1226 = vrot.lane.b32.xlu0 %v9242_v2, %s8941_s17 }
 0x32c   : > { %1011 = vrot.lane.b32.xlu1 %v9246_v4, %s8940_s16  ;;  %1230 = vrot.lane.b32.xlu0 %v9246_v4, %s8941_s17  ;;  %s8950_s16 = smov 10  }
 0x330   : > { %1216 = vrot.lane.b32.xlu1 %v9220_v52, %s8941_s17  ;;  %1436 = vrot.lane.b32.xlu0 %v9220_v52, %s8942_s18 }
 0x334   : > { %1220 = vrot.lane.b32.xlu1 %v9230_v59, %s8941_s17  ;;  %1440 = vrot.lane.b32.xlu0 %v9230_v59, %s8942_s18 }
 0x338   : > { %1224 = vrot.lane.b32.xlu1 %v9238_v1, %s8941_s17  ;;  %1444 = vrot.lane.b32.xlu0 %v9238_v1, %s8942_s18 }
 0x33c   : > { %1228 = vrot.lane.b32.xlu1 %v9226_v56, %s8941_s17  ;;  %1448 = vrot.lane.b32.xlu0 %v9226_v56, %s8942_s18  ;;  %s8953_s17 = smov 37  }
 0x340   : > { %1434 = vrot.lane.b32.xlu1 %v9218_v51, %s8942_s18  ;;  %1662 = vrot.lane.b32.xlu0 %v9218_v51, %s8943_s19 }
 0x344   : > { %1438 = vrot.lane.b32.xlu1 %v9224_v55, %s8942_s18  ;;  %1666 = vrot.lane.b32.xlu0 %v9224_v55, %s8943_s19 }
 0x348   : > { %1442 = vrot.lane.b32.xlu1 %v9234_v63, %s8942_s18  ;;  %1670 = vrot.lane.b32.xlu0 %v9234_v63, %s8943_s19 }
 0x34c   : > { %1446 = vrot.lane.b32.xlu1 %v9242_v2, %s8942_s18  ;;  %1674 = vrot.lane.b32.xlu0 %v9242_v2, %s8943_s19 }
 0x350   : > { %1450 = vrot.lane.b32.xlu1 %v9246_v4, %s8942_s18  ;;  %1678 = vrot.lane.b32.xlu0 %v9246_v4, %s8943_s19  ;;  %s8948_s18 = smov 89  }
 0x354   : > { %1664 = vrot.lane.b32.xlu1 %v9220_v52, %s8943_s19  ;;  %1892 = vrot.lane.b32.xlu0 %v9220_v52, %s8944_s20 }
 0x358   : > { %1668 = vrot.lane.b32.xlu1 %v9230_v59, %s8943_s19  ;;  %1896 = vrot.lane.b32.xlu0 %v9230_v59, %s8944_s20 }
 0x35c   : > { %1672 = vrot.lane.b32.xlu1 %v9238_v1, %s8943_s19  ;;  %1900 = vrot.lane.b32.xlu0 %v9238_v1, %s8944_s20 }
 0x360   : > { %1676 = vrot.lane.b32.xlu1 %v9226_v56, %s8943_s19  ;;  %1904 = vrot.lane.b32.xlu0 %v9226_v56, %s8944_s20  ;;  %s8951_s19 = smov 9  }
 0x364   : > { %1890 = vrot.lane.b32.xlu1 %v9218_v51, %s8944_s20  ;;  %2118 = vrot.lane.b32.xlu0 %v9218_v51, %s8945_s21 }
 0x368   : > { %1894 = vrot.lane.b32.xlu1 %v9224_v55, %s8944_s20  ;;  %2122 = vrot.lane.b32.xlu0 %v9224_v55, %s8945_s21 }
 0x36c   : > { %1898 = vrot.lane.b32.xlu1 %v9234_v63, %s8944_s20  ;;  %2126 = vrot.lane.b32.xlu0 %v9234_v63, %s8945_s21 }
 0x370   : > { %1902 = vrot.lane.b32.xlu1 %v9242_v2, %s8944_s20  ;;  %2130 = vrot.lane.b32.xlu0 %v9242_v2, %s8945_s21 }
 0x374   : > { %1906 = vrot.lane.b32.xlu1 %v9246_v4, %s8944_s20  ;;  %2134 = vrot.lane.b32.xlu0 %v9246_v4, %s8945_s21  ;;  %s8959_s20 = smov 18  }
 0x378   : > { %2120 = vrot.lane.b32.xlu1 %v9220_v52, %s8945_s21  ;;  %2348 = vrot.lane.b32.xlu0 %v9220_v52, %s8946_s22 }
 0x37c   : > { %2124 = vrot.lane.b32.xlu1 %v9230_v59, %s8945_s21  ;;  %2352 = vrot.lane.b32.xlu0 %v9230_v59, %s8946_s22 }
 0x380   : > { %2128 = vrot.lane.b32.xlu1 %v9238_v1, %s8945_s21  ;;  %2356 = vrot.lane.b32.xlu0 %v9238_v1, %s8946_s22 }
 0x384   : > { %2132 = vrot.lane.b32.xlu1 %v9226_v56, %s8945_s21  ;;  %2360 = vrot.lane.b32.xlu0 %v9226_v56, %s8946_s22  ;;  %s8949_s21 = smov 11  }
 0x386   : > { %v996_v14 = vpop.permute.xlu0 %995  ;;  %v998_v15 = vpop.permute.xlu1 %997 }
 0x387   : > { %v1014_v16 = vsel %vm1013_vm11, %v996_v14, %v998_v15 }
 0x388   : > { %2346 = vrot.lane.b32.xlu1 %v9218_v51, %s8946_s22  ;;  %2574 = vrot.lane.b32.xlu0 %v9218_v51, %s8947_s23  ;;  %v1027_v18 = vsel %vm1025_vm12, %v1014_v16, 0 }
 0x38a   : > { %v1010_v37 = vpop.permute.xlu0 %1009  ;;  %v1000_v17 = vpop.permute.xlu1 %999 }
 0x38b   : > { %v1015_v40 = vsel %vm1013_vm11, %v998_v15, %v1000_v17 }
 0x38c   : > { %2350 = vrot.lane.b32.xlu1 %v9224_v55, %s8946_s22  ;;  %2578 = vrot.lane.b32.xlu0 %v9224_v55, %s8947_s23 }
 0x38d   : > { %8077 = vmatprep.subr.msk.bf16.mxu0 %vm1025_vm12, %v1015_v40 }
 0x38e   : > { %1051 = vmatpush1.bf16.msra.mxu0 %v1027_v18  ;;  %v1215_v41 = vpop.permute.xlu0 %1214  ;;  %v1002_v46 = vpop.permute.xlu1 %1001 }
 0x38f   : > { %v1016_v5 = vsel %vm1013_vm11, %v1000_v17, %v1002_v46 }
 0x390   : > { %2354 = vrot.lane.b32.xlu1 %v9234_v63, %s8946_s22  ;;  %2582 = vrot.lane.b32.xlu0 %v9234_v63, %s8947_s23  ;;  %v1033_v20 = vsel %vm1025_vm12, %v1016_v5, 0 }
 0x391   : > { %8078 = vmatmul.mubr.msk.bf16.vlgmr.msra.gmra.mrb[12].mxu0 %vm716_vm2, %v8067_v3 }
 0x392   : > { %v1219_v6 = vpop.permute.xlu0 %1218  ;;  %v1004_v11 = vpop.permute.xlu1 %1003  ;;  %1164 = vmatprep.mubr.bf16.mxu0 %v8932_v0 }
 0x393   : > { %v1017_v19 = vsel %vm1013_vm11, %v1002_v46, %v1004_v11 }
 0x394   : > { %2358 = vrot.lane.b32.xlu1 %v9242_v2, %s8946_s22  ;;  %2586 = vrot.lane.b32.xlu0 %v9242_v2, %s8947_s23 }
 0x395   : > { %8079 = vmatprep.subr.msk.bf16.mxu1 %vm1025_vm12, %v1017_v19 }
 0x396   : > { %1092 = vmatpush1.bf16.msra.mxu1 %v1033_v20  ;;  %v1223_v21 = vpop.permute.xlu0 %1222  ;;  %v1006_v22 = vpop.permute.xlu1 %1005 }
 0x397   : > { %v1018_v23 = vsel %vm1013_vm11, %v1004_v11, %v1006_v22 }
 0x398   : > { %2362 = vrot.lane.b32.xlu1 %v9246_v4, %s8946_s22  ;;  %2590 = vrot.lane.b32.xlu0 %v9246_v4, %s8947_s23  ;;  %v1039_v28 = vsel %vm1025_vm12, %v1018_v23, 0  ;;  %s8952_s22 = smov 1  }
 0x399   : > { %8080 = vmatmul.mubr.msk.bf16.vlgmr.msra.gmra.mrb[12].mxu1 %vm716_vm2, %v8067_v3 }
 0x39a   : > { %v1227_v24 = vpop.permute.xlu0 %1226  ;;  %v1008_v25 = vpop.permute.xlu1 %1007  ;;  %1205 = vmatprep.mubr.bf16.mxu1 %v8932_v0 }
 0x39b   : > { %v1019_v27 = vsel %vm1013_vm11, %v1006_v22, %v1008_v25  ;;  %v1020_v29 = vsel %vm1013_vm11, %v1008_v25, %v1010_v37 }
 0x39c   : > { %2576 = vrot.lane.b32.xlu1 %v9220_v52, %s8947_s23  ;;  %2804 = vrot.lane.b32.xlu0 %v9220_v52, %s8948_s18  ;;  %v1045_v49 = vsel %vm1025_vm12, %v1020_v29, 0 }
 0x39d   : > { %8081 = vmatprep.subr.msk.bf16.mxu0 %vm1025_vm12, %v1019_v27 }
 0x39e   : > { %1133 = vmatpush1.bf16.msra.mxu0 %v1039_v28  ;;  %v1231_v45 = vpop.permute.xlu0 %1230  ;;  %v1012_v47 = vpop.permute.xlu1 %1011 }
 0x39f   : > { %v1021_v48 = vsel %vm1013_vm11, %v1010_v37, %v1012_v47  ;;  %v964_v37 = vld [vmem:[%s10769_s3] sm:$0xf]  ;;  %vm3732_vm11 = vcmask 7168  }
 0x3a0   : > { %2580 = vrot.lane.b32.xlu1 %v9230_v59, %s8947_s23  ;;  %2808 = vrot.lane.b32.xlu0 %v9230_v59, %s8948_s18 }
 0x3a1   : > { %8083 = vmatprep.subr.msk.bf16.mxu1 %vm1025_vm12, %v1021_v48  ;;  %8082 = vmatmul.mubr.msk.bf16.vlgmr.msra.gmra.mrb[16].mxu0 %vm716_vm2, %v8067_v3 }
 0x3a2   : > { %1174 = vmatpush1.bf16.msra.mxu1 %v1045_v49  ;;  %v1437_v50 = vpop.permute.xlu0 %1436  ;;  %v1217_v53 = vpop.permute.xlu1 %1216  ;;  %1300 = vmatprep.mubr.bf16.mxu0 %v8932_v0 }
 0x3a3   : > { %v1233_v54 = vsel %vm1232_vm13, %v1215_v41, %v1217_v53  ;;  %v1234_v60 = vsel %vm1232_vm13, %v1217_v53, %v1219_v6  ;;  %v8093_v53 = vld [vmem:[%s10769_s3 + $0x8] sm:$0xf] }
 0x3a4   : > { %2584 = vrot.lane.b32.xlu1 %v9238_v1, %s8947_s23  ;;  %2812 = vrot.lane.b32.xlu0 %v9238_v1, %s8948_s18  ;;  %v1245_v14 = vsel %vm1025_vm12, %v1233_v54, 0 }
 0x3a5   : > { %8085 = vmatprep.subr.msk.bf16.mxu0 %vm1025_vm12, %v1234_v60  ;;  %8084 = vmatmul.mubr.msk.bf16.vlgmr.msra.gmra.mrb[16].mxu1 %vm716_vm2, %v8067_v3 }
 0x3a6   : > { %1269 = vmatpush1.bf16.msra.mxu0 %v1245_v14  ;;  %v1441_v15 = vpop.permute.xlu0 %1440  ;;  %v1221_v16 = vpop.permute.xlu1 %1220  ;;  %1341 = vmatprep.mubr.bf16.mxu1 %v8932_v0 }
 0x3a7   : > { %v1235_v17 = vsel %vm1232_vm13, %v1219_v6, %v1221_v16  ;;  %v1236_v40 = vsel %vm1232_vm13, %v1221_v16, %v1223_v21 }
 0x3a8   : > { %2588 = vrot.lane.b32.xlu1 %v9226_v56, %s8947_s23  ;;  %2816 = vrot.lane.b32.xlu0 %v9226_v56, %s8948_s18  ;;  %v1251_v18 = vsel %vm1025_vm12, %v1235_v17, 0  ;;  %s8957_s23 = smov 29  }
 0x3a9   : > { %8087 = vmatprep.subr.msk.bf16.mxu1 %vm1025_vm12, %v1236_v40  ;;  %8086 = vmatmul.mubr.msk.bf16.vlgmr.msra.gmra.mrb[12].mxu0 %vm716_vm2, %v964_v37 }
 0x3aa   : > { %1310 = vmatpush1.bf16.msra.mxu1 %v1251_v18  ;;  %v1445_v41 = vpop.permute.xlu0 %1444  ;;  %v1225_v46 = vpop.permute.xlu1 %1224  ;;  %1382 = vmatprep.mubr.bf16.mxu0 %v8932_v0 }
 0x3ab   : > { %v1237_v3 = vsel %vm1232_vm13, %v1223_v21, %v1225_v46  ;;  %v1238_v5 = vsel %vm1232_vm13, %v1225_v46, %v1227_v24 }
 0x3ac   : > { %2802 = vrot.lane.b32.xlu1 %v9218_v51, %s8948_s18  ;;  %3030 = vrot.lane.b32.xlu0 %v9218_v51, %s8949_s21  ;;  %v1257_v6 = vsel %vm1025_vm12, %v1237_v3, 0 }
 0x3ad   : > { %8089 = vmatprep.subr.msk.bf16.mxu0 %vm1025_vm12, %v1238_v5  ;;  %8088 = vmatmul.mubr.msk.bf16.vlgmr.msra.gmra.mrb[12].mxu1 %vm716_vm2, %v964_v37 }
 0x3ae   : > { %1351 = vmatpush1.bf16.msra.mxu0 %v1257_v6  ;;  %v1449_v11 = vpop.permute.xlu0 %1448  ;;  %v1229_v19 = vpop.permute.xlu1 %1228  ;;  %1423 = vmatprep.mubr.bf16.mxu1 %v8932_v0 }
 0x3af   : > { %v1239_v20 = vsel %vm1232_vm13, %v1227_v24, %v1229_v19  ;;  %v1240_v21 = vsel %vm1232_vm13, %v1229_v19, %v1231_v45  ;;  %vm4213_vm13 = vcmask 1039360  }
 0x3b0   : > { %2806 = vrot.lane.b32.xlu1 %v9224_v55, %s8948_s18  ;;  %3034 = vrot.lane.b32.xlu0 %v9224_v55, %s8949_s21  ;;  %v1263_v22 = vsel %vm1025_vm12, %v1239_v20, 0 }
 0x3b1   : > { %8091 = vmatprep.subr.msk.bf16.mxu1 %vm1025_vm12, %v1240_v21  ;;  %8090 = vmatmul.mubr.msk.bf16.vlgmr.msra.gmra.mrb[16].mxu0 %vm716_vm2, %v964_v37 }
 0x3b2   : > { %1392 = vmatpush1.bf16.msra.mxu1 %v1263_v22  ;;  %v1663_v23 = vpop.permute.xlu0 %1662  ;;  %v1435_v25 = vpop.permute.xlu1 %1434  ;;  %1520 = vmatprep.mubr.bf16.mxu0 %v8932_v0  ;;  %v8102_v22 = vld [vmem:[%s10769_s3 + $0xc] sm:$0xf] }
 0x3b3   : > { %v1453_v24 = vsel %vm1452_vm14, %v1435_v25, %v1437_v50 }
 0x3b4   : > { %2810 = vrot.lane.b32.xlu1 %v9234_v63, %s8948_s18  ;;  %3038 = vrot.lane.b32.xlu0 %v9234_v63, %s8949_s21  ;;  %v1465_v45 = vsel %vm1025_vm12, %v1453_v24, 0 }
 0x3b5   : > { %8092 = vmatmul.mubr.msk.bf16.vlgmr.msra.gmra.mrb[16].mxu1 %vm716_vm2, %v964_v37 }
 0x3b6   : > { %v1667_v27 = vpop.permute.xlu0 %1666  ;;  %v1439_v28 = vpop.permute.xlu1 %1438  ;;  %1561 = vmatprep.mubr.bf16.mxu1 %v8932_v0 }
 0x3b7   : > { %v1454_v29 = vsel %vm1452_vm14, %v1437_v50, %v1439_v28  ;;  %v1455_v47 = vsel %vm1452_vm14, %v1439_v28, %v1441_v15 }
 0x3b8   : > { %2814 = vrot.lane.b32.xlu1 %v9242_v2, %s8948_s18  ;;  %3042 = vrot.lane.b32.xlu0 %v9242_v2, %s8949_s21  ;;  %v1471_v54 = vsel %vm1025_vm12, %v1455_v47, 0 }
 0x3b9   : > { %8094 = vmatprep.subr.msk.bf16.mxu0 %vm1025_vm12, %v1454_v29 }
 0x3ba   : > { %1489 = vmatpush1.bf16.msra.mxu0 %v1465_v45  ;;  %v1671_v48 = vpop.permute.xlu0 %1670  ;;  %v1443_v49 = vpop.permute.xlu1 %1442 }
 0x3bb   : > { %v1456_v50 = vsel %vm1452_vm14, %v1441_v15, %v1443_v49  ;;  %v1457_v60 = vsel %vm1452_vm14, %v1443_v49, %v1445_v41 }
 0x3bc   : > { %2818 = vrot.lane.b32.xlu1 %v9246_v4, %s8948_s18  ;;  %3046 = vrot.lane.b32.xlu0 %v9246_v4, %s8949_s21  ;;  %v1477_v37 = vsel %vm1025_vm12, %v1457_v60, 0  ;;  %s8954_s18 = smov 28  }
 0x3bd   : > { %8096 = vmatprep.subr.msk.bf16.mxu1 %vm1025_vm12, %v1456_v50  ;;  %8095 = vmatmul.mubr.msk.bf16.vlgmr.msra.gmra.mrb[12].mxu0 %vm716_vm2, %v8093_v53 }
 0x3be   : > { %1530 = vmatpush1.bf16.msra.mxu1 %v1471_v54  ;;  %v1675_v14 = vpop.permute.xlu0 %1674  ;;  %v1447_v16 = vpop.permute.xlu1 %1446  ;;  %1602 = vmatprep.mubr.bf16.mxu0 %v8932_v0 }
 0x3bf   : > { %v1458_v15 = vsel %vm1452_vm14, %v1445_v41, %v1447_v16  ;;  %v1459_v17 = vsel %vm1452_vm14, %v1447_v16, %v1449_v11 }
 0x3c0   : > { %3032 = vrot.lane.b32.xlu1 %v9220_v52, %s8949_s21  ;;  %3260 = vrot.lane.b32.xlu0 %v9220_v52, %s8950_s16  ;;  %v1483_v46 = vsel %vm1025_vm12, %v1459_v17, 0 }
 0x3c1   : > { %8098 = vmatprep.subr.msk.bf16.mxu0 %vm1025_vm12, %v1458_v15  ;;  %8097 = vmatmul.mubr.msk.bf16.vlgmr.msra.gmra.mrb[12].mxu1 %vm716_vm2, %v8093_v53 }
 0x3c2   : > { %1571 = vmatpush1.bf16.msra.mxu0 %v1477_v37  ;;  %v1679_v40 = vpop.permute.xlu0 %1678  ;;  %v1451_v18 = vpop.permute.xlu1 %1450  ;;  %1643 = vmatprep.mubr.bf16.mxu1 %v8932_v0 }
 0x3c3   : > { %v1460_v41 = vsel %vm1452_vm14, %v1449_v11, %v1451_v18  ;;  %vm4441_vm14 = vcmask 973824  }
 0x3c4   : > { %3036 = vrot.lane.b32.xlu1 %v9230_v59, %s8949_s21  ;;  %3264 = vrot.lane.b32.xlu0 %v9230_v59, %s8950_s16 }
 0x3c5   : > { %8100 = vmatprep.subr.msk.bf16.mxu1 %vm1025_vm12, %v1460_v41  ;;  %8099 = vmatmul.mubr.msk.bf16.vlgmr.msra.gmra.mrb[16].mxu0 %vm716_vm2, %v8093_v53 }
 0x3c6   : > { %1612 = vmatpush1.bf16.msra.mxu1 %v1483_v46  ;;  %v1893_v3 = vpop.permute.xlu0 %1892  ;;  %v1665_v5 = vpop.permute.xlu1 %1664  ;;  %1748 = vmatprep.mubr.bf16.mxu0 %v8932_v0 }
 0x3c7   : > { %v1681_v6 = vsel %vm1680_vm15, %v1663_v23, %v1665_v5  ;;  %v1682_v11 = vsel %vm1680_vm15, %v1665_v5, %v1667_v27  ;;  %v8111_v5 = vld [vmem:[%s10769_s3 + $0x10] sm:$0xf] }
 0x3c8   : > { %3040 = vrot.lane.b32.xlu1 %v9238_v1, %s8949_s21  ;;  %3268 = vrot.lane.b32.xlu0 %v9238_v1, %s8950_s16  ;;  %v1693_v19 = vsel %vm1025_vm12, %v1681_v6, 0 }
 0x3c9   : > { %8103 = vmatprep.subr.msk.bf16.mxu0 %vm1025_vm12, %v1682_v11  ;;  %8101 = vmatmul.mubr.msk.bf16.vlgmr.msra.gmra.mrb[16].mxu1 %vm716_vm2, %v8093_v53 }
 0x3ca   : > { %1717 = vmatpush1.bf16.msra.mxu0 %v1693_v19  ;;  %v1897_v20 = vpop.permute.xlu0 %1896  ;;  %v1669_v21 = vpop.permute.xlu1 %1668  ;;  %1789 = vmatprep.mubr.bf16.mxu1 %v8932_v0 }
 0x3cb   : > { %v1683_v23 = vsel %vm1680_vm15, %v1667_v27, %v1669_v21  ;;  %v1684_v25 = vsel %vm1680_vm15, %v1669_v21, %v1671_v48 }
 0x3cc   : > { %3044 = vrot.lane.b32.xlu1 %v9226_v56, %s8949_s21  ;;  %3272 = vrot.lane.b32.xlu0 %v9226_v56, %s8950_s16  ;;  %v1699_v24 = vsel %vm1025_vm12, %v1683_v23, 0 }
 0x3cd   : > { %8105 = vmatprep.subr.msk.bf16.mxu1 %vm1025_vm12, %v1684_v25  ;;  %8104 = vmatmul.mubr.msk.bf16.vlgmr.msra.gmra.mrb[12].mxu0 %vm716_vm2, %v8102_v22 }
 0x3ce   : > { %1758 = vmatpush1.bf16.msra.mxu1 %v1699_v24  ;;  %v1901_v28 = vpop.permute.xlu0 %1900  ;;  %v1673_v29 = vpop.permute.xlu1 %1672  ;;  %1830 = vmatprep.mubr.bf16.mxu0 %v8932_v0 }
 0x3cf   : > { %v1685_v27 = vsel %vm1680_vm15, %v1671_v48, %v1673_v29  ;;  %v1686_v45 = vsel %vm1680_vm15, %v1673_v29, %v1675_v14 }
 0x3d0   : > { %3486 = vrot.lane.b32.xlu0 %v9218_v51, %s8951_s19  ;;  %3258 = vrot.lane.b32.xlu1 %v9218_v51, %s8950_s16  ;;  %v1705_v47 = vsel %vm1025_vm12, %v1685_v27, 0 }
 0x3d1   : > { %8107 = vmatprep.subr.msk.bf16.mxu0 %vm1025_vm12, %v1686_v45  ;;  %8106 = vmatmul.mubr.msk.bf16.vlgmr.msra.gmra.mrb[12].mxu1 %vm716_vm2, %v8102_v22 }
 0x3d2   : > { %1799 = vmatpush1.bf16.msra.mxu0 %v1705_v47  ;;  %v1905_v49 = vpop.permute.xlu0 %1904  ;;  %v1677_v53 = vpop.permute.xlu1 %1676  ;;  %1871 = vmatprep.mubr.bf16.mxu1 %v8932_v0 }
 0x3d3   : > { %v1687_v48 = vsel %vm1680_vm15, %v1675_v14, %v1677_v53  ;;  %v1688_v50 = vsel %vm1680_vm15, %v1677_v53, %v1679_v40  ;;  %vm4669_vm15 = vcmask 965632  }
 0x3d4   : > { %3490 = vrot.lane.b32.xlu0 %v9224_v55, %s8951_s19  ;;  %3262 = vrot.lane.b32.xlu1 %v9224_v55, %s8950_s16  ;;  %v1711_v54 = vsel %vm1025_vm12, %v1687_v48, 0  ;;  %v8120_v48 = vld [vmem:[%s10769_s3 + $0x14] sm:$0xf] }
 0x3d5   : > { %8109 = vmatprep.subr.msk.bf16.mxu1 %vm1025_vm12, %v1688_v50  ;;  %8108 = vmatmul.mubr.msk.bf16.vlgmr.msra.gmra.mrb[16].mxu0 %vm716_vm2, %v8102_v22 }
 0x3d6   : > { %1840 = vmatpush1.bf16.msra.mxu1 %v1711_v54  ;;  %v2119_v60 = vpop.permute.xlu0 %2118  ;;  %v1891_v16 = vpop.permute.xlu1 %1890  ;;  %1976 = vmatprep.mubr.bf16.mxu0 %v8932_v0 }
 0x3d7   : > { %v1909_v14 = vsel %vm1908_vm3, %v1891_v16, %v1893_v3 }
 0x3d8   : > { %3494 = vrot.lane.b32.xlu0 %v9234_v63, %s8951_s19  ;;  %3266 = vrot.lane.b32.xlu1 %v9234_v63, %s8950_s16  ;;  %v1921_v40 = vsel %vm1025_vm12, %v1909_v14, 0 }
 0x3d9   : > { %8110 = vmatmul.mubr.msk.bf16.vlgmr.msra.gmra.mrb[16].mxu1 %vm716_vm2, %v8102_v22 }
 0x3da   : > { %v2123_v15 = vpop.permute.xlu0 %2122  ;;  %v1895_v37 = vpop.permute.xlu1 %1894  ;;  %2017 = vmatprep.mubr.bf16.mxu1 %v8932_v0 }
 0x3db   : > { %v1910_v17 = vsel %vm1908_vm3, %v1893_v3, %v1895_v37  ;;  %v1911_v18 = vsel %vm1908_vm3, %v1895_v37, %v1897_v20 }
 0x3dc   : > { %3498 = vrot.lane.b32.xlu0 %v9242_v2, %s8951_s19  ;;  %3270 = vrot.lane.b32.xlu1 %v9242_v2, %s8950_s16  ;;  %v1927_v6 = vsel %vm1025_vm12, %v1911_v18, 0 }
 0x3dd   : > { %8112 = vmatprep.subr.msk.bf16.mxu0 %vm1025_vm12, %v1910_v17 }
 0x3de   : > { %1945 = vmatpush1.bf16.msra.mxu0 %v1921_v40  ;;  %v2127_v41 = vpop.permute.xlu0 %2126  ;;  %v1899_v46 = vpop.permute.xlu1 %1898 }
 0x3df   : > { %v1912_v3 = vsel %vm1908_vm3, %v1897_v20, %v1899_v46  ;;  %v1913_v11 = vsel %vm1908_vm3, %v1899_v46, %v1901_v28 }
 0x3e0   : > { %3502 = vrot.lane.b32.xlu0 %v9246_v4, %s8951_s19  ;;  %3274 = vrot.lane.b32.xlu1 %v9246_v4, %s8950_s16  ;;  %v1933_v22 = vsel %vm1025_vm12, %v1913_v11, 0  ;;  %s8958_s16 = smov 27  }
 0x3e1   : > { %8114 = vmatprep.subr.msk.bf16.mxu1 %vm1025_vm12, %v1912_v3  ;;  %8113 = vmatmul.mubr.msk.bf16.vlgmr.msra.gmra.mrb[12].mxu0 %vm716_vm2, %v8111_v5 }
 0x3e2   : > { %1986 = vmatpush1.bf16.msra.mxu1 %v1927_v6  ;;  %v2131_v19 = vpop.permute.xlu0 %2130  ;;  %v1903_v21 = vpop.permute.xlu1 %1902  ;;  %2058 = vmatprep.mubr.bf16.mxu0 %v8932_v0 }
 0x3e3   : > { %v1914_v20 = vsel %vm1908_vm3, %v1901_v28, %v1903_v21  ;;  %v1915_v23 = vsel %vm1908_vm3, %v1903_v21, %v1905_v49 }
 0x3e4   : > { %3716 = vrot.lane.b32.xlu0 %v9220_v52, %s8952_s22  ;;  %3488 = vrot.lane.b32.xlu1 %v9220_v52, %s8951_s19  ;;  %v1939_v52 = vsel %vm1025_vm12, %v1915_v23, 0  ;;  %v9626_v23 = vpack.c.bf16 %v9199_v39, %v9199_v39 }
 0x3e5   : > { %8116 = vmatprep.subr.msk.bf16.mxu0 %vm1025_vm12, %v1914_v20  ;;  %8115 = vmatmul.mubr.msk.bf16.vlgmr.msra.gmra.mrb[12].mxu1 %vm716_vm2, %v8111_v5 }
 0x3e6   : > { %2027 = vmatpush1.bf16.msra.mxu0 %v1933_v22  ;;  %v2135_v25 = vpop.permute.xlu0 %2134  ;;  %v1907_v24 = vpop.permute.xlu1 %1906  ;;  %2099 = vmatprep.mubr.bf16.mxu1 %v8932_v0  ;;  %v8129_v22 = vld [vmem:[%s10769_s3 + $0x18] sm:$0xf] }
 0x3e7   : > { %v1916_v28 = vsel %vm1908_vm3, %v1905_v49, %v1907_v24  ;;  %vm4897_vm3 = vcmask 957440  }
 0x3e8   : > { %3720 = vrot.lane.b32.xlu0 %v9230_v59, %s8952_s22  ;;  %3492 = vrot.lane.b32.xlu1 %v9230_v59, %s8951_s19 }
 0x3e9   : > { %8118 = vmatprep.subr.msk.bf16.mxu1 %vm1025_vm12, %v1916_v28  ;;  %8117 = vmatmul.mubr.msk.bf16.vlgmr.msra.gmra.mrb[16].mxu0 %vm716_vm2, %v8111_v5 }
 0x3ea   : > { %2068 = vmatpush1.bf16.msra.mxu1 %v1939_v52  ;;  %v2349_v29 = vpop.permute.xlu0 %2348  ;;  %v2121_v27 = vpop.permute.xlu1 %2120  ;;  %2204 = vmatprep.mubr.bf16.mxu0 %v8932_v0  ;;  %v9642_v52 = vpack.c.bf16 %v9205_v43, %v9205_v43 }
 0x3eb   : > { %v2137_v45 = vsel %vm2136_vm4, %v2119_v60, %v2121_v27  ;;  %v2138_v47 = vsel %vm2136_vm4, %v2121_v27, %v2123_v15 }
 0x3ec   : > { %3724 = vrot.lane.b32.xlu0 %v9238_v1, %s8952_s22  ;;  %3496 = vrot.lane.b32.xlu1 %v9238_v1, %s8951_s19  ;;  %v2149_v59 = vsel %vm1025_vm12, %v2137_v45, 0 }
 0x3ed   : > { %8121 = vmatprep.subr.msk.bf16.mxu0 %vm1025_vm12, %v2138_v47  ;;  %8119 = vmatmul.mubr.msk.bf16.vlgmr.msra.gmra.mrb[16].mxu1 %vm716_vm2, %v8111_v5 }
 0x3ee   : > { %2173 = vmatpush1.bf16.msra.mxu0 %v2149_v59  ;;  %v2353_v49 = vpop.permute.xlu0 %2352  ;;  %v2125_v53 = vpop.permute.xlu1 %2124  ;;  %2245 = vmatprep.mubr.bf16.mxu1 %v8932_v0  ;;  %v9656_v59 = vpack.c.bf16 %v9190_v31, %v9190_v31 }
 0x3ef   : > { %v2139_v50 = vsel %vm2136_vm4, %v2123_v15, %v2125_v53  ;;  %v2140_v54 = vsel %vm2136_vm4, %v2125_v53, %v2127_v41 }
 0x3f0   : > { %3728 = vrot.lane.b32.xlu0 %v9226_v56, %s8952_s22  ;;  %3500 = vrot.lane.b32.xlu1 %v9226_v56, %s8951_s19  ;;  %v2155_v1 = vsel %vm1025_vm12, %v2139_v50, 0  ;;  %s8955_s19 = smov 19   ;;  %v8898_v50 = vld [vmem:[#allocation2 + $0x24] ss:$0 sps:$4 sm:$0xff]  }
 0x3f1   : > { %8123 = vmatprep.subr.msk.bf16.mxu1 %vm1025_vm12, %v2140_v54  ;;  %8122 = vmatmul.mubr.msk.bf16.vlgmr.msra.gmra.mrb[12].mxu0 %vm716_vm2, %v8120_v48  ;;  %v9671_v54 = vpack.c.bf16 %v9196_v33, %v9196_v33 }
 0x3f2   : > { %2214 = vmatpush1.bf16.msra.mxu1 %v2155_v1  ;;  %v2357_v60 = vpop.permute.xlu0 %2356  ;;  %v2129_v16 = vpop.permute.xlu1 %2128  ;;  %2286 = vmatprep.mubr.bf16.mxu0 %v8932_v0 }
 0x3f3   : > { %v2141_v14 = vsel %vm2136_vm4, %v2127_v41, %v2129_v16  ;;  %v2142_v15 = vsel %vm2136_vm4, %v2129_v16, %v2131_v19  ;;  %v8138_v16 = vld [vmem:[%s10769_s3 + $0x1c] sm:$0xf] }
 0x3f4   : > { %5579 = vrot.lane.b32.xlu0 %v9158_v58, %s8953_s17  ;;  %3714 = vrot.lane.b32.xlu1 %v9218_v51, %s8952_s22  ;;  %v2161_v56 = vsel %vm1025_vm12, %v2141_v14, 0 }
 0x3f5   : > { %8125 = vmatprep.subr.msk.bf16.mxu0 %vm1025_vm12, %v2142_v15  ;;  %8124 = vmatmul.mubr.msk.bf16.vlgmr.msra.gmra.mrb[12].mxu1 %vm716_vm2, %v8120_v48 }
 0x3f6   : > { %2255 = vmatpush1.bf16.msra.mxu0 %v2161_v56  ;;  %v2361_v37 = vpop.permute.xlu0 %2360  ;;  %v2133_v17 = vpop.permute.xlu1 %2132  ;;  %2327 = vmatprep.mubr.bf16.mxu1 %v8932_v0  ;;  %v9690_v56 = vpack.c.bf16 %v9202_v42, %v9202_v42 }
 0x3f7   : > { %v2143_v40 = vsel %vm2136_vm4, %v2131_v19, %v2133_v17  ;;  %v2144_v18 = vsel %vm2136_vm4, %v2133_v17, %v2135_v25  ;;  %vm5125_vm4 = vcmask 318464  }
 0x3f8   : > { %6035 = vrot.lane.b32.xlu0 %v9158_v58, %s8954_s18  ;;  %3718 = vrot.lane.b32.xlu1 %v9224_v55, %s8952_s22  ;;  %v2167_v51 = vsel %vm1025_vm12, %v2143_v40, 0  ;;  %v9593_v55 = vpack.c.bf16 %v9187_v30, %v9187_v30  ;;  %v9608_v30 = vpack.c.bf16 %v9193_v32, %v9193_v32 }
 0x3f9   : > { %8127 = vmatprep.subr.msk.bf16.mxu1 %vm1025_vm12, %v2144_v18  ;;  %8126 = vmatmul.mubr.msk.bf16.vlgmr.msra.gmra.mrb[16].mxu0 %vm716_vm2, %v8120_v48 }
 0x3fa   : > { %2296 = vmatpush1.bf16.msra.mxu1 %v2167_v51  ;;  %v9583_v41 = vpop.permute.xlu0 %2574  ;;  %v2347_v46 = vpop.permute.xlu1 %2346  ;;  %2432 = vmatprep.mubr.bf16.mxu0 %v8932_v0  ;;  %v9706_v51 = vpack.c.bf16 %v9208_v44, %v9208_v44 }
 0x3fb   : > { %v2365_v5 = vsel %vm2364_vm5, %v2347_v46, %v2349_v29 }
 0x3fc   : > { %6491 = vrot.lane.b32.xlu0 %v9158_v58, %s8955_s19  ;;  %3722 = vrot.lane.b32.xlu1 %v9234_v63, %s8952_s22  ;;  %v2377_v63 = vsel %vm1025_vm12, %v2365_v5, 0 }
 0x3fd   : > { %8128 = vmatmul.mubr.msk.bf16.vlgmr.msra.gmra.mrb[16].mxu1 %vm716_vm2, %v8120_v48 }
 0x3fe   : > { %v9596_v3 = vpop.permute.xlu0 %2578  ;;  %v2351_v6 = vpop.permute.xlu1 %2350  ;;  %2473 = vmatprep.mubr.bf16.mxu1 %v8932_v0 }
 0x3ff   : > { %v2366_v11 = vsel %vm2364_vm5, %v2349_v29, %v2351_v6  ;;  %v2367_v19 = vsel %vm2364_vm5, %v2351_v6, %v2353_v49 }
 0x400   : > { %4195 = vrot.lane.b32.xlu0 %v9593_v55, %s8935_s24  ;;  %3726 = vrot.lane.b32.xlu1 %v9242_v2, %s8952_s22  ;;  %v2383_v32 = vsel %vm1025_vm12, %v2367_v19, 0 }
 0x401   : > { %8130 = vmatprep.subr.msk.bf16.mxu0 %vm1025_vm12, %v2366_v11 }
 0x402   : > { %2401 = vmatpush1.bf16.msra.mxu0 %v2377_v63  ;;  %v9611_v21 = vpop.permute.xlu0 %2582  ;;  %v2355_v20 = vpop.permute.xlu1 %2354 }
 0x403   : > { %v2368_v2 = vsel %vm2364_vm5, %v2353_v49, %v2355_v20  ;;  %v2369_v25 = vsel %vm2364_vm5, %v2355_v20, %v2357_v60 }
 0x404   : > { %4199 = vrot.lane.b32.xlu0 %v9608_v30, %s8935_s24  ;;  %3730 = vrot.lane.b32.xlu1 %v9246_v4, %s8952_s22  ;;  %s8956_s22 = smov 38   ;;  %v2389_v39 = vsel %vm1025_vm12, %v2369_v25, 0 }
 0x405   : > { %8132 = vmatprep.subr.msk.bf16.mxu1 %vm1025_vm12, %v2368_v2  ;;  %8131 = vmatmul.mubr.msk.bf16.vlgmr.msra.gmra.mrb[12].mxu0 %vm716_vm2, %v8129_v22 }
 0x406   : > { %2442 = vmatpush1.bf16.msra.mxu1 %v2383_v32  ;;  %v9629_v24 = vpop.permute.xlu0 %2586  ;;  %v2359_v28 = vpop.permute.xlu1 %2358  ;;  %2514 = vmatprep.mubr.bf16.mxu0 %v8932_v0 }
 0x407   : > { %v2370_v4 = vsel %vm2364_vm5, %v2357_v60, %v2359_v28  ;;  %v2371_v29 = vsel %vm2364_vm5, %v2359_v28, %v2361_v37 }
 0x408   : > { %4203 = vrot.lane.b32.xlu0 %v9626_v23, %s8935_s24  ;;  %5351 = vrot.lane.b32.xlu1 %v9158_v58, %s8956_s22  ;;  %v2395_v43 = vsel %vm1025_vm12, %v2371_v29, 0 }
 0x409   : > { %8134 = vmatprep.subr.msk.bf16.mxu0 %vm1025_vm12, %v2370_v4  ;;  %8133 = vmatmul.mubr.msk.bf16.vlgmr.msra.gmra.mrb[12].mxu1 %vm716_vm2, %v8129_v22 }
 0x40a   : > { %2483 = vmatpush1.bf16.msra.mxu0 %v2389_v39  ;;  %v2591_v27 = vpop.permute.xlu0 %2590  ;;  %v2363_v45 = vpop.permute.xlu1 %2362  ;;  %2555 = vmatprep.mubr.bf16.mxu1 %v8932_v0 }
 0x40b   : > { %v2372_v47 = vsel %vm2364_vm5, %v2361_v37, %v2363_v45  ;;  %vm5353_vm5 = vcmask 310272  }
 0x40c   : > { %4207 = vrot.lane.b32.xlu0 %v9642_v52, %s8935_s24  ;;  %5807 = vrot.lane.b32.xlu1 %v9158_v58, %s8957_s23 }
 0x40d   : > { %8136 = vmatprep.subr.msk.bf16.mxu1 %vm1025_vm12, %v2372_v47  ;;  %8135 = vmatmul.mubr.msk.bf16.vlgmr.msra.gmra.mrb[16].mxu0 %vm716_vm2, %v8129_v22 }
 0x40e   : > { %2524 = vmatpush1.bf16.msra.mxu1 %v2395_v43  ;;  %v2805_v49 = vpop.permute.xlu0 %2804  ;;  %v2577_v53 = vpop.permute.xlu1 %2576  ;;  %2660 = vmatprep.mubr.bf16.mxu0 %v8932_v0 }
 0x40f   : > { %v2593_v48 = vsel %vm2592_vm6, %v9583_v41, %v2577_v53  ;;  %v2594_v58 = vsel %vm2592_vm6, %v2577_v53, %v9596_v3 }
 0x410   : > { %4425 = vrot.lane.b32.xlu0 %v9656_v59, %s8937_s29  ;;  %6263 = vrot.lane.b32.xlu1 %v8898_v50, %s8958_s16  ;;  %v2605_v31 = vsel %vm1025_vm12, %v2593_v48, 0 }
 0x411   : > { %8139 = vmatprep.subr.msk.bf16.mxu0 %vm1025_vm12, %v2594_v58  ;;  %8137 = vmatmul.mubr.msk.bf16.vlgmr.msra.gmra.mrb[16].mxu1 %vm716_vm2, %v8129_v22 }
 0x412   : > { %2629 = vmatpush1.bf16.msra.mxu0 %v2605_v31  ;;  %v2809_v1 = vpop.permute.xlu0 %2808  ;;  %v2581_v60 = vpop.permute.xlu1 %2580  ;;  %2701 = vmatprep.mubr.bf16.mxu1 %v8932_v0 }
 0x413   : > { %v2595_v14 = vsel %vm2592_vm6, %v9596_v3, %v2581_v60  ;;  %v2596_v15 = vsel %vm2592_vm6, %v2581_v60, %v9611_v21 }
 0x414   : > { %4429 = vrot.lane.b32.xlu0 %v9671_v54, %s8937_s29  ;;  %4197 = vrot.lane.b32.xlu1 %v9656_v59, %s8935_s24  ;;  %v2611_v33 = vsel %vm1025_vm12, %v2595_v14, 0 }
 0x415   : > { %8141 = vmatprep.subr.msk.bf16.mxu1 %vm1025_vm12, %v2596_v15  ;;  %8140 = vmatmul.mubr.msk.bf16.vlgmr.msra.gmra.mrb[12].mxu0 %vm716_vm2, %v8138_v16 }
 0x416   : > { %2670 = vmatpush1.bf16.msra.mxu1 %v2611_v33  ;;  %v2813_v37 = vpop.permute.xlu0 %2812  ;;  %v2585_v17 = vpop.permute.xlu1 %2584  ;;  %2742 = vmatprep.mubr.bf16.mxu0 %v8932_v0  ;;  %v8156_v33 = vld [vmem:[%s10769_s3 + $0x24] sm:$0xf] }
 0x417   : > { %v2597_v40 = vsel %vm2592_vm6, %v9611_v21, %v2585_v17  ;;  %v2598_v18 = vsel %vm2592_vm6, %v2585_v17, %v9629_v24 }
 0x418   : > { %4433 = vrot.lane.b32.xlu0 %v9690_v56, %s8937_s29  ;;  %4201 = vrot.lane.b32.xlu1 %v9671_v54, %s8935_s24  ;;  %v2617_v42 = vsel %vm1025_vm12, %v2597_v40, 0 }
 0x419   : > { %8143 = vmatprep.subr.msk.bf16.mxu0 %vm1025_vm12, %v2598_v18  ;;  %8142 = vmatmul.mubr.msk.bf16.vlgmr.msra.gmra.mrb[12].mxu1 %vm716_vm2, %v8138_v16 }
 0x41a   : > { %2711 = vmatpush1.bf16.msra.mxu0 %v2617_v42  ;;  %v2817_v41 = vpop.permute.xlu0 %2816  ;;  %v2589_v46 = vpop.permute.xlu1 %2588  ;;  %2783 = vmatprep.mubr.bf16.mxu1 %v8932_v0 }
 0x41b   : > { %v2599_v5 = vsel %vm2592_vm6, %v9629_v24, %v2589_v46  ;;  %v2600_v3 = vsel %vm2592_vm6, %v2589_v46, %v2591_v27  ;;  %v8147_v24 = vld [vmem:[%s10769_s3 + $0x20] sm:$0xf]  ;;  %vm5581_vm6 = vcmask 302080  }
 0x41c   : > { %4437 = vrot.lane.b32.xlu0 %v9706_v51, %s8937_s29  ;;  %4205 = vrot.lane.b32.xlu1 %v9690_v56, %s8935_s24  ;;  %v2623_v6 = vsel %vm1025_vm12, %v2599_v5, 0 }
 0x41d   : > { %8145 = vmatprep.subr.msk.bf16.mxu1 %vm1025_vm12, %v2600_v3  ;;  %8144 = vmatmul.mubr.msk.bf16.vlgmr.msra.gmra.mrb[16].mxu0 %vm716_vm2, %v8138_v16 }
 0x41e   : > { %2752 = vmatpush1.bf16.msra.mxu1 %v2623_v6  ;;  %v3031_v44 = vpop.permute.xlu0 %3030  ;;  %v2803_v11 = vpop.permute.xlu1 %2802  ;;  %2888 = vmatprep.mubr.bf16.mxu0 %v8932_v0 }
 0x41f   : > { %v2821_v63 = vsel %vm2820_vm7, %v2803_v11, %v2805_v49 }
 0x420   : > { %4651 = vrot.lane.b32.xlu0 %v9593_v55, %s8936_s28  ;;  %4209 = vrot.lane.b32.xlu1 %v9706_v51, %s8935_s24  ;;  %v2833_v22 = vsel %vm1025_vm12, %v2821_v63, 0 }
 0x421   : > { %8146 = vmatmul.mubr.msk.bf16.vlgmr.msra.gmra.mrb[16].mxu1 %vm716_vm2, %v8138_v16 }
 0x422   : > { %v3035_v19 = vpop.permute.xlu0 %3034  ;;  %v2807_v21 = vpop.permute.xlu1 %2806  ;;  %2929 = vmatprep.mubr.bf16.mxu1 %v8932_v0 }
 0x423   : > { %v2822_v20 = vsel %vm2820_vm7, %v2805_v49, %v2807_v21  ;;  %v2823_v2 = vsel %vm2820_vm7, %v2807_v21, %v2809_v1 }
 0x424   : > { %4655 = vrot.lane.b32.xlu0 %v9608_v30, %s8936_s28  ;;  %4423 = vrot.lane.b32.xlu1 %v9593_v55, %s8937_s29  ;;  %v2839_v4 = vsel %vm1025_vm12, %v2823_v2, 0 }
 0x425   : > { %8148 = vmatprep.subr.msk.bf16.mxu0 %vm1025_vm12, %v2822_v20 }
 0x426   : > { %2857 = vmatpush1.bf16.msra.mxu0 %v2833_v22  ;;  %v3039_v32 = vpop.permute.xlu0 %3038  ;;  %v2811_v25 = vpop.permute.xlu1 %2810 }
 0x427   : > { %v2824_v28 = vsel %vm2820_vm7, %v2809_v1, %v2811_v25  ;;  %v2825_v39 = vsel %vm2820_vm7, %v2811_v25, %v2813_v37 }
 0x428   : > { %4659 = vrot.lane.b32.xlu0 %v9626_v23, %s8936_s28  ;;  %4427 = vrot.lane.b32.xlu1 %v9608_v30, %s8937_s29  ;;  %v2845_v47 = vsel %vm1025_vm12, %v2825_v39, 0  ;;  %v8165_v39 = vld [vmem:[%s10769_s3 + $0x28] sm:$0xf] }
 0x429   : > { %8150 = vmatprep.subr.msk.bf16.mxu1 %vm1025_vm12, %v2824_v28  ;;  %8149 = vmatmul.mubr.msk.bf16.vlgmr.msra.gmra.mrb[12].mxu0 %vm716_vm2, %v8147_v24 }
 0x42a   : > { %2898 = vmatpush1.bf16.msra.mxu1 %v2839_v4  ;;  %v3043_v29 = vpop.permute.xlu0 %3042  ;;  %v2815_v27 = vpop.permute.xlu1 %2814  ;;  %2970 = vmatprep.mubr.bf16.mxu0 %v8932_v0 }
 0x42b   : > { %v2826_v45 = vsel %vm2820_vm7, %v2813_v37, %v2815_v27  ;;  %v2827_v43 = vsel %vm2820_vm7, %v2815_v27, %v2817_v41 }
 0x42c   : > { %4663 = vrot.lane.b32.xlu0 %v9642_v52, %s8936_s28  ;;  %4431 = vrot.lane.b32.xlu1 %v9626_v23, %s8937_s29  ;;  %v2851_v58 = vsel %vm1025_vm12, %v2827_v43, 0 }
 0x42d   : > { %8152 = vmatprep.subr.msk.bf16.mxu0 %vm1025_vm12, %v2826_v45  ;;  %8151 = vmatmul.mubr.msk.bf16.vlgmr.msra.gmra.mrb[12].mxu1 %vm716_vm2, %v8147_v24 }
 0x42e   : > { %2939 = vmatpush1.bf16.msra.mxu0 %v2845_v47  ;;  %v3047_v49 = vpop.permute.xlu0 %3046  ;;  %v2819_v53 = vpop.permute.xlu1 %2818  ;;  %3011 = vmatprep.mubr.bf16.mxu1 %v8932_v0 }
 0x42f   : > { %v2828_v48 = vsel %vm2820_vm7, %v2817_v41, %v2819_v53  ;;  %vm5809_vm7 = vcmask 236544  }
 0x430   : > { %4881 = vrot.lane.b32.xlu0 %v9656_v59, %s8939_s15  ;;  %4435 = vrot.lane.b32.xlu1 %v9642_v52, %s8937_s29  ;;  %s8960_s29 = smov 17  }
 0x431   : > { %8154 = vmatprep.subr.msk.bf16.mxu1 %vm1025_vm12, %v2828_v48  ;;  %8153 = vmatmul.mubr.msk.bf16.vlgmr.msra.gmra.mrb[16].mxu0 %vm716_vm2, %v8147_v24 }
 0x432   : > { %2980 = vmatpush1.bf16.msra.mxu1 %v2851_v58  ;;  %v3261_v50 = vpop.permute.xlu0 %3260  ;;  %v3033_v31 = vpop.permute.xlu1 %3032  ;;  %3116 = vmatprep.mubr.bf16.mxu0 %v8932_v0 }
 0x433   : > { %v3049_v1 = vsel %vm3048_vm8, %v3031_v44, %v3033_v31  ;;  %v3050_v60 = vsel %vm3048_vm8, %v3033_v31, %v3035_v19 }
 0x434   : > { %4885 = vrot.lane.b32.xlu0 %v9671_v54, %s8939_s15  ;;  %4653 = vrot.lane.b32.xlu1 %v9656_v59, %s8936_s28  ;;  %v3061_v16 = vsel %vm1025_vm12, %v3049_v1, 0 }
 0x435   : > { %8157 = vmatprep.subr.msk.bf16.mxu0 %vm1025_vm12, %v3050_v60  ;;  %8155 = vmatmul.mubr.msk.bf16.vlgmr.msra.gmra.mrb[16].mxu1 %vm716_vm2, %v8147_v24 }
 0x436   : > { %3085 = vmatpush1.bf16.msra.mxu0 %v3061_v16  ;;  %v3265_v14 = vpop.permute.xlu0 %3264  ;;  %v3037_v15 = vpop.permute.xlu1 %3036  ;;  %3157 = vmatprep.mubr.bf16.mxu1 %v8932_v0 }
 0x437   : > { %v3051_v37 = vsel %vm3048_vm8, %v3035_v19, %v3037_v15  ;;  %v3052_v17 = vsel %vm3048_vm8, %v3037_v15, %v3039_v32 }
 0x438   : > { %4889 = vrot.lane.b32.xlu0 %v9690_v56, %s8939_s15  ;;  %4657 = vrot.lane.b32.xlu1 %v9671_v54, %s8936_s28  ;;  %v3067_v40 = vsel %vm1025_vm12, %v3051_v37, 0 }
 0x439   : > { %8159 = vmatprep.subr.msk.bf16.mxu1 %vm1025_vm12, %v3052_v17  ;;  %8158 = vmatmul.mubr.msk.bf16.vlgmr.msra.gmra.mrb[12].mxu0 %vm716_vm2, %v8156_v33 }
 0x43a   : > { %3126 = vmatpush1.bf16.msra.mxu1 %v3067_v40  ;;  %v3269_v18 = vpop.permute.xlu0 %3268  ;;  %v3041_v42 = vpop.permute.xlu1 %3040  ;;  %3198 = vmatprep.mubr.bf16.mxu0 %v8932_v0  ;;  %v8174_v40 = vld [vmem:[%s10769_s3 + $0x2c] sm:$0xf] }
 0x43b   : > { %v3053_v41 = vsel %vm3048_vm8, %v3039_v32, %v3041_v42  ;;  %v3054_v46 = vsel %vm3048_vm8, %v3041_v42, %v3043_v29 }
 0x43c   : > { %4893 = vrot.lane.b32.xlu0 %v9706_v51, %s8939_s15  ;;  %4661 = vrot.lane.b32.xlu1 %v9690_v56, %s8936_s28  ;;  %v3073_v5 = vsel %vm1025_vm12, %v3053_v41, 0 }
 0x43d   : > { %8161 = vmatprep.subr.msk.bf16.mxu0 %vm1025_vm12, %v3054_v46  ;;  %8160 = vmatmul.mubr.msk.bf16.vlgmr.msra.gmra.mrb[12].mxu1 %vm716_vm2, %v8156_v33 }
 0x43e   : > { %3167 = vmatpush1.bf16.msra.mxu0 %v3073_v5  ;;  %v3273_v3 = vpop.permute.xlu0 %3272  ;;  %v3045_v6 = vpop.permute.xlu1 %3044  ;;  %3239 = vmatprep.mubr.bf16.mxu1 %v8932_v0 }
 0x43f   : > { %v3055_v44 = vsel %vm3048_vm8, %v3043_v29, %v3045_v6  ;;  %v3056_v11 = vsel %vm3048_vm8, %v3045_v6, %v3047_v49  ;;  %vm6037_vm8 = vcmask 228352  }
 0x440   : > { %5107 = vrot.lane.b32.xlu0 %v9593_v55, %s8938_s14  ;;  %4665 = vrot.lane.b32.xlu1 %v9706_v51, %s8936_s28  ;;  %v3079_v63 = vsel %vm1025_vm12, %v3055_v44, 0 }
 0x441   : > { %8163 = vmatprep.subr.msk.bf16.mxu1 %vm1025_vm12, %v3056_v11  ;;  %8162 = vmatmul.mubr.msk.bf16.vlgmr.msra.gmra.mrb[16].mxu0 %vm716_vm2, %v8156_v33 }
 0x442   : > { %3208 = vmatpush1.bf16.msra.mxu1 %v3079_v63  ;;  %v3487_v19 = vpop.permute.xlu0 %3486  ;;  %v3259_v21 = vpop.permute.xlu1 %3258  ;;  %3344 = vmatprep.mubr.bf16.mxu0 %v8932_v0 }
 0x443   : > { %v3277_v20 = vsel %vm3276_vm9, %v3259_v21, %v3261_v50 }
 0x444   : > { %5111 = vrot.lane.b32.xlu0 %v9608_v30, %s8938_s14  ;;  %4879 = vrot.lane.b32.xlu1 %v9593_v55, %s8939_s15  ;;  %v3289_v25 = vsel %vm1025_vm12, %v3277_v20, 0 }
 0x445   : > { %8164 = vmatmul.mubr.msk.bf16.vlgmr.msra.gmra.mrb[16].mxu1 %vm716_vm2, %v8156_v33 }
 0x446   : > { %v3491_v22 = vpop.permute.xlu0 %3490  ;;  %v3263_v2 = vpop.permute.xlu1 %3262  ;;  %3385 = vmatprep.mubr.bf16.mxu1 %v8932_v0 }
 0x447   : > { %v3278_v32 = vsel %vm3276_vm9, %v3261_v50, %v3263_v2  ;;  %v3279_v24 = vsel %vm3276_vm9, %v3263_v2, %v3265_v14 }
 0x448   : > { %5115 = vrot.lane.b32.xlu0 %v9626_v23, %s8938_s14  ;;  %4883 = vrot.lane.b32.xlu1 %v9608_v30, %s8939_s15  ;;  %v3295_v27 = vsel %vm1025_vm12, %v3279_v24, 0 }
 0x449   : > { %8166 = vmatprep.subr.msk.bf16.mxu0 %vm1025_vm12, %v3278_v32 }
 0x44a   : > { %3313 = vmatpush1.bf16.msra.mxu0 %v3289_v25  ;;  %v3495_v28 = vpop.permute.xlu0 %3494  ;;  %v3267_v4 = vpop.permute.xlu1 %3266 }
 0x44b   : > { %v3280_v29 = vsel %vm3276_vm9, %v3265_v14, %v3267_v4  ;;  %v3281_v45 = vsel %vm3276_vm9, %v3267_v4, %v3269_v18 }
 0x44c   : > { %5119 = vrot.lane.b32.xlu0 %v9642_v52, %s8938_s14  ;;  %4887 = vrot.lane.b32.xlu1 %v9626_v23, %s8939_s15  ;;  %v3301_v53 = vsel %vm1025_vm12, %v3281_v45, 0  ;;  %v8183_v45 = vld [vmem:[%s10769_s3 + $0x30] sm:$0xf] }
 0x44d   : > { %8168 = vmatprep.subr.msk.bf16.mxu1 %vm1025_vm12, %v3280_v29  ;;  %8167 = vmatmul.mubr.msk.bf16.vlgmr.msra.gmra.mrb[12].mxu0 %vm716_vm2, %v8165_v39 }
 0x44e   : > { %3354 = vmatpush1.bf16.msra.mxu1 %v3295_v27  ;;  %v3499_v47 = vpop.permute.xlu0 %3498  ;;  %v3271_v43 = vpop.permute.xlu1 %3270  ;;  %3426 = vmatprep.mubr.bf16.mxu0 %v8932_v0 }
 0x44f   : > { %v3282_v49 = vsel %vm3276_vm9, %v3269_v18, %v3271_v43  ;;  %v3283_v48 = vsel %vm3276_vm9, %v3271_v43, %v3273_v3 }
 0x450   : > { %5337 = vrot.lane.b32.xlu0 %v9656_v59, %s8956_s22  ;;  %4891 = vrot.lane.b32.xlu1 %v9642_v52, %s8939_s15  ;;  %v3307_v1 = vsel %vm1025_vm12, %v3283_v48, 0 }
 0x451   : > { %8170 = vmatprep.subr.msk.bf16.mxu0 %vm1025_vm12, %v3282_v49  ;;  %8169 = vmatmul.mubr.msk.bf16.vlgmr.msra.gmra.mrb[12].mxu1 %vm716_vm2, %v8165_v39  ;;  %v3942_v49 = vld [vmem:[#allocation2 + $0x4] sm:$0xff] }
 0x452   : > { %3395 = vmatpush1.bf16.msra.mxu0 %v3301_v53  ;;  %v3503_v58 = vpop.permute.xlu0 %3502  ;;  %v3275_v50 = vpop.permute.xlu1 %3274  ;;  %3467 = vmatprep.mubr.bf16.mxu1 %v8932_v0 }
 0x453   : > { %v3284_v31 = vsel %vm3276_vm9, %v3273_v3, %v3275_v50  ;;  %vm6265_vm9 = vcmask 220160  }
 0x454   : > { %5341 = vrot.lane.b32.xlu0 %v9671_v54, %s8956_s22  ;;  %5109 = vrot.lane.b32.xlu1 %v9656_v59, %s8938_s14 }
 0x455   : > { %8172 = vmatprep.subr.msk.bf16.mxu1 %vm1025_vm12, %v3284_v31  ;;  %8171 = vmatmul.mubr.msk.bf16.vlgmr.msra.gmra.mrb[16].mxu0 %vm716_vm2, %v8165_v39  ;;  %v8193_v31 = vcombine.low %v3942_v49, %v3942_v49 }
 0x456   : > { %3436 = vmatpush1.bf16.msra.mxu1 %v3307_v1  ;;  %v3717_v60 = vpop.permute.xlu0 %3716  ;;  %v3489_v16 = vpop.permute.xlu1 %3488  ;;  %3572 = vmatprep.mubr.bf16.mxu0 %v8932_v0 }
 0x457   : > { %v3505_v14 = vsel %vm3504_vm10, %v3487_v19, %v3489_v16  ;;  %v3506_v15 = vsel %vm3504_vm10, %v3489_v16, %v3491_v22 }
 0x458   : > { %5345 = vrot.lane.b32.xlu0 %v9690_v56, %s8956_s22  ;;  %5113 = vrot.lane.b32.xlu1 %v9671_v54, %s8938_s14  ;;  %v3517_v33 = vsel %vm1025_vm12, %v3505_v14, 0 }
 0x459   : > { %8175 = vmatprep.subr.msk.bf16.mxu0 %vm1025_vm12, %v3506_v15  ;;  %8173 = vmatmul.mubr.msk.bf16.vlgmr.msra.gmra.mrb[16].mxu1 %vm716_vm2, %v8165_v39 }
 0x45a   : > { %3541 = vmatpush1.bf16.msra.mxu0 %v3517_v33  ;;  %v3721_v37 = vpop.permute.xlu0 %3720  ;;  %v3493_v17 = vpop.permute.xlu1 %3492  ;;  %3613 = vmatprep.mubr.bf16.mxu1 %v8932_v0  ;;  %v3943_v33 = vld [vmem:[#allocation2 + $0xc] sm:$0xff] }
 0x45b   : > { %v3507_v18 = vsel %vm3504_vm10, %v3491_v22, %v3493_v17  ;;  %v3508_v42 = vsel %vm3504_vm10, %v3493_v17, %v3495_v28 }
 0x45c   : > { %5349 = vrot.lane.b32.xlu0 %v9706_v51, %s8956_s22  ;;  %5117 = vrot.lane.b32.xlu1 %v9690_v56, %s8938_s14  ;;  %v3523_v41 = vsel %vm1025_vm12, %v3507_v18, 0 }
 0x45d   : > { %8177 = vmatprep.subr.msk.bf16.mxu1 %vm1025_vm12, %v3508_v42  ;;  %8176 = vmatmul.mubr.msk.bf16.vlgmr.msra.gmra.mrb[12].mxu0 %vm716_vm2, %v8174_v40  ;;  %v8196_v42 = vcombine.high %v3943_v33, %v3943_v33 }
 0x45e   : > { %3582 = vmatpush1.bf16.msra.mxu1 %v3523_v41  ;;  %v3725_v46 = vpop.permute.xlu0 %3724  ;;  %v3497_v5 = vpop.permute.xlu1 %3496  ;;  %3654 = vmatprep.mubr.bf16.mxu0 %v8932_v0 }
 0x45f   : > { %v3509_v3 = vsel %vm3504_vm10, %v3495_v28, %v3497_v5  ;;  %v3510_v6 = vsel %vm3504_vm10, %v3497_v5, %v3499_v47 }
 0x460   : > { %5563 = vrot.lane.b32.xlu0 %v9593_v55, %s8953_s17  ;;  %5121 = vrot.lane.b32.xlu1 %v9706_v51, %s8938_s14  ;;  %v3529_v44 = vsel %vm1025_vm12, %v3509_v3, 0 }
 0x461   : > { %8179 = vmatprep.subr.msk.bf16.mxu0 %vm1025_vm12, %v3510_v6  ;;  %8178 = vmatmul.mubr.msk.bf16.vlgmr.msra.gmra.mrb[12].mxu1 %vm716_vm2, %v8174_v40  ;;  %v3945_v6 = vld [vmem:[#allocation2 + $0x1c] sm:$0xff] }
 0x462   : > { %3623 = vmatpush1.bf16.msra.mxu0 %v3529_v44  ;;  %v3729_v11 = vpop.permute.xlu0 %3728  ;;  %v3501_v63 = vpop.permute.xlu1 %3500  ;;  %3695 = vmatprep.mubr.bf16.mxu1 %v8932_v0 }
 0x463   : > { %v3511_v19 = vsel %vm3504_vm10, %v3499_v47, %v3501_v63  ;;  %v3512_v21 = vsel %vm3504_vm10, %v3501_v63, %v3503_v58  ;;  %vm6493_vm10 = vcmask 154624  }
 0x464   : > { %5567 = vrot.lane.b32.xlu0 %v9608_v30, %s8953_s17  ;;  %5335 = vrot.lane.b32.xlu1 %v9593_v55, %s8956_s22  ;;  %v3535_v20 = vsel %vm1025_vm12, %v3511_v19, 0 }
 0x465   : > { %8181 = vmatprep.subr.msk.bf16.mxu1 %vm1025_vm12, %v3512_v21  ;;  %8180 = vmatmul.mubr.msk.bf16.vlgmr.msra.gmra.mrb[16].mxu0 %vm716_vm2, %v8174_v40 }
 0x466   : > { %3664 = vmatpush1.bf16.msra.mxu1 %v3535_v20  ;;  %v9899_v22 = vpop.permute.xlu0 %5579  ;;  %v3715_v2 = vpop.permute.xlu1 %3714  ;;  %3800 = vmatprep.mubr.bf16.mxu0 %v8932_v0  ;;  %v8192_v20 = vld [vmem:[%s10769_s3 + $0x34] sm:$0xf] }
 0x467   : > { %v3733_v32 = vsel %vm3732_vm11, %v3715_v2, %v3717_v60 }
 0x468   : > { %5571 = vrot.lane.b32.xlu0 %v9626_v23, %s8953_s17  ;;  %5339 = vrot.lane.b32.xlu1 %v9608_v30, %s8956_s22  ;;  %v3745_v4 = vsel %vm1025_vm12, %v3733_v32, 0  ;;  %v8199_v32 = vcombine.low %v3945_v6, %v3945_v6 }
 0x469   : > { %8182 = vmatmul.mubr.msk.bf16.vlgmr.msra.gmra.mrb[16].mxu1 %vm716_vm2, %v8174_v40  ;;  %v3970_v40 = vsel %vm1025_vm12, %v8193_v31, 0 }
 0x46a   : > { %v9908_v25 = vpop.permute.xlu0 %6035  ;;  %v3719_v24 = vpop.permute.xlu1 %3718  ;;  %3841 = vmatprep.mubr.bf16.mxu1 %v8932_v0 }
 0x46b   : > { %v3734_v28 = vsel %vm3732_vm11, %v3717_v60, %v3719_v24  ;;  %v3735_v39 = vsel %vm3732_vm11, %v3719_v24, %v3721_v37  ;;  %v8194_v60 = vcombine.high %v3942_v49, %v3942_v49 }
 0x46c   : > { %5575 = vrot.lane.b32.xlu0 %v9642_v52, %s8953_s17  ;;  %5343 = vrot.lane.b32.xlu1 %v9626_v23, %s8956_s22  ;;  %v3751_v43 = vsel %vm1025_vm12, %v3735_v39, 0 }
 0x46d   : > { %8184 = vmatprep.subr.msk.bf16.mxu0 %vm1025_vm12, %v3734_v28 }
 0x46e   : > { %3769 = vmatpush1.bf16.msra.mxu0 %v3745_v4  ;;  %v9919_v29 = vpop.permute.xlu0 %6491  ;;  %v3723_v27 = vpop.permute.xlu1 %3722  ;;  %v3988_v4 = vsel %vm1025_vm12, %v8199_v32, 0 }
 0x46f   : > { %v3736_v47 = vsel %vm3732_vm11, %v3721_v37, %v3723_v27  ;;  %v3737_v53 = vsel %vm3732_vm11, %v3723_v27, %v3725_v46  ;;  %v3944_v37 = vld [vmem:[#allocation2 + $0x14] sm:$0xff] }
 0x470   : > { %5793 = vrot.lane.b32.xlu0 %v9656_v59, %s8957_s23  ;;  %5347 = vrot.lane.b32.xlu1 %v9642_v52, %s8956_s22  ;;  %v3757_v1 = vsel %vm1025_vm12, %v3737_v53, 0  ;;  %v8198_v41 = vcombine.high %v3944_v37, %v3944_v37  ;;  %v8197_v63 = vcombine.low %v3944_v37, %v3944_v37  ;;  %s10715_s22 = scalar_lea.vmem %s10779_s13, %s8352_s27 }
 0x471   : > { %8185 = vmatmul.mubr.msk.bf16.vlgmr.msra.gmra.mrb[12].mxu0 %vm716_vm2, %v8183_v45  ;;  %8186 = vmatprep.subr.msk.bf16.mxu1 %vm1025_vm12, %v3736_v47 }
 0x472   : > { %3810 = vmatpush1.bf16.msra.mxu1 %v3751_v43  ;;  %v9933_v48 = vpop.permute.xlu0 %4195  ;;  %v3727_v58 = vpop.permute.xlu1 %3726  ;;  %3882 = vmatprep.mubr.bf16.mxu0 %v8932_v0  ;;  %v3982_v2 = vsel %vm1025_vm12, %v8197_v63, 0 }
 0x473   : > { %v3738_v50 = vsel %vm3732_vm11, %v3725_v46, %v3727_v58  ;;  %v3739_v16 = vsel %vm3732_vm11, %v3727_v58, %v3729_v11  ;;  %v8195_v46 = vcombine.low %v3943_v33, %v3943_v33 }
 0x474   : > { %5797 = vrot.lane.b32.xlu0 %v9671_v54, %s8957_s23  ;;  %5565 = vrot.lane.b32.xlu1 %v9656_v59, %s8953_s17  ;;  %v3763_v18 = vsel %vm1025_vm12, %v3739_v16, 0 }
 0x475   : > { %8187 = vmatmul.mubr.msk.bf16.vlgmr.msra.gmra.mrb[12].mxu1 %vm716_vm2, %v8183_v45  ;;  %8188 = vmatprep.subr.msk.bf16.mxu0 %vm1025_vm12, %v3738_v50  ;;  %v3976_v44 = vsel %vm1025_vm12, %v8195_v46, 0 }
 0x476   : > { %3851 = vmatpush1.bf16.msra.mxu0 %v3757_v1  ;;  %v9945_v14 = vpop.permute.xlu0 %4199  ;;  %v3731_v15 = vpop.permute.xlu1 %3730  ;;  %3923 = vmatprep.mubr.bf16.mxu1 %v8932_v0 }
 0x477   : > { %8201 = vmatprep.subr.msk.bf16.mxu0 %vm1025_vm12, %v8194_v60  ;;  %v3740_v17 = vsel %vm3732_vm11, %v3729_v11, %v3731_v15  ;;  %v8200_v11 = vcombine.high %v3945_v6, %v3945_v6  ;;  %v8209_v60 = vld [vmem:[%s10769_s3 + $0x38] sm:$0xf]  ;;  %vm6721_vm11 = vcmask 146432  }
 0x478   : > { %5801 = vrot.lane.b32.xlu0 %v9690_v56, %s8957_s23  ;;  %5569 = vrot.lane.b32.xlu1 %v9671_v54, %s8953_s17 }
 0x479   : > { %8189 = vmatmul.mubr.msk.bf16.vlgmr.msra.gmra.mrb[16].mxu0 %vm716_vm2, %v8183_v45  ;;  %8190 = vmatprep.subr.msk.bf16.mxu1 %vm1025_vm12, %v3740_v17 }
 0x47a   : > { %3892 = vmatpush1.bf16.msra.mxu1 %v3763_v18  ;;  %3994 = vmatpush1.bf16.msra.mxu0 %v3970_v40  ;;  %v4204_v5 = vpop.permute.xlu0 %4203  ;;  %v9958_v3 = vpop.permute.xlu1 %5351 }
 0x47b   : > { %8203 = vmatprep.subr.msk.bf16.mxu1 %vm1025_vm12, %v8196_v42  ;;  %8205 = vmatprep.subr.msk.bf16.mxu0 %vm1025_vm12, %v8198_v41 }
 0x47c   : > { %5805 = vrot.lane.b32.xlu0 %v9706_v51, %s8957_s23  ;;  %5573 = vrot.lane.b32.xlu1 %v9690_v56, %s8953_s17 }
 0x47d   : > { %8191 = vmatmul.mubr.msk.bf16.vlgmr.msra.gmra.mrb[16].mxu1 %vm716_vm2, %v8183_v45  ;;  %4025 = vmatprep.mubr.bf16.mxu0 %v8932_v0 }
 0x47e   : > { %4035 = vmatpush1.bf16.msra.mxu1 %v3976_v44  ;;  %v4208_v19 = vpop.permute.xlu0 %4207  ;;  %v9969_v21 = vpop.permute.xlu1 %5807  ;;  %4066 = vmatprep.mubr.bf16.mxu1 %v8932_v0 }
 0x47f   : > { %8207 = vmatprep.subr.msk.bf16.mxu1 %vm1025_vm12, %v8200_v11 }
 0x480   : > { %6019 = vrot.lane.b32.xlu0 %v9593_v55, %s8954_s18  ;;  %5577 = vrot.lane.b32.xlu1 %v9706_v51, %s8953_s17 }
 0x481   : > { %8202 = vmatmul.mubr.msk.bf16.vlgmr.msra.gmra.mrb[12].mxu0 %vm716_vm2, %v8192_v20 }
 0x482   : > { %4076 = vmatpush1.bf16.msra.mxu0 %v3982_v2  ;;  %v9982_v24 = vpop.permute.xlu0 %4425  ;;  %v9984_v28 = vpop.permute.xlu1 %6263  ;;  %4107 = vmatprep.mubr.bf16.mxu0 %v8932_v0 }
 0x484   : > { %6023 = vrot.lane.b32.xlu0 %v9608_v30, %s8954_s18  ;;  %5791 = vrot.lane.b32.xlu1 %v9593_v55, %s8957_s23 }
 0x485   : > { %8204 = vmatmul.mubr.msk.bf16.vlgmr.msra.gmra.mrb[12].mxu1 %vm716_vm2, %v8192_v20 }
 0x486   : > { %4117 = vmatpush1.bf16.msra.mxu1 %v3988_v4  ;;  %v9993_v39 = vpop.permute.xlu0 %4429  ;;  %v4198_v27 = vpop.permute.xlu1 %4197  ;;  %4148 = vmatprep.mubr.bf16.mxu1 %v8932_v0 }
 0x487   : > { %v4214_v45 = vsel %vm4213_vm13, %v9933_v48, %v4198_v27  ;;  %v4215_v47 = vsel %vm4213_vm13, %v4198_v27, %v9945_v14 }
 0x488   : > { %6027 = vrot.lane.b32.xlu0 %v9626_v23, %s8954_s18  ;;  %5795 = vrot.lane.b32.xlu1 %v9608_v30, %s8957_s23  ;;  %v4226_v43 = vsel %vm1025_vm12, %v4214_v45, 0 }
 0x489   : > { %8206 = vmatmul.mubr.msk.bf16.vlgmr.msra.gmra.mrb[16].mxu0 %vm716_vm2, %v8192_v20  ;;  %8219 = vmatprep.subr.msk.bf16.mxu0 %vm1025_vm12, %v4215_v47 }
 0x48a   : > { %4250 = vmatpush1.bf16.msra.mxu0 %v4226_v43  ;;  %v10007_v49 = vpop.permute.xlu0 %4433  ;;  %v4202_v53 = vpop.permute.xlu1 %4201  ;;  %4281 = vmatprep.mubr.bf16.mxu0 %v8932_v0 }
 0x48b   : > { %v4216_v48 = vsel %vm4213_vm13, %v9945_v14, %v4202_v53  ;;  %v4217_v58 = vsel %vm4213_vm13, %v4202_v53, %v4204_v5 }
 0x48c   : > { %6031 = vrot.lane.b32.xlu0 %v9642_v52, %s8954_s18  ;;  %5799 = vrot.lane.b32.xlu1 %v9626_v23, %s8957_s23  ;;  %v4232_v50 = vsel %vm1025_vm12, %v4216_v48, 0 }
 0x48d   : > { %8208 = vmatmul.mubr.msk.bf16.vlgmr.msra.gmra.mrb[16].mxu1 %vm716_vm2, %v8192_v20  ;;  %8221 = vmatprep.subr.msk.bf16.mxu1 %vm1025_vm12, %v4217_v58  ;;  %v8227_v20 = vld [vmem:[%s10769_s3 + $0x3c] sm:$0xf] }
 0x48e   : > { %4291 = vmatpush1.bf16.msra.mxu1 %v4232_v50  ;;  %v4438_v31 = vpop.permute.xlu0 %4437  ;;  %v4206_v1 = vpop.permute.xlu1 %4205  ;;  %4322 = vmatprep.mubr.bf16.mxu1 %v8932_v0 }
 0x48f   : > { %v4218_v16 = vsel %vm4213_vm13, %v4204_v5, %v4206_v1  ;;  %v4219_v14 = vsel %vm4213_vm13, %v4206_v1, %v4208_v19 }
 0x490   : > { %6249 = vrot.lane.b32.xlu0 %v9656_v59, %s8958_s16  ;;  %5803 = vrot.lane.b32.xlu1 %v9642_v52, %s8957_s23  ;;  %v4238_v15 = vsel %vm1025_vm12, %v4218_v16, 0 }
 0x491   : > { %8220 = vmatmul.mubr.msk.bf16.vlgmr.msra.gmra.mrb[12].mxu0 %vm716_vm2, %v8209_v60  ;;  %8223 = vmatprep.subr.msk.bf16.mxu0 %vm1025_vm12, %v4219_v14 }
 0x492   : > { %4332 = vmatpush1.bf16.msra.mxu0 %v4238_v15  ;;  %v4652_v33 = vpop.permute.xlu0 %4651  ;;  %v4210_v37 = vpop.permute.xlu1 %4209  ;;  %4363 = vmatprep.mubr.bf16.mxu0 %v8932_v0 }
 0x493   : > { %v4220_v17 = vsel %vm4213_vm13, %v4208_v19, %v4210_v37  ;;  %v4221_v40 = vsel %vm4213_vm13, %v4210_v37, %v9286_v8  ;;  %v8236_v37 = vld [vmem:[%s10769_s3 + $0x40] sm:$0xf]  ;;  %vm6949_vm13 = vcmask 138240  }
 0x494   : > { %6253 = vrot.lane.b32.xlu0 %v9671_v54, %s8958_s16  ;;  %6021 = vrot.lane.b32.xlu1 %v9656_v59, %s8954_s18  ;;  %v4244_v18 = vsel %vm1025_vm12, %v4220_v17, 0 }
 0x495   : > { %8222 = vmatmul.mubr.msk.bf16.vlgmr.msra.gmra.mrb[12].mxu1 %vm716_vm2, %v8209_v60  ;;  %8225 = vmatprep.subr.msk.bf16.mxu1 %vm1025_vm12, %v4221_v40 }
 0x496   : > { %4373 = vmatpush1.bf16.msra.mxu1 %v4244_v18  ;;  %v4656_v42 = vpop.permute.xlu0 %4655  ;;  %v4424_v41 = vpop.permute.xlu1 %4423  ;;  %4404 = vmatprep.mubr.bf16.mxu1 %v8932_v0 }
 0x497   : > { %v4442_v8 = vsel %vm4441_vm14, %v4424_v41, %v9982_v24 }
 0x498   : > { %6257 = vrot.lane.b32.xlu0 %v9690_v56, %s8958_s16  ;;  %6025 = vrot.lane.b32.xlu1 %v9671_v54, %s8954_s18  ;;  %v4454_v44 = vsel %vm1025_vm12, %v4442_v8, 0 }
 0x499   : > { %8224 = vmatmul.mubr.msk.bf16.vlgmr.msra.gmra.mrb[16].mxu0 %vm716_vm2, %v8209_v60 }
 0x49a   : > { %v10052_v46 = vpop.permute.xlu0 %4659  ;;  %v4428_v5 = vpop.permute.xlu1 %4427  ;;  %4509 = vmatprep.mubr.bf16.mxu0 %v8932_v0 }
 0x49b   : > { %v4443_v6 = vsel %vm4441_vm14, %v9982_v24, %v4428_v5  ;;  %v4444_v11 = vsel %vm4441_vm14, %v4428_v5, %v9993_v39 }
 0x49c   : > { %6261 = vrot.lane.b32.xlu0 %v9706_v51, %s8958_s16  ;;  %6029 = vrot.lane.b32.xlu1 %v9690_v56, %s8954_s18  ;;  %v4460_v32 = vsel %vm1025_vm12, %v4444_v11, 0 }
 0x49d   : > { %8226 = vmatmul.mubr.msk.bf16.vlgmr.msra.gmra.mrb[16].mxu1 %vm716_vm2, %v8209_v60  ;;  %8228 = vmatprep.subr.msk.bf16.mxu0 %vm1025_vm12, %v4443_v6 }
 0x49e   : > { %4478 = vmatpush1.bf16.msra.mxu0 %v4454_v44  ;;  %v10066_v63 = vpop.permute.xlu0 %4663  ;;  %v4432_v19 = vpop.permute.xlu1 %4431  ;;  %4550 = vmatprep.mubr.bf16.mxu1 %v8932_v0 }
 0x49f   : > { %v4445_v2 = vsel %vm4441_vm14, %v9993_v39, %v4432_v19  ;;  %v4446_v24 = vsel %vm4441_vm14, %v4432_v19, %v10007_v49  ;;  %v4449_v39 = vsel %vm4441_vm14, %v4438_v31, %v9293_v10 }
 0x4a0   : > { %6475 = vrot.lane.b32.xlu0 %v9593_v55, %s8955_s19  ;;  %6033 = vrot.lane.b32.xlu1 %v9706_v51, %s8954_s18  ;;  %v4466_v10 = vsel %vm1025_vm12, %v4446_v24, 0 }
 0x4a1   : > { %8229 = vmatmul.mubr.msk.bf16.vlgmr.msra.gmra.mrb[12].mxu0 %vm716_vm2, %v8227_v20  ;;  %8230 = vmatprep.subr.msk.bf16.mxu1 %vm1025_vm12, %v4445_v2 }
 0x4a2   : > { %4519 = vmatpush1.bf16.msra.mxu1 %v4460_v32  ;;  %v10083_v4 = vpop.permute.xlu0 %4881  ;;  %v4436_v27 = vpop.permute.xlu1 %4435  ;;  %4591 = vmatprep.mubr.bf16.mxu0 %v8932_v0 }
 0x4a3   : > { %8234 = vmatprep.subr.msk.bf16.mxu1 %vm1025_vm12, %v4449_v39  ;;  %v4448_v45 = vsel %vm4441_vm14, %v4436_v27, %v4438_v31  ;;  %v4447_v47 = vsel %vm4441_vm14, %v10007_v49, %v4436_v27 }
 0x4a4   : > { %6479 = vrot.lane.b32.xlu0 %v9608_v30, %s8955_s19  ;;  %6247 = vrot.lane.b32.xlu1 %v9593_v55, %s8958_s16  ;;  %v4472_v43 = vsel %vm1025_vm12, %v4448_v45, 0 }
 0x4a5   : > { %8231 = vmatmul.mubr.msk.bf16.vlgmr.msra.gmra.mrb[12].mxu1 %vm716_vm2, %v8227_v20  ;;  %8232 = vmatprep.subr.msk.bf16.mxu0 %vm1025_vm12, %v4447_v47 }
 0x4a6   : > { %4560 = vmatpush1.bf16.msra.mxu0 %v4466_v10  ;;  %4601 = vmatpush1.bf16.msra.mxu1 %v4472_v43  ;;  %v10100_v53 = vpop.permute.xlu0 %4885  ;;  %v4654_v49 = vpop.permute.xlu1 %4653 }
 0x4a7   : > { %v4670_v48 = vsel %vm4669_vm15, %v4652_v33, %v4654_v49  ;;  %v4671_v58 = vsel %vm4669_vm15, %v4654_v49, %v4656_v42  ;;  %4632 = vmatprep.mubr.bf16.mxu1 %v8932_v0 }
 0x4a8   : > { %6483 = vrot.lane.b32.xlu0 %v9626_v23, %s8955_s19  ;;  %6251 = vrot.lane.b32.xlu1 %v9608_v30, %s8958_s16  ;;  %v4682_v50 = vsel %vm1025_vm12, %v4670_v48, 0 }
 0x4a9   : > { %8233 = vmatmul.mubr.msk.bf16.vlgmr.msra.gmra.mrb[16].mxu0 %vm716_vm2, %v8227_v20  ;;  %8237 = vmatprep.subr.msk.bf16.mxu0 %vm1025_vm12, %v4671_v58 }
 0x4aa   : > { %4706 = vmatpush1.bf16.msra.mxu0 %v4682_v50  ;;  %v10112_v31 = vpop.permute.xlu0 %4889  ;;  %v4658_v1 = vpop.permute.xlu1 %4657  ;;  %4737 = vmatprep.mubr.bf16.mxu0 %v8932_v0 }
 0x4ab   : > { %v4672_v60 = vsel %vm4669_vm15, %v4656_v42, %v4658_v1  ;;  %v4673_v16 = vsel %vm4669_vm15, %v4658_v1, %v10052_v46 }
 0x4ac   : > { %6487 = vrot.lane.b32.xlu0 %v9642_v52, %s8955_s19  ;;  %6255 = vrot.lane.b32.xlu1 %v9626_v23, %s8958_s16  ;;  %v4688_v14 = vsel %vm1025_vm12, %v4672_v60, 0 }
 0x4ad   : > { %8235 = vmatmul.mubr.msk.bf16.vlgmr.msra.gmra.mrb[16].mxu1 %vm716_vm2, %v8227_v20  ;;  %8239 = vmatprep.subr.msk.bf16.mxu1 %vm1025_vm12, %v4673_v16 }
 0x4ae   : > { %4747 = vmatpush1.bf16.msra.mxu1 %v4688_v14  ;;  %v10125_v15 = vpop.permute.xlu0 %4893  ;;  %v4662_v33 = vpop.permute.xlu1 %4661  ;;  %4778 = vmatprep.mubr.bf16.mxu1 %v8932_v0 }
 0x4af   : > { %v4674_v17 = vsel %vm4669_vm15, %v10052_v46, %v4662_v33  ;;  %v4675_v40 = vsel %vm4669_vm15, %v4662_v33, %v10066_v63  ;;  %v4905_v45 = vsel %vm4897_vm3, %v10125_v15, %v9303_v13 }
 0x4b0   : > { %6705 = vrot.lane.b32.xlu0 %v9656_v59, %s8959_s20  ;;  %6259 = vrot.lane.b32.xlu1 %v9642_v52, %s8958_s16  ;;  %v4694_v18 = vsel %vm1025_vm12, %v4674_v17, 0  ;;  %v8254_v17 = vld [vmem:[%s10769_s3 + $0x48] sm:$0xf] }
 0x4b1   : > { %8238 = vmatmul.mubr.msk.bf16.vlgmr.msra.gmra.mrb[12].mxu0 %vm716_vm2, %v8236_v37  ;;  %8241 = vmatprep.subr.msk.bf16.mxu0 %vm1025_vm12, %v4675_v40 }
 0x4b2   : > { %4788 = vmatpush1.bf16.msra.mxu0 %v4694_v18  ;;  %v5108_v42 = vpop.permute.xlu0 %5107  ;;  %v4666_v41 = vpop.permute.xlu1 %4665  ;;  %4819 = vmatprep.mubr.bf16.mxu0 %v8932_v0 }
 0x4b3   : > { %v4676_v8 = vsel %vm4669_vm15, %v10066_v63, %v4666_v41  ;;  %v4677_v46 = vsel %vm4669_vm15, %v4666_v41, %v9291_v9 }
 0x4b4   : > { %6709 = vrot.lane.b32.xlu0 %v9671_v54, %s8959_s20  ;;  %6477 = vrot.lane.b32.xlu1 %v9656_v59, %s8955_s19  ;;  %v4700_v5 = vsel %vm1025_vm12, %v4676_v8, 0 }
 0x4b5   : > { %8240 = vmatmul.mubr.msk.bf16.vlgmr.msra.gmra.mrb[12].mxu1 %vm716_vm2, %v8236_v37  ;;  %8243 = vmatprep.subr.msk.bf16.mxu1 %vm1025_vm12, %v4677_v46 }
 0x4b6   : > { %4829 = vmatpush1.bf16.msra.mxu1 %v4700_v5  ;;  %v10154_v6 = vpop.permute.xlu0 %5111  ;;  %v4880_v44 = vpop.permute.xlu1 %4879  ;;  %4860 = vmatprep.mubr.bf16.mxu1 %v8932_v0 }
 0x4b7   : > { %v4898_v9 = vsel %vm4897_vm3, %v4880_v44, %v10083_v4 }
 0x4b8   : > { %6713 = vrot.lane.b32.xlu0 %v9690_v56, %s8959_s20  ;;  %6481 = vrot.lane.b32.xlu1 %v9671_v54, %s8955_s19  ;;  %v4910_v20 = vsel %vm1025_vm12, %v4898_v9, 0 }
 0x4b9   : > { %8242 = vmatmul.mubr.msk.bf16.vlgmr.msra.gmra.mrb[16].mxu0 %vm716_vm2, %v8236_v37 }
 0x4ba   : > { %v10164_v11 = vpop.permute.xlu0 %5115  ;;  %v4884_v63 = vpop.permute.xlu1 %4883  ;;  %4965 = vmatprep.mubr.bf16.mxu0 %v8932_v0 }
 0x4bb   : > { %v4899_v19 = vsel %vm4897_vm3, %v10083_v4, %v4884_v63  ;;  %v4900_v2 = vsel %vm4897_vm3, %v4884_v63, %v10100_v53  ;;  %v8245_v4 = vld [vmem:[%s10769_s3 + $0x44] sm:$0xf] }
 0x4bc   : > { %6717 = vrot.lane.b32.xlu0 %v9706_v51, %s8959_s20  ;;  %6485 = vrot.lane.b32.xlu1 %v9690_v56, %s8955_s19  ;;  %v4916_v27 = vsel %vm1025_vm12, %v4900_v2, 0 }
 0x4bd   : > { %8244 = vmatmul.mubr.msk.bf16.vlgmr.msra.gmra.mrb[16].mxu1 %vm716_vm2, %v8236_v37  ;;  %8246 = vmatprep.subr.msk.bf16.mxu0 %vm1025_vm12, %v4899_v19 }
 0x4be   : > { %4934 = vmatpush1.bf16.msra.mxu0 %v4910_v20  ;;  %v10178_v32 = vpop.permute.xlu0 %5119  ;;  %v4888_v24 = vpop.permute.xlu1 %4887  ;;  %5006 = vmatprep.mubr.bf16.mxu1 %v8932_v0 }
 0x4bf   : > { %v4901_v39 = vsel %vm4897_vm3, %v10100_v53, %v4888_v24  ;;  %v4902_v47 = vsel %vm4897_vm3, %v4888_v24, %v10112_v31 }
 0x4c0   : > { %6931 = vrot.lane.b32.xlu0 %v9593_v55, %s8960_s29  ;;  %6489 = vrot.lane.b32.xlu1 %v9706_v51, %s8955_s19  ;;  %v4922_v13 = vsel %vm1025_vm12, %v4902_v47, 0 }
 0x4c1   : > { %8247 = vmatmul.mubr.msk.bf16.vlgmr.msra.gmra.mrb[12].mxu0 %vm716_vm2, %v8245_v4  ;;  %8248 = vmatprep.subr.msk.bf16.mxu1 %vm1025_vm12, %v4901_v39 }
 0x4c2   : > { %4975 = vmatpush1.bf16.msra.mxu1 %v4916_v27  ;;  %v10198_v43 = vpop.permute.xlu0 %5337  ;;  %v4892_v10 = vpop.permute.xlu1 %4891  ;;  %5047 = vmatprep.mubr.bf16.mxu0 %v8932_v0 }
 0x4c3   : > { %8252 = vmatprep.subr.msk.bf16.mxu1 %vm1025_vm12, %v4905_v45  ;;  %v4903_v53 = vsel %vm4897_vm3, %v10112_v31, %v4892_v10  ;;  %v4904_v49 = vsel %vm4897_vm3, %v4892_v10, %v10125_v15 }
 0x4c4   : > { %v4928_v48 = vsel %vm1025_vm12, %v4904_v49, 0  ;;  %6935 = vrot.lane.b32.xlu0 %v9608_v30, %s8960_s29  ;;  %6703 = vrot.lane.b32.xlu1 %v9593_v55, %s8959_s20 }
 0x4c5   : > { %8249 = vmatmul.mubr.msk.bf16.vlgmr.msra.gmra.mrb[12].mxu1 %vm716_vm2, %v8245_v4  ;;  %8250 = vmatprep.subr.msk.bf16.mxu0 %vm1025_vm12, %v4903_v53 }
 0x4c6   : > { %5016 = vmatpush1.bf16.msra.mxu0 %v4922_v13  ;;  %5057 = vmatpush1.bf16.msra.mxu1 %v4928_v48  ;;  %v10214_v58 = vpop.permute.xlu0 %5341  ;;  %v5110_v50 = vpop.permute.xlu1 %5109 }
 0x4c7   : > { %v5126_v31 = vsel %vm5125_vm4, %v5108_v42, %v5110_v50  ;;  %v5127_v1 = vsel %vm5125_vm4, %v5110_v50, %v10154_v6  ;;  %5088 = vmatprep.mubr.bf16.mxu1 %v8932_v0  ;;  %v8899_v42 = vld [vmem:[#allocation2 + $0x24] ss:$0 sps:$4 sm:$0xff]  }
 0x4c8   : > { %v5138_v55 = vsel %vm1025_vm12, %v5126_v31, 0  ;;  %6939 = vrot.lane.b32.xlu0 %v9626_v23, %s8960_s29  ;;  %6707 = vrot.lane.b32.xlu1 %v9608_v30, %s8959_s20 }
 0x4c9   : > { %8251 = vmatmul.mubr.msk.bf16.vlgmr.msra.gmra.mrb[16].mxu0 %vm716_vm2, %v8245_v4  ;;  %8255 = vmatprep.subr.msk.bf16.mxu0 %vm1025_vm12, %v5127_v1 }
 0x4ca   : > { %5162 = vmatpush1.bf16.msra.mxu0 %v5138_v55  ;;  %v10227_v60 = vpop.permute.xlu0 %5345  ;;  %v5114_v16 = vpop.permute.xlu1 %5113  ;;  %5193 = vmatprep.mubr.bf16.mxu0 %v8932_v0 }
 0x4cb   : > { %v5128_v14 = vsel %vm5125_vm4, %v10154_v6, %v5114_v16  ;;  %v5129_v15 = vsel %vm5125_vm4, %v5114_v16, %v10164_v11  ;;  %v8272_v16 = vld [vmem:[%s10769_s3 + $0x50] sm:$0xf] }
 0x4cc   : > { %v5144_v33 = vsel %vm1025_vm12, %v5128_v14, 0  ;;  %6943 = vrot.lane.b32.xlu0 %v9642_v52, %s8960_s29  ;;  %6711 = vrot.lane.b32.xlu1 %v9626_v23, %s8959_s20 }
 0x4cd   : > { %8253 = vmatmul.mubr.msk.bf16.vlgmr.msra.gmra.mrb[16].mxu1 %vm716_vm2, %v8245_v4  ;;  %8257 = vmatprep.subr.msk.bf16.mxu1 %vm1025_vm12, %v5129_v15 }
 0x4ce   : > { %5203 = vmatpush1.bf16.msra.mxu1 %v5144_v33  ;;  %v5350_v30 = vpop.permute.xlu0 %5349  ;;  %v5118_v37 = vpop.permute.xlu1 %5117  ;;  %5234 = vmatprep.mubr.bf16.mxu1 %v8932_v0 }
 0x4cf   : > { %v5130_v40 = vsel %vm5125_vm4, %v10164_v11, %v5118_v37  ;;  %v5131_v18 = vsel %vm5125_vm4, %v5118_v37, %v10178_v32  ;;  %v5361_v4 = vsel %vm5353_vm5, %v5350_v30, %v9958_v3 }
 0x4d0   : > { %v5150_v23 = vsel %vm1025_vm12, %v5130_v40, 0  ;;  %6715 = vrot.lane.b32.xlu1 %v9642_v52, %s8959_s20  ;;  %8259 = vmatprep.subr.msk.bf16.mxu0 %vm1025_vm12, %v5131_v18 }
 0x4d1   : > { %8256 = vmatmul.mubr.msk.bf16.vlgmr.msra.gmra.mrb[12].mxu0 %vm716_vm2, %v8254_v17  ;;  %6947 = vrot.lane.b32.xlu0 %v8899_v42, %s8960_s29 }
 0x4d2   : > { %5244 = vmatpush1.bf16.msra.mxu0 %v5150_v23  ;;  %v5564_v41 = vpop.permute.xlu0 %5563  ;;  %v5122_v8 = vpop.permute.xlu1 %5121  ;;  %5275 = vmatprep.mubr.bf16.mxu0 %v8932_v0 }
 0x4d3   : > { %v5132_v46 = vsel %vm5125_vm4, %v10178_v32, %v5122_v8  ;;  %v5133_v5 = vsel %vm5125_vm4, %v5122_v8, %v9301_v12  ;;  %v8263_v32 = vld [vmem:[%s10769_s3 + $0x4c] sm:$0xf] }
 0x4d4   : > { %v5156_v52 = vsel %vm1025_vm12, %v5132_v46, 0  ;;  %6719 = vrot.lane.b32.xlu1 %v8899_v42, %s8959_s20  ;;  %8261 = vmatprep.subr.msk.bf16.mxu1 %vm1025_vm12, %v5133_v5 }
 0x4d5   : > { %8258 = vmatmul.mubr.msk.bf16.vlgmr.msra.gmra.mrb[12].mxu1 %vm716_vm2, %v8254_v17 }
 0x4d6   : > { %5285 = vmatpush1.bf16.msra.mxu1 %v5156_v52  ;;  %v5568_v6 = vpop.permute.xlu0 %5567  ;;  %v5336_v44 = vpop.permute.xlu1 %5335  ;;  %5316 = vmatprep.mubr.bf16.mxu1 %v8932_v0 }
 0x4d7   : > { %v5354_v12 = vsel %vm5353_vm5, %v5336_v44, %v10198_v43 }
 0x4d8   : > { %6933 = vrot.lane.b32.xlu1 %v9656_v59, %s8960_s29  ;;  %v5366_v19 = vsel %vm1025_vm12, %v5354_v12, 0  ;;  %v8281_v12 = vld [vmem:[%s10769_s3 + $0x54] sm:$0xf] }
 0x4d9   : > { %8260 = vmatmul.mubr.msk.bf16.vlgmr.msra.gmra.mrb[16].mxu0 %vm716_vm2, %v8254_v17 }
 0x4da   : > { %v5572_v9 = vpop.permute.xlu0 %5571  ;;  %v5340_v11 = vpop.permute.xlu1 %5339  ;;  %5421 = vmatprep.mubr.bf16.mxu0 %v8932_v0 }
 0x4db   : > { %v5355_v63 = vsel %vm5353_vm5, %v10198_v43, %v5340_v11  ;;  %v5356_v59 = vsel %vm5353_vm5, %v5340_v11, %v10214_v58 }
 0x4dc   : > { %6937 = vrot.lane.b32.xlu1 %v9671_v54, %s8960_s29  ;;  %8264 = vmatprep.subr.msk.bf16.mxu0 %vm1025_vm12, %v5355_v63  ;;  %v5372_v54 = vsel %vm1025_vm12, %v5356_v59, 0 }
 0x4dd   : > { %8262 = vmatmul.mubr.msk.bf16.vlgmr.msra.gmra.mrb[16].mxu1 %vm716_vm2, %v8254_v17  ;;  %5390 = vmatpush1.bf16.msra.mxu0 %v5366_v19 }
 0x4de   : > { %v5576_v20 = vpop.permute.xlu0 %5575  ;;  %v5344_v2 = vpop.permute.xlu1 %5343  ;;  %5462 = vmatprep.mubr.bf16.mxu1 %v8932_v0 }
 0x4df   : > { %v5357_v24 = vsel %vm5353_vm5, %v10214_v58, %v5344_v2  ;;  %v5358_v39 = vsel %vm5353_vm5, %v5344_v2, %v10227_v60 }
 0x4e0   : > { %6941 = vrot.lane.b32.xlu1 %v9690_v56, %s8960_s29  ;;  %8266 = vmatprep.subr.msk.bf16.mxu1 %vm1025_vm12, %v5357_v24  ;;  %v5378_v43 = vsel %vm1025_vm12, %v5358_v39, 0 }
 0x4e1   : > { %8265 = vmatmul.mubr.msk.bf16.vlgmr.msra.gmra.mrb[12].mxu0 %vm716_vm2, %v8263_v32  ;;  %5431 = vmatpush1.bf16.msra.mxu1 %v5372_v54 }
 0x4e2   : > { %v5794_v27 = vpop.permute.xlu0 %5793  ;;  %8270 = vmatprep.subr.msk.bf16.mxu1 %vm1025_vm12, %v5361_v4  ;;  %v5348_v45 = vpop.permute.xlu1 %5347  ;;  %5503 = vmatprep.mubr.bf16.mxu0 %v8932_v0 }
 0x4e3   : > { %v5359_v56 = vsel %vm5353_vm5, %v10227_v60, %v5348_v45  ;;  %v5360_v47 = vsel %vm5353_vm5, %v5348_v45, %v5350_v30 }
 0x4e4   : > { %v5384_v3 = vsel %vm1025_vm12, %v5360_v47, 0  ;;  %6945 = vrot.lane.b32.xlu1 %v9706_v51, %s8960_s29  ;;  %8268 = vmatprep.subr.msk.bf16.mxu0 %vm1025_vm12, %v5359_v56 }
 0x4e5   : > { %8267 = vmatmul.mubr.msk.bf16.vlgmr.msra.gmra.mrb[12].mxu1 %vm716_vm2, %v8263_v32  ;;  %5472 = vmatpush1.bf16.msra.mxu0 %v5378_v43 }
 0x4e6   : > { %5513 = vmatpush1.bf16.msra.mxu1 %v5384_v3  ;;  %v5798_v10 = vpop.permute.xlu0 %5797  ;;  %v5566_v53 = vpop.permute.xlu1 %5565  ;;  %5544 = vmatprep.mubr.bf16.mxu1 %v8932_v0 }
 0x4e7   : > { %v5582_v49 = vsel %vm5581_vm6, %v5564_v41, %v5566_v53  ;;  %v5583_v48 = vsel %vm5581_vm6, %v5566_v53, %v5568_v6 }
 0x4e8   : > { %v5594_v13 = vsel %vm1025_vm12, %v5582_v49, 0  ;;  %8273 = vmatprep.subr.msk.bf16.mxu0 %vm1025_vm12, %v5583_v48  ;;  %v8290_v48 = vld [vmem:[%s10769_s3 + $0x58] sm:$0xf] }
 0x4e9   : > { %8269 = vmatmul.mubr.msk.bf16.vlgmr.msra.gmra.mrb[16].mxu0 %vm716_vm2, %v8263_v32 }
 0x4ea   : > { %5618 = vmatpush1.bf16.msra.mxu0 %v5594_v13  ;;  %v5802_v51 = vpop.permute.xlu0 %5801  ;;  %v5570_v58 = vpop.permute.xlu1 %5569  ;;  %5649 = vmatprep.mubr.bf16.mxu0 %v8932_v0 }
 0x4eb   : > { %v5584_v50 = vsel %vm5581_vm6, %v5568_v6, %v5570_v58  ;;  %v5585_v31 = vsel %vm5581_vm6, %v5570_v58, %v5572_v9 }
 0x4ec   : > { %v5600_v1 = vsel %vm1025_vm12, %v5584_v50, 0  ;;  %8275 = vmatprep.subr.msk.bf16.mxu1 %vm1025_vm12, %v5585_v31 }
 0x4ed   : > { %8271 = vmatmul.mubr.msk.bf16.vlgmr.msra.gmra.mrb[16].mxu1 %vm716_vm2, %v8263_v32 }
 0x4ee   : > { %5659 = vmatpush1.bf16.msra.mxu1 %v5600_v1  ;;  %v5806_v55 = vpop.permute.xlu0 %5805  ;;  %v5574_v60 = vpop.permute.xlu1 %5573  ;;  %5690 = vmatprep.mubr.bf16.mxu1 %v8932_v0 }
 0x4ef   : > { %v5586_v14 = vsel %vm5581_vm6, %v5572_v9, %v5574_v60  ;;  %v5587_v15 = vsel %vm5581_vm6, %v5574_v60, %v5576_v20  ;;  %v5817_v63 = vsel %vm5809_vm7, %v5806_v55, %v9969_v21 }
 0x4f0   : > { %v5606_v33 = vsel %vm1025_vm12, %v5586_v14, 0  ;;  %8277 = vmatprep.subr.msk.bf16.mxu0 %vm1025_vm12, %v5587_v15 }
 0x4f1   : > { %8274 = vmatmul.mubr.msk.bf16.vlgmr.msra.gmra.mrb[12].mxu0 %vm716_vm2, %v8272_v16 }
 0x4f2   : > { %5700 = vmatpush1.bf16.msra.mxu0 %v5606_v33  ;;  %v6020_v30 = vpop.permute.xlu0 %6019  ;;  %v5578_v37 = vpop.permute.xlu1 %5577  ;;  %5731 = vmatprep.mubr.bf16.mxu0 %v8932_v0 }
 0x4f3   : > { %v5588_v17 = vsel %vm5581_vm6, %v5576_v20, %v5578_v37  ;;  %v5589_v40 = vsel %vm5581_vm6, %v5578_v37, %v9899_v22 }
 0x4f4   : > { %v5612_v18 = vsel %vm1025_vm12, %v5588_v17, 0  ;;  %8279 = vmatprep.subr.msk.bf16.mxu1 %vm1025_vm12, %v5589_v40 }
 0x4f5   : > { %8276 = vmatmul.mubr.msk.bf16.vlgmr.msra.gmra.mrb[12].mxu1 %vm716_vm2, %v8272_v16 }
 0x4f6   : > { %5741 = vmatpush1.bf16.msra.mxu1 %v5612_v18  ;;  %v6024_v23 = vpop.permute.xlu0 %6023  ;;  %v5792_v42 = vpop.permute.xlu1 %5791  ;;  %5772 = vmatprep.mubr.bf16.mxu1 %v8932_v0  ;;  %v8299_v18 = vld [vmem:[%s10769_s3 + $0x5c] sm:$0xf] }
 0x4f7   : > { %v5810_v41 = vsel %vm5809_vm7, %v5792_v42, %v5794_v27 }
 0x4f8   : > { %v5822_v5 = vsel %vm1025_vm12, %v5810_v41, 0 }
 0x4f9   : > { %8278 = vmatmul.mubr.msk.bf16.vlgmr.msra.gmra.mrb[16].mxu0 %vm716_vm2, %v8272_v16 }
 0x4fa   : > { %v6028_v8 = vpop.permute.xlu0 %6027  ;;  %v5796_v46 = vpop.permute.xlu1 %5795  ;;  %5877 = vmatprep.mubr.bf16.mxu0 %v8932_v0 }
 0x4fb   : > { %v5811_v22 = vsel %vm5809_vm7, %v5794_v27, %v5796_v46  ;;  %v5812_v52 = vsel %vm5809_vm7, %v5796_v46, %v5798_v10 }
 0x4fc   : > { %8282 = vmatprep.subr.msk.bf16.mxu0 %vm1025_vm12, %v5811_v22  ;;  %v5828_v11 = vsel %vm1025_vm12, %v5812_v52, 0 }
 0x4fd   : > { %8280 = vmatmul.mubr.msk.bf16.vlgmr.msra.gmra.mrb[16].mxu1 %vm716_vm2, %v8272_v16  ;;  %5846 = vmatpush1.bf16.msra.mxu0 %v5822_v5 }
 0x4fe   : > { %v6032_v6 = vpop.permute.xlu0 %6031  ;;  %v5800_v44 = vpop.permute.xlu1 %5799  ;;  %5918 = vmatprep.mubr.bf16.mxu1 %v8932_v0 }
 0x4ff   : > { %v5813_v9 = vsel %vm5809_vm7, %v5798_v10, %v5800_v44  ;;  %v5814_v19 = vsel %vm5809_vm7, %v5800_v44, %v5802_v51 }
 0x500   : > { %8284 = vmatprep.subr.msk.bf16.mxu1 %vm1025_vm12, %v5813_v9  ;;  %v5834_v24 = vsel %vm1025_vm12, %v5814_v19, 0 }
 0x501   : > { %8283 = vmatmul.mubr.msk.bf16.vlgmr.msra.gmra.mrb[12].mxu0 %vm716_vm2, %v8281_v12  ;;  %5887 = vmatpush1.bf16.msra.mxu1 %v5828_v11 }
 0x502   : > { %v6250_v59 = vpop.permute.xlu0 %6249  ;;  %8288 = vmatprep.subr.msk.bf16.mxu1 %vm1025_vm12, %v5817_v63  ;;  %v5804_v20 = vpop.permute.xlu1 %5803  ;;  %5959 = vmatprep.mubr.bf16.mxu0 %v8932_v0 }
 0x503   : > { %v5815_v2 = vsel %vm5809_vm7, %v5802_v51, %v5804_v20  ;;  %v5816_v32 = vsel %vm5809_vm7, %v5804_v20, %v5806_v55 }
 0x504   : > { %v5840_v54 = vsel %vm1025_vm12, %v5816_v32, 0  ;;  %8286 = vmatprep.subr.msk.bf16.mxu0 %vm1025_vm12, %v5815_v2 }
 0x505   : > { %8285 = vmatmul.mubr.msk.bf16.vlgmr.msra.gmra.mrb[12].mxu1 %vm716_vm2, %v8281_v12  ;;  %5928 = vmatpush1.bf16.msra.mxu0 %v5834_v24 }
 0x506   : > { %5969 = vmatpush1.bf16.msra.mxu1 %v5840_v54  ;;  %v6254_v21 = vpop.permute.xlu0 %6253  ;;  %v6022_v4 = vpop.permute.xlu1 %6021  ;;  %6000 = vmatprep.mubr.bf16.mxu1 %v8932_v0  ;;  %v8308_v54 = vld [vmem:[%s10769_s3 + $0x60] sm:$0xf] }
 0x507   : > { %v6038_v39 = vsel %vm6037_vm8, %v6020_v30, %v6022_v4  ;;  %v6039_v27 = vsel %vm6037_vm8, %v6022_v4, %v6024_v23 }
 0x508   : > { %v6050_v45 = vsel %vm1025_vm12, %v6038_v39, 0  ;;  %8291 = vmatprep.subr.msk.bf16.mxu0 %vm1025_vm12, %v6039_v27 }
 0x509   : > { %8287 = vmatmul.mubr.msk.bf16.vlgmr.msra.gmra.mrb[16].mxu0 %vm716_vm2, %v8281_v12 }
 0x50a   : > { %6074 = vmatpush1.bf16.msra.mxu0 %v6050_v45  ;;  %v6258_v56 = vpop.permute.xlu0 %6257  ;;  %v6026_v47 = vpop.permute.xlu1 %6025  ;;  %6105 = vmatprep.mubr.bf16.mxu0 %v8932_v0 }
 0x50b   : > { %v6040_v43 = vsel %vm6037_vm8, %v6024_v23, %v6026_v47  ;;  %v6041_v3 = vsel %vm6037_vm8, %v6026_v47, %v6028_v8 }
 0x50c   : > { %v6056_v10 = vsel %vm1025_vm12, %v6040_v43, 0  ;;  %8293 = vmatprep.subr.msk.bf16.mxu1 %vm1025_vm12, %v6041_v3 }
 0x50d   : > { %8289 = vmatmul.mubr.msk.bf16.vlgmr.msra.gmra.mrb[16].mxu1 %vm716_vm2, %v8281_v12 }
 0x50e   : > { %6115 = vmatpush1.bf16.msra.mxu1 %v6056_v10  ;;  %v6262_v53 = vpop.permute.xlu0 %6261  ;;  %v6030_v49 = vpop.permute.xlu1 %6029  ;;  %6146 = vmatprep.mubr.bf16.mxu1 %v8932_v0 }
 0x50f   : > { %v6042_v13 = vsel %vm6037_vm8, %v6028_v8, %v6030_v49  ;;  %v6043_v51 = vsel %vm6037_vm8, %v6030_v49, %v6032_v6  ;;  %v6273_v8 = vsel %vm6265_vm9, %v6262_v53, %v9984_v28 }
 0x510   : > { %v6062_v58 = vsel %vm1025_vm12, %v6042_v13, 0  ;;  %8295 = vmatprep.subr.msk.bf16.mxu0 %vm1025_vm12, %v6043_v51 }
 0x511   : > { %8292 = vmatmul.mubr.msk.bf16.vlgmr.msra.gmra.mrb[12].mxu0 %vm716_vm2, %v8290_v48 }
 0x512   : > { %6156 = vmatpush1.bf16.msra.mxu0 %v6062_v58  ;;  %v6476_v50 = vpop.permute.xlu0 %6475  ;;  %v6034_v31 = vpop.permute.xlu1 %6033  ;;  %6187 = vmatprep.mubr.bf16.mxu0 %v8932_v0 }
 0x513   : > { %v6044_v1 = vsel %vm6037_vm8, %v6032_v6, %v6034_v31  ;;  %v6045_v55 = vsel %vm6037_vm8, %v6034_v31, %v9908_v25 }
 0x514   : > { %v6068_v60 = vsel %vm1025_vm12, %v6044_v1, 0  ;;  %8297 = vmatprep.subr.msk.bf16.mxu1 %vm1025_vm12, %v6045_v55 }
 0x515   : > { %8294 = vmatmul.mubr.msk.bf16.vlgmr.msra.gmra.mrb[12].mxu1 %vm716_vm2, %v8290_v48 }
 0x516   : > { %6197 = vmatpush1.bf16.msra.mxu1 %v6068_v60  ;;  %v6480_v16 = vpop.permute.xlu0 %6479  ;;  %v6248_v14 = vpop.permute.xlu1 %6247  ;;  %6228 = vmatprep.mubr.bf16.mxu1 %v8932_v0 }
 0x517   : > { %v6266_v15 = vsel %vm6265_vm9, %v6248_v14, %v6250_v59 }
 0x518   : > { %v6278_v37 = vsel %vm1025_vm12, %v6266_v15, 0 }
 0x519   : > { %8296 = vmatmul.mubr.msk.bf16.vlgmr.msra.gmra.mrb[16].mxu0 %vm716_vm2, %v8290_v48 }
 0x51a   : > { %v6484_v33 = vpop.permute.xlu0 %6483  ;;  %v6252_v30 = vpop.permute.xlu1 %6251  ;;  %6333 = vmatprep.mubr.bf16.mxu0 %v8932_v0 }
 0x51b   : > { %v6267_v25 = vsel %vm6265_vm9, %v6250_v59, %v6252_v30  ;;  %v6268_v17 = vsel %vm6265_vm9, %v6252_v30, %v6254_v21 }
 0x51c   : > { %8300 = vmatprep.subr.msk.bf16.mxu0 %vm1025_vm12, %v6267_v25  ;;  %v6284_v42 = vsel %vm1025_vm12, %v6268_v17, 0 }
 0x51d   : > { %8298 = vmatmul.mubr.msk.bf16.vlgmr.msra.gmra.mrb[16].mxu1 %vm716_vm2, %v8290_v48  ;;  %6302 = vmatpush1.bf16.msra.mxu0 %v6278_v37 }
 0x51e   : > { %v6256_v40 = vpop.permute.xlu1 %6255  ;;  %6374 = vmatprep.mubr.bf16.mxu1 %v8932_v0  ;;  %v6488_v41 = vpop.permute.xlu0 %6487 }
 0x51f   : > { %v6269_v23 = vsel %vm6265_vm9, %v6254_v21, %v6256_v40  ;;  %v6270_v46 = vsel %vm6265_vm9, %v6256_v40, %v6258_v56 }
 0x520   : > { %8302 = vmatprep.subr.msk.bf16.mxu1 %vm1025_vm12, %v6269_v23  ;;  %v6290_v6 = vsel %vm1025_vm12, %v6270_v46, 0 }
 0x521   : > { %8301 = vmatmul.mubr.msk.bf16.vlgmr.msra.gmra.mrb[12].mxu0 %vm716_vm2, %v8299_v18  ;;  %6343 = vmatpush1.bf16.msra.mxu1 %v6284_v42 }
 0x522   : > { %8306 = vmatprep.subr.msk.bf16.mxu1 %vm1025_vm12, %v6273_v8  ;;  %v6260_v22 = vpop.permute.xlu1 %6259  ;;  %6415 = vmatprep.mubr.bf16.mxu0 %v8932_v0  ;;  %v6706_v28 = vpop.permute.xlu0 %6705  ;;  %v8326_v8 = vld [vmem:[%s10769_s3 + $0x68] sm:$0xf] }
 0x523   : > { %v6271_v5 = vsel %vm6265_vm9, %v6258_v56, %v6260_v22  ;;  %v6272_v52 = vsel %vm6265_vm9, %v6260_v22, %v6262_v53 }
 0x524   : > { %v6296_v44 = vsel %vm1025_vm12, %v6272_v52, 0  ;;  %8304 = vmatprep.subr.msk.bf16.mxu0 %vm1025_vm12, %v6271_v5 }
 0x525   : > { %8303 = vmatmul.mubr.msk.bf16.vlgmr.msra.gmra.mrb[12].mxu1 %vm716_vm2, %v8299_v18  ;;  %6384 = vmatpush1.bf16.msra.mxu0 %v6290_v6 }
 0x526   : > { %6425 = vmatpush1.bf16.msra.mxu1 %v6296_v44  ;;  %v6478_v12 = vpop.permute.xlu1 %6477  ;;  %6456 = vmatprep.mubr.bf16.mxu1 %v8932_v0  ;;  %v6710_v2 = vpop.permute.xlu0 %6709 }
 0x527   : > { %v6494_v9 = vsel %vm6493_vm10, %v6476_v50, %v6478_v12  ;;  %v6495_v11 = vsel %vm6493_vm10, %v6478_v12, %v6480_v16  ;;  %v8317_v50 = vld [vmem:[%s10769_s3 + $0x64] sm:$0xf] }
 0x528   : > { %v6506_v63 = vsel %vm1025_vm12, %v6494_v9, 0  ;;  %8309 = vmatprep.subr.msk.bf16.mxu0 %vm1025_vm12, %v6495_v11 }
 0x529   : > { %8305 = vmatmul.mubr.msk.bf16.vlgmr.msra.gmra.mrb[16].mxu0 %vm716_vm2, %v8299_v18 }
 0x52a   : > { %6530 = vmatpush1.bf16.msra.mxu0 %v6506_v63  ;;  %v6482_v19 = vpop.permute.xlu1 %6481  ;;  %6561 = vmatprep.mubr.bf16.mxu0 %v8932_v0  ;;  %v6714_v27 = vpop.permute.xlu0 %6713 }
 0x52b   : > { %v6496_v59 = vsel %vm6493_vm10, %v6480_v16, %v6482_v19  ;;  %v6497_v20 = vsel %vm6493_vm10, %v6482_v19, %v6484_v33 }
 0x52c   : > { %v6512_v32 = vsel %vm1025_vm12, %v6496_v59, 0  ;;  %8311 = vmatprep.subr.msk.bf16.mxu1 %vm1025_vm12, %v6497_v20 }
 0x52d   : > { %8307 = vmatmul.mubr.msk.bf16.vlgmr.msra.gmra.mrb[16].mxu1 %vm716_vm2, %v8299_v18 }
 0x52e   : > { %6571 = vmatpush1.bf16.msra.mxu1 %v6512_v32  ;;  %v6486_v24 = vpop.permute.xlu1 %6485  ;;  %6602 = vmatprep.mubr.bf16.mxu1 %v8932_v0  ;;  %v6718_v10 = vpop.permute.xlu0 %6717 }
 0x52f   : > { %v6498_v21 = vsel %vm6493_vm10, %v6484_v33, %v6486_v24  ;;  %v6499_v4 = vsel %vm6493_vm10, %v6486_v24, %v6488_v41 }
 0x530   : > { %v6518_v39 = vsel %vm1025_vm12, %v6498_v21, 0  ;;  %8313 = vmatprep.subr.msk.bf16.mxu0 %vm1025_vm12, %v6499_v4 }
 0x531   : > { %8310 = vmatmul.mubr.msk.bf16.vlgmr.msra.gmra.mrb[12].mxu0 %vm716_vm2, %v8308_v54 }
 0x532   : > { %6612 = vmatpush1.bf16.msra.mxu0 %v6518_v39  ;;  %v6490_v45 = vpop.permute.xlu1 %6489  ;;  %6643 = vmatprep.mubr.bf16.mxu0 %v8932_v0  ;;  %v6932_v51 = vpop.permute.xlu0 %6931 }
 0x533   : > { %v6500_v56 = vsel %vm6493_vm10, %v6488_v41, %v6490_v45  ;;  %v6501_v47 = vsel %vm6493_vm10, %v6490_v45, %v9919_v29 }
 0x534   : > { %v6524_v43 = vsel %vm1025_vm12, %v6500_v56, 0  ;;  %8315 = vmatprep.subr.msk.bf16.mxu1 %vm1025_vm12, %v6501_v47 }
 0x535   : > { %8312 = vmatmul.mubr.msk.bf16.vlgmr.msra.gmra.mrb[12].mxu1 %vm716_vm2, %v8308_v54 }
 0x536   : > { %6653 = vmatpush1.bf16.msra.mxu1 %v6524_v43  ;;  %v6704_v3 = vpop.permute.xlu1 %6703  ;;  %6684 = vmatprep.mubr.bf16.mxu1 %v8932_v0  ;;  %v6936_v14 = vpop.permute.xlu0 %6935 }
 0x537   : > { %v6722_v53 = vsel %vm6721_vm11, %v6704_v3, %v6706_v28 }
 0x538   : > { %v6734_v48 = vsel %vm1025_vm12, %v6722_v53, 0 }
 0x539   : > { %8314 = vmatmul.mubr.msk.bf16.vlgmr.msra.gmra.mrb[16].mxu0 %vm716_vm2, %v8308_v54 }
 0x53a   : > { %v6708_v49 = vpop.permute.xlu1 %6707  ;;  %6789 = vmatprep.mubr.bf16.mxu0 %v8932_v0  ;;  %v6940_v17 = vpop.permute.xlu0 %6939 }
 0x53b   : > { %v6723_v29 = vsel %vm6721_vm11, %v6706_v28, %v6708_v49  ;;  %v6724_v13 = vsel %vm6721_vm11, %v6708_v49, %v6710_v2 }
 0x53c   : > { %8318 = vmatprep.subr.msk.bf16.mxu0 %vm1025_vm12, %v6723_v29  ;;  %v6740_v1 = vsel %vm1025_vm12, %v6724_v13, 0 }
 0x53d   : > { %8316 = vmatmul.mubr.msk.bf16.vlgmr.msra.gmra.mrb[16].mxu1 %vm716_vm2, %v8308_v54  ;;  %6758 = vmatpush1.bf16.msra.mxu0 %v6734_v48 }
 0x53e   : > { %v6712_v58 = vpop.permute.xlu1 %6711  ;;  %6830 = vmatprep.mubr.bf16.mxu1 %v8932_v0  ;;  %v6944_v5 = vpop.permute.xlu0 %6943 }
 0x53f   : > { %v6725_v31 = vsel %vm6721_vm11, %v6710_v2, %v6712_v58  ;;  %v6726_v55 = vsel %vm6721_vm11, %v6712_v58, %v6714_v27 }
 0x540   : > { %8320 = vmatprep.subr.msk.bf16.mxu1 %vm1025_vm12, %v6725_v31  ;;  %v6746_v15 = vsel %vm1025_vm12, %v6726_v55, 0 }
 0x541   : > { %8319 = vmatmul.mubr.msk.bf16.vlgmr.msra.gmra.mrb[12].mxu0 %vm716_vm2, %v8317_v50  ;;  %6799 = vmatpush1.bf16.msra.mxu1 %v6740_v1 }
 0x542   : > { %v6716_v60 = vpop.permute.xlu1 %6715  ;;  %6871 = vmatprep.mubr.bf16.mxu0 %v8932_v0 }
 0x543   : > { %v6727_v16 = vsel %vm6721_vm11, %v6714_v27, %v6716_v60  ;;  %v6728_v33 = vsel %vm6721_vm11, %v6716_v60, %v6718_v10  ;;  %v6948_v9 = vpop.permute.xlu0 %6947 }
 0x544   : > { %8322 = vmatprep.subr.msk.bf16.mxu0 %vm1025_vm12, %v6727_v16  ;;  %v6752_v37 = vsel %vm1025_vm12, %v6728_v33, 0 }
 0x545   : > { %8321 = vmatmul.mubr.msk.bf16.vlgmr.msra.gmra.mrb[12].mxu1 %vm716_vm2, %v8317_v50  ;;  %6840 = vmatpush1.bf16.msra.mxu0 %v6746_v15 }
 0x546   : > { %v6720_v30 = vpop.permute.xlu1 %6719  ;;  %6912 = vmatprep.mubr.bf16.mxu1 %v8932_v0 }
 0x547   : > { %v6729_v25 = vsel %vm6721_vm11, %v6718_v10, %v6720_v30 }
 0x548   : > { %8324 = vmatprep.subr.msk.bf16.mxu1 %vm1025_vm12, %v6729_v25 }
 0x549   : > { %8323 = vmatmul.mubr.msk.bf16.vlgmr.msra.gmra.mrb[16].mxu0 %vm716_vm2, %v8317_v50  ;;  %6881 = vmatpush1.bf16.msra.mxu1 %v6752_v37 }
 0x54a   : > { %v6934_v40 = vpop.permute.xlu1 %6933  ;;  %7017 = vmatprep.mubr.bf16.mxu0 %v8932_v0 }
 0x54b   : > { %v6950_v18 = vsel %vm6949_vm13, %v6932_v51, %v6934_v40  ;;  %v6951_v23 = vsel %vm6949_vm13, %v6934_v40, %v6936_v14 }
 0x54c   : > { %v6962_v42 = vsel %vm1025_vm12, %v6950_v18, 0  ;;  %8327 = vmatprep.subr.msk.bf16.mxu0 %vm1025_vm12, %v6951_v23 }
 0x54d   : > { %8325 = vmatmul.mubr.msk.bf16.vlgmr.msra.gmra.mrb[16].mxu1 %vm716_vm2, %v8317_v50  ;;  %6986 = vmatpush1.bf16.msra.mxu0 %v6962_v42 }
 0x54e   : > { %v6938_v41 = vpop.permute.xlu1 %6937  ;;  %7058 = vmatprep.mubr.bf16.mxu1 %v8932_v0 }
 0x54f   : > { %v6952_v46 = vsel %vm6949_vm13, %v6936_v14, %v6938_v41  ;;  %v6953_v22 = vsel %vm6949_vm13, %v6938_v41, %v6940_v17 }
 0x550   : > { %v6968_v52 = vsel %vm1025_vm12, %v6952_v46, 0  ;;  %8329 = vmatprep.subr.msk.bf16.mxu1 %vm1025_vm12, %v6953_v22 }
 0x551   : > { %8328 = vmatmul.mubr.msk.bf16.vlgmr.msra.gmra.mrb[12].mxu0 %vm716_vm2, %v8326_v8  ;;  %7027 = vmatpush1.bf16.msra.mxu1 %v6968_v52 }
 0x552   : > { %v6942_v6 = vpop.permute.xlu1 %6941  ;;  %7099 = vmatprep.mubr.bf16.mxu0 %v8932_v0 }
 0x553   : > { %v6954_v44 = vsel %vm6949_vm13, %v6940_v17, %v6942_v6  ;;  %v6955_v28 = vsel %vm6949_vm13, %v6942_v6, %v6944_v5  ;;  %v7157_v6 = vld [vmem:[%s10777_s11] sm:$0xff] }
 0x554   : > { %v6974_v12 = vsel %vm1025_vm12, %v6954_v44, 0  ;;  %8331 = vmatprep.subr.msk.bf16.mxu0 %vm1025_vm12, %v6955_v28 }
 0x555   : > { %8330 = vmatmul.mubr.msk.bf16.vlgmr.msra.gmra.mrb[12].mxu1 %vm716_vm2, %v8326_v8  ;;  %7068 = vmatpush1.bf16.msra.mxu0 %v6974_v12 }
 0x556   : > { %v6946_v11 = vpop.permute.xlu1 %6945  ;;  %7140 = vmatprep.mubr.bf16.mxu1 %v8932_v0  ;;  %8384 = vmatprep.subr.mxu0 %v8933_v26 }
 0x557   : > { %v6956_v63 = vsel %vm6949_vm13, %v6944_v5, %v6946_v11  ;;  %v6957_v19 = vsel %vm6949_vm13, %v6946_v11, %v6948_v9 }
 0x558   : > { %v6980_v59 = vsel %vm1025_vm12, %v6956_v63, 0  ;;  %8333 = vmatprep.subr.msk.bf16.mxu1 %vm1025_vm12, %v6957_v19 }
 0x559   : > { %8332 = vmatmul.mubr.msk.bf16.vlgmr.msra.gmra.mrb[16].mxu0 %vm716_vm2, %v8326_v8  ;;  %7109 = vmatpush1.bf16.msra.mxu1 %v6980_v59 }
 0x55a   : > { %8386 = vmatprep.mubr.msk.f32.mxu0 %vm8934_vm1, %v8933_v26  ;;  %8389 = vmatprep.subr.mxu1 %v8933_v26 }
 0x55d   : > { %8334 = vmatmul.mubr.msk.bf16.vlgmr.msra.gmra.mrb[16].mxu1 %vm716_vm2, %v8326_v8 }
 0x55e   : > { %8391 = vmatprep.mubr.msk.f32.mxu1 %vm8934_vm1, %v8933_v26 }
 0x624   : > { %v10509_v20 = vpop.f32.mrb[12].mxu0 }
 0x625   : > { %v7160_v2 = vmul.f32 %v10509_v20, %v9085_v34  ;;  %v10513_v32 = vpop.f32.mrb[13].mxu0 }
 0x626   : > { %v7161_v24 = vmul.f32 %v10513_v32, %v9087_v35  ;;  %v7023_v54 = vpop.f32.mrb[14].mxu0 }
 0x627   : > { %v7177_v21 = vmul.f32 %v7160_v2, %v10509_v20  ;;  %v7024_v4 = vpop.f32.mrb[15].mxu0 }
 0x628   : > { %v7168_v39 = vadd.f32 %v7161_v24, %v7160_v2  ;;  %v7178_v27 = vmul.f32 %v7161_v24, %v10513_v32  ;;  %v10519_v45 = vpop.f32.mrb[12].mxu1  ;;  %v7158_v4 = vld [vmem:[%s10773_s7] sm:$0xff] }
 0x629   : > { %v7162_v26 = vmul.f32 %v10519_v45, %v9089_v36  ;;  %v10523_v56 = vpop.f32.mrb[13].mxu1 }
 0x62a   : > { %v7185_v47 = vadd.f32 %v7178_v27, %v7177_v21  ;;  %v7163_v43 = vmul.f32 %v10523_v56, %v9093_v38  ;;  %v7064_v3 = vpop.f32.mrb[14].mxu1 }
 0x62b   : > { %v7169_v10 = vadd.f32 %v7168_v39, %v7162_v26  ;;  %v7179_v53 = vmul.f32 %v7162_v26, %v10519_v45  ;;  %v7065_v49 = vpop.f32.mrb[15].mxu1  ;;  %v7159_v26 = vld [vmem:[%s10774_s8] sm:$0xff] }
 0x62c   : > { %v7180_v29 = vmul.f32 %v7163_v43, %v10523_v56  ;;  %v10529_v48 = vpop.f32.mrb[16].mxu0 }
 0x62d   : > { %v7186_v13 = vadd.f32 %v7185_v47, %v7179_v53  ;;  %v7170_v51 = vadd.f32 %v7169_v10, %v7163_v43  ;;  %v7164_v58 = vmul.f32 %v10529_v48, %v9112_v57  ;;  %v7103_v50 = vpop.f32.mrb[17].mxu0 }
 0x62e   : > { %v7165_v31 = vmul.f32 %v7103_v50, %v9114_v61  ;;  %v7105_v1 = vpop.f32.mrb[18].mxu0 }
 0x62f   : > { %v7187_v55 = vadd.f32 %v7186_v13, %v7180_v29  ;;  %v7171_v60 = vadd.f32 %v7170_v51, %v7164_v58  ;;  %v7181_v16 = vmul.f32 %v7164_v58, %v10529_v48  ;;  %v7106_v14 = vpop.f32.mrb[19].mxu0 }
 0x630   : > { %v7182_v15 = vmul.f32 %v7165_v31, %v7103_v50  ;;  %v7142_v33 = vpop.f32.mrb[16].mxu1 }
 0x631   : > { %v7188_v30 = vadd.f32 %v7187_v55, %v7181_v16  ;;  %v7172_v25 = vadd.f32 %v7171_v60, %v7165_v31  ;;  %v7166_v37 = vmul.f32 %v7142_v33, %v9116_v62  ;;  %v7144_v17 = vpop.f32.mrb[17].mxu1 }
 0x632   : > { %v7167_v40 = vmul.f32 %v7144_v17, %v9127_v7  ;;  %v7146_v18 = vpop.f32.mrb[18].mxu1 }
 0x633   : > { %v7189_v23 = vadd.f32 %v7188_v30, %v7182_v15  ;;  %v7173_v42 = vadd.f32 %v7172_v25, %v7166_v37  ;;  %v7183_v41 = vmul.f32 %v7166_v37, %v7142_v33  ;;  %v7147_v8 = vpop.f32.mrb[19].mxu1 }
 0x634   : > { %v7184_v46 = vmul.f32 %v7167_v40, %v7144_v17 }
 0x635   : > { %v7190_v22 = vadd.f32 %v7189_v23, %v7183_v41  ;;  %v7174_v5 = vadd.f32 %v7173_v42, %v7167_v40 }
 0x637   : > { %7175 = vadd.xlane.f32.xlu1 %v7174_v5  ;;  %v7191_v52 = vadd.f32 %v7190_v22, %v7184_v46 }
 0x639   : > { %7192 = vadd.xlane.f32.xlu0 %v7191_v52 }
 0x6c4   : > { %v7176_v44 = vpop.xlane.xlu1 %7175 }
 0x6c5   : > { %8385 = vmatpush3.msra.mxu0 %v7176_v44  ;;  %v8889_v44 = vld [vmem:[%s10770_s4] sm:$0xff]  }
 0x6c6   : > { %v7193_v28 = vpop.xlane.xlu0 %7192  ;;  %8387 = vmatmul.mubr.msk.f32.vlgmr.msra.gmra.mrb[10].mxu0 %vm716_vm2, %v7157_v6 }
 0x6c7   : > { %8390 = vmatpush3.msra.mxu1 %v7193_v28  ;;  %7471 = vmatprep.mubr.bf16.mxu0 %v8932_v0 }
 0x6c8   : > { %8392 = vmatmul.mubr.msk.f32.vlgmr.msra.gmra.mrb[10].mxu1 %vm716_vm2, %v7157_v6 }
 0x6c9   : > { %7514 = vmatprep.mubr.bf16.mxu1 %v8932_v0 }
 0x799   : > { %v7263_v12 = vpop.f32.mrb[10].mxu0 }
 0x79a   : > { %v7337_v9 = vmul.f32 0.0009765625, %v7263_v12  ;;  %v8388_v11 = vpop.f32.mrb[11].mxu0 }
 0x79b   : > { %v7333_v63 = vpop.f32.mrb[10].mxu1 }
 0x79c   : > { %v7339_v19 = vmul.f32 %v7337_v9, %v7337_v9  ;;  %v7338_v59 = vmul.f32 0.0009765625, %v7333_v63  ;;  %v8393_v2 = vpop.f32.mrb[11].mxu1 }
 0x79e   : > { %v7340_v24 = vsub.f32 %v7338_v59, %v7339_v19 }
 0x7a0   : > { %v7341_v54 = vmax.f32 %v7340_v24, 0.0 }
 0x7a2   : > { %v7342_v21 = vadd.f32 1e-05, %v7341_v54 }
 0x7a4   : > { %8892 = vrsqrt.f32 %v7342_v21 }
 0x7ae   : > { %v8893_v39 = vpop.eup %8892 }
 0x7af   : > { %v7344_v27 = vmul.f32 %v8893_v39, %v7158_v4 }
 0x7b1   : > { %7349 = vperm.xlu0 %8870, %v7344_v27   ;;  %v7345_v47 = vmul.f32 %v7344_v27, %v7337_v9 }
 0x7b3   : > { %v7346_v43 = vsub.f32 %v7159_v26, %v7345_v47 }
 0x7b5   : > { %7362 = vperm.xlu1 %8869, %v7346_v43  }
 0x830   : > { %v7350_v3 = vpop.permute.xlu0 %7349 }
 0x831   : > { %v7353_v10 = vmul.f32 %v7350_v3, %v10513_v32  ;;  %v7355_v53 = vmul.f32 %v7350_v3, %v10523_v56  ;;  %v7352_v49 = vmul.f32 %v7350_v3, %v10509_v20  ;;  %v7354_v29 = vmul.f32 %v7350_v3, %v10519_v45 }
 0x832   : > { %v7357_v51 = vmul.f32 %v7350_v3, %v7103_v50  ;;  %v7359_v58 = vmul.f32 %v7350_v3, %v7144_v17  ;;  %v7356_v31 = vmul.f32 %v7350_v3, %v10529_v48  ;;  %v7358_v1 = vmul.f32 %v7350_v3, %v7142_v33 }
 0x834   : > { %v7363_v13 = vpop.permute.xlu1 %7362 }
 0x835   : > { %v7366_v55 = vadd.f32 %v7363_v13, %v7353_v10  ;;  %v7368_v60 = vadd.f32 %v7363_v13, %v7355_v53  ;;  %v7365_v16 = vadd.f32 %v7363_v13, %v7352_v49  ;;  %v7367_v14 = vadd.f32 %v7363_v13, %v7354_v29 }
 0x836   : > { %v7370_v15 = vadd.f32 %v7363_v13, %v7357_v51  ;;  %v7372_v30 = vadd.f32 %v7363_v13, %v7359_v58  ;;  %v7369_v25 = vadd.f32 %v7363_v13, %v7356_v31  ;;  %v7371_v32 = vadd.f32 %v7363_v13, %v7358_v1 }
 0x837   : > { %vm7374_vm1 = vcmp.ge.f32.partialorder %v7366_v55, 0.0  ;;  %v7382_v56 = vmul.f32 0.01, %v7366_v55  ;;  %vm7376_vm14 = vcmp.ge.f32.partialorder %v7368_v60, 0.0  ;;  %v7384_v20 = vmul.f32 0.01, %v7368_v60 }
 0x838   : > { %vm7373_vm15 = vcmp.ge.f32.partialorder %v7365_v16, 0.0  ;;  %v7381_v45 = vmul.f32 0.01, %v7365_v16  ;;  %vm7375_vm3 = vcmp.ge.f32.partialorder %v7367_v14, 0.0  ;;  %v7383_v50 = vmul.f32 0.01, %v7367_v14 }
 0x839   : > { %v7390_v37 = vsel %vm7374_vm1, %v7366_v55, %v7382_v56  ;;  %v7392_v17 = vsel %vm7376_vm14, %v7368_v60, %v7384_v20  ;;  %vm7378_vm4 = vcmp.ge.f32.partialorder %v7370_v15, 0.0  ;;  %v7386_v48 = vmul.f32 0.01, %v7370_v15 }
 0x83a   : > { %v7400_v33 = vpack.c.bf16 %v7390_v37, %v7390_v37  ;;  %v7402_v40 = vpack.c.bf16 %v7392_v17, %v7392_v17  ;;  %v7389_v18 = vsel %vm7373_vm15, %v7365_v16, %v7381_v45  ;;  %v7391_v23 = vsel %vm7375_vm3, %v7367_v14, %v7383_v50 }
 0x83b   : > { %v7399_v42 = vpack.c.bf16 %v7389_v18, %v7389_v18  ;;  %v7401_v41 = vpack.c.bf16 %v7391_v23, %v7391_v23  ;;  %v7394_v8 = vsel %vm7378_vm4, %v7370_v15, %v7386_v48  ;;  %vm7380_vm5 = vcmp.ge.f32.partialorder %v7372_v30, 0.0 }
 0x83c   : > { %8338 = vmatprep.subr.msk.bf16.mxu0 %vm1025_vm12, %v7400_v33  ;;  %8340 = vmatprep.subr.msk.bf16.mxu1 %vm1025_vm12, %v7402_v40  ;;  %v7404_v46 = vpack.c.bf16 %v7394_v8, %v7394_v8  ;;  %v7388_v22 = vmul.f32 0.01, %v7372_v30  ;;  %vm7377_vm6 = vcmp.ge.f32.partialorder %v7369_v25, 0.0  ;;  %v7385_v5 = vmul.f32 0.01, %v7369_v25 }
 0x83d   : > { %v7416_v52 = vsel %vm1025_vm12, %v7399_v42, 0  ;;  %v7422_v6 = vsel %vm1025_vm12, %v7401_v41, 0  ;;  %vm7379_vm7 = vcmp.ge.f32.partialorder %v7371_v32, 0.0  ;;  %v7387_v28 = vmul.f32 0.01, %v7371_v32 }
 0x83e   : > { %7440 = vmatpush1.bf16.msra.mxu0 %v7416_v52  ;;  %7483 = vmatpush1.bf16.msra.mxu1 %v7422_v6  ;;  %v7396_v12 = vsel %vm7380_vm5, %v7372_v30, %v7388_v22  ;;  %v7393_v9 = vsel %vm7377_vm6, %v7369_v25, %v7385_v5 }
 0x83f   : > { %8342 = vmatprep.subr.msk.bf16.mxu0 %vm1025_vm12, %v7404_v46  ;;  %v7406_v11 = vpack.c.bf16 %v7396_v12, %v7396_v12  ;;  %v7403_v63 = vpack.c.bf16 %v7393_v9, %v7393_v9  ;;  %v7395_v19 = vsel %vm7379_vm7, %v7371_v32, %v7387_v28 }
 0x840   : > { %v7405_v59 = vpack.c.bf16 %v7395_v19, %v7395_v19 }
 0x841   : > { %8344 = vmatprep.subr.msk.bf16.mxu1 %vm1025_vm12, %v7406_v11  ;;  %8339 = vmatmul.mubr.msk.bf16.vlgmr.msra.gmra.mrb[20].mxu0 %vm716_vm2, %v8889_v44  ;;  %v7428_v2 = vsel %vm1025_vm12, %v7403_v63, 0 }
 0x842   : > { %8341 = vmatmul.mubr.msk.bf16.vlgmr.msra.gmra.mrb[20].mxu1 %vm716_vm2, %v8889_v44  ;;  %7526 = vmatpush1.bf16.msra.mxu0 %v7428_v2  ;;  %v7434_v24 = vsel %vm1025_vm12, %v7405_v59, 0 }
 0x843   : > { %7569 = vmatpush1.bf16.msra.mxu1 %v7434_v24  ;;  %7557 = vmatprep.mubr.bf16.mxu0 %v8932_v0 }
 0x844   : > { %7600 = vmatprep.mubr.bf16.mxu1 %v8932_v0 }
 0x849   : > { %8343 = vmatmul.mubr.msk.bf16.vlgmr.msra.gmra.mrb[24].mxu0 %vm716_vm2, %v8889_v44 }
 0x84a   : > { %8345 = vmatmul.mubr.msk.bf16.vlgmr.msra.gmra.mrb[24].mxu1 %vm716_vm2, %v8889_v44 }
 0x914   : > { %v10572_v54 = vpop.f32.mrb[20].mxu0 }
 0x915   : > { %v7617_v21 = vmul.f32 %v10572_v54, %v9085_v34  ;;  %v10576_v4 = vpop.f32.mrb[21].mxu0  ;;  %v10578_v39 = vpop.f32.mrb[20].mxu1 }
 0x916   : > { %v7618_v27 = vmul.f32 %v10576_v4, %v9087_v35  ;;  %v7619_v26 = vmul.f32 %v10578_v39, %v9089_v36  ;;  %v10584_v0 = vpop.f32.mrb[22].mxu0  ;;  %v10586_v47 = vpop.f32.mrb[21].mxu1 }
 0x917   : > { %v7651_v43 = vmul.f32 %v7617_v21, %v10572_v54  ;;  %v7625_v3 = vmul.f32 %v10584_v0, %v9085_v34  ;;  %v7620_v10 = vmul.f32 %v10586_v47, %v9093_v38  ;;  %v10593_v53 = vpop.f32.mrb[23].mxu0  ;;  %v10595_v49 = vpop.f32.mrb[22].mxu1 }
 0x918   : > { %v7633_v29 = vadd.f32 %v7618_v27, %v7617_v21  ;;  %v7652_v13 = vmul.f32 %v7618_v27, %v10576_v4  ;;  %v7653_v51 = vmul.f32 %v7619_v26, %v10578_v39  ;;  %v7626_v58 = vmul.f32 %v10593_v53, %v9087_v35  ;;  %v10601_v31 = vpop.f32.mrb[23].mxu1 }
 0x919   : > { %v7659_v1 = vmul.f32 %v7625_v3, %v10584_v0  ;;  %v7627_v34 = vmul.f32 %v10595_v49, %v9089_v36  ;;  %v7628_v55 = vmul.f32 %v10601_v31, %v9093_v38  ;;  %v7654_v30 = vmul.f32 %v7620_v10, %v10586_v47 }
 0x91a   : > { %v7667_v60 = vadd.f32 %v7652_v13, %v7651_v43  ;;  %v7634_v16 = vadd.f32 %v7633_v29, %v7619_v26  ;;  %v7642_v14 = vadd.f32 %v7626_v58, %v7625_v3  ;;  %v7660_v15 = vmul.f32 %v7626_v58, %v10593_v53 }
 0x91b   : > { %v7661_v25 = vmul.f32 %v7627_v34, %v10595_v49  ;;  %v7662_v36 = vmul.f32 %v7628_v55, %v10601_v31 }
 0x91c   : > { %v7668_v35 = vadd.f32 %v7667_v60, %v7653_v51  ;;  %v7635_v32 = vadd.f32 %v7634_v16, %v7620_v10  ;;  %v7676_v56 = vadd.f32 %v7660_v15, %v7659_v1  ;;  %v7643_v20 = vadd.f32 %v7642_v14, %v7627_v34  ;;  %v10611_v45 = vpop.f32.mrb[24].mxu0 }
 0x91d   : > { %v7621_v38 = vmul.f32 %v10611_v45, %v9112_v57  ;;  %v10616_v50 = vpop.f32.mrb[25].mxu0  ;;  %v10618_v37 = vpop.f32.mrb[24].mxu1 }
 0x91e   : > { %v7669_v17 = vadd.f32 %v7668_v35, %v7654_v30  ;;  %v7677_v48 = vadd.f32 %v7676_v56, %v7661_v25  ;;  %v7644_v33 = vadd.f32 %v7643_v20, %v7628_v55  ;;  %v7622_v40 = vmul.f32 %v10616_v50, %v9114_v61  ;;  %v10622_v18 = vpop.f32.mrb[26].mxu0  ;;  %v10624_v23 = vpop.f32.mrb[25].mxu1  ;;  %v7612_v30 = vld [vmem:[%s10778_s12 + $0x8] sm:$0xff] }
 0x91f   : > { %v7636_v42 = vadd.f32 %v7635_v32, %v7621_v38  ;;  %v7655_v41 = vmul.f32 %v7621_v38, %v10611_v45  ;;  %v7623_v8 = vmul.f32 %v10618_v37, %v9116_v62  ;;  %v7629_v46 = vmul.f32 %v10622_v18, %v9112_v57  ;;  %v10631_v22 = vpop.f32.mrb[27].mxu0  ;;  %v10633_v5 = vpop.f32.mrb[26].mxu1 }
 0x920   : > { %v7678_v52 = vadd.f32 %v7677_v48, %v7662_v36  ;;  %v7656_v6 = vmul.f32 %v7622_v40, %v10616_v50  ;;  %v7630_v44 = vmul.f32 %v10631_v22, %v9114_v61  ;;  %v10638_v28 = vpop.f32.mrb[27].mxu1  ;;  %v7624_v63 = vmul.f32 %v10624_v23, %v9127_v7 }
 0x921   : > { %v7670_v12 = vadd.f32 %v7669_v17, %v7655_v41  ;;  %v7637_v9 = vadd.f32 %v7636_v42, %v7622_v40  ;;  %v7645_v11 = vadd.f32 %v7644_v33, %v7629_v46  ;;  %v7663_v57 = vmul.f32 %v7629_v46, %v10622_v18 }
 0x922   : > { %v7664_v19 = vmul.f32 %v7630_v44, %v10631_v22  ;;  %v7631_v59 = vmul.f32 %v10633_v5, %v9116_v62  ;;  %v7657_v21 = vmul.f32 %v7623_v8, %v10618_v37  ;;  %v7632_v26 = vmul.f32 %v10638_v28, %v9127_v7  ;;  %v7611_v7 = vld [vmem:[%s10778_s12] sm:$0xff] }
 0x923   : > { %v7671_v2 = vadd.f32 %v7670_v12, %v7656_v6  ;;  %v7638_v24 = vadd.f32 %v7637_v9, %v7623_v8  ;;  %v7646_v61 = vadd.f32 %v7645_v11, %v7630_v44  ;;  %v7679_v27 = vadd.f32 %v7678_v52, %v7663_v57  ;;  %8398 = vmatprep.mubr.msk.f32.mxu0 %vm470_vm0, %v7611_v7  ;;  %v7614_v12 = vld [vmem:[%s10775_s9 + $0x8] sm:$0xff]  ;;  %v7613_v9 = vld [vmem:[%s10775_s9] sm:$0xff] }
 0x924   : > { %v7658_v3 = vmul.f32 %v7624_v63, %v10624_v23  ;;  %v7665_v51 = vmul.f32 %v7631_v59, %v10633_v5  ;;  %v7666_v34 = vmul.f32 %v7632_v26, %v10638_v28  ;;  %8405 = vmatprep.mubr.msk.f32.mxu1 %vm470_vm0, %v7611_v7 }
 0x925   : > { %v7672_v43 = vadd.f32 %v7671_v2, %v7657_v21  ;;  %v7647_v10 = vadd.f32 %v7646_v61, %v7631_v59  ;;  %v7639_v29 = vadd.f32 %v7638_v24, %v7624_v63  ;;  %v7680_v13 = vadd.f32 %v7679_v27, %v7664_v19  ;;  %v7615_v59 = vld [vmem:[%s10776_s10] sm:$0xff]  ;;  %v7616_v61 = vld [vmem:[%s10776_s10 + $0x8] sm:$0xff] }
 0x927   : > { %7640 = vadd.xlane.f32.xlu1 %v7639_v29  ;;  %v7648_v58 = vadd.f32 %v7647_v10, %v7632_v26  ;;  %v7673_v62 = vadd.f32 %v7672_v43, %v7658_v3  ;;  %v7681_v1 = vadd.f32 %v7680_v13, %v7665_v51 }
 0x929   : > { %7649 = vadd.xlane.f32.xlu0 %v7648_v58  ;;  %v7682_v55 = vadd.f32 %v7681_v1, %v7666_v34 }
 0x92b   : > { %7674 = vadd.xlane.f32.xlu1 %v7673_v62 }
 0x92f   : > { %7683 = vadd.xlane.f32.xlu1 %v7682_v55 }
 0x9b4   : > { %v7641_v60 = vpop.xlane.xlu1 %7640 }
 0x9b6   : > { %v7650_v16 = vpop.xlane.xlu0 %7649 }
 0x9b7   : > { %v8408_v14 = vpack.c.bf16 %v7650_v16, %v7641_v60 }
 0x9b8   : > { %v7675_v15 = vpop.xlane.xlu1 %7674 }
 0x9b9   : > { %8409 = vmatprep.subr.bf16.mxu0 %v8408_v14 }
 0x9ba   : > { %8411 = vmatpush3.bf16.msra.mxu0 %v8408_v14  ;;  %v8901_v14 = vld [vmem:[%s9053_s30 + $0x8] sm:$0xff] }
 0x9bc   : > { %v7684_v25 = vpop.xlane.xlu1 %7683 }
 0x9bd   : > { %v8412_v35 = vpack.c.bf16 %v7684_v25, %v7675_v15  ;;  %8399 = vmatmul.mubr.msk.f32.vlgmr.msra.gmra.mrb[28].mxu0 %vm470_vm0, %v7612_v30  ;;  %v8902_v15 = vld [vmem:[%s9053_s30 + $0x10] sm:$0xff] }
 0x9bf   : > { %8413 = vmatprep.subr.bf16.mxu1 %v8412_v35 }
 0x9c0   : > { %8415 = vmatpush3.bf16.msra.mxu1 %v8412_v35  ;;  %v8904_v35 = vld [vmem:[%s9053_s30 + $0x20] sm:$0xff] }
 0x9c3   : > { %8406 = vmatmul.mubr.msk.f32.vlgmr.msra.gmra.mrb[28].mxu1 %vm470_vm0, %v7612_v30  ;;  %v8903_v30 = vld [vmem:[%s9053_s30 + $0x18] sm:$0xff] }
 0xa90   : > { %v8400_v32 = vpop.f32.mrb[28].mxu0 }
 0xa91   : > { %v7842_v56 = vmul.f32 0.00024414063, %v8400_v32  ;;  %v7757_v20 = vpop.f32.mrb[29].mxu0 }
 0xa92   : > { %v7841_v36 = vmul.f32 0.00024414063, %v7757_v20 }
 0xa93   : > { %v7846_v38 = vmul.f32 %v7842_v56, %v7842_v56 }
 0xa94   : > { %v7845_v17 = vmul.f32 %v7841_v36, %v7841_v36 }
 0xa96   : > { %v8407_v48 = vpop.f32.mrb[28].mxu1 }
 0xa97   : > { %v7844_v33 = vmul.f32 0.00024414063, %v8407_v48  ;;  %v7832_v40 = vpop.f32.mrb[29].mxu1 }
 0xa98   : > { %v7843_v42 = vmul.f32 0.00024414063, %v7832_v40 }
 0xa99   : > { %v7848_v41 = vsub.f32 %v7844_v33, %v7846_v38 }
 0xa9a   : > { %v7847_v8 = vsub.f32 %v7843_v42, %v7845_v17  ;;  %v8907_v17 = vld [vmem:[%s9053_s30 + $0x38] sm:$0xff] }
 0xa9b   : > { %v7850_v46 = vmax.f32 %v7848_v41, 0.0 }
 0xa9c   : > { %v7849_v52 = vmax.f32 %v7847_v8, 0.0 }
 0xa9d   : > { %v7852_v6 = vadd.f32 1e-05, %v7850_v46 }
 0xa9e   : > { %v7851_v44 = vadd.f32 1e-05, %v7849_v52 }
 0xa9f   : > { %8894 = vrsqrt.f32 %v7852_v6 }
 0xaa0   : > { %8896 = vrsqrt.f32 %v7851_v44 }
 0xaa9   : > { %v8895_v11 = vpop.eup %8894 }
 0xaaa   : > { %v8897_v63 = vpop.eup %8896  ;;  %v7856_v57 = vmul.f32 %v8895_v11, %v7614_v12 }
 0xaab   : > { %v7855_v19 = vmul.f32 %v8897_v63, %v7613_v9 }
 0xaac   : > { %7868 = vperm.xlu0 %8870, %v7856_v57   ;;  %v7858_v2 = vmul.f32 %v7856_v57, %v7842_v56  ;;  %v8905_v56 = vld [vmem:[%s9053_s30 + $0x28] sm:$0xff] }
 0xaad   : > { %7863 = vperm.xlu1 %8869, %v7855_v19   ;;  %v7857_v24 = vmul.f32 %v7855_v19, %v7841_v36  ;;  %v8906_v36 = vld [vmem:[%s9053_s30 + $0x30] sm:$0xff] }
 0xaae   : > { %v7860_v27 = vsub.f32 %v7616_v61, %v7858_v2 }
 0xaaf   : > { %v7859_v21 = vsub.f32 %v7615_v59, %v7857_v24 }
 0xab1   : > { %7889 = vperm.xlu1 %8869, %v7859_v21  }
 0xab5   : > { %7894 = vperm.xlu1 %8869, %v7860_v27  }
 0xb2b   : > { %v7869_v26 = vpop.permute.xlu0 %7868 }
 0xb2c   : > { %v7864_v43 = vpop.permute.xlu1 %7863  ;;  %v7879_v3 = vmul.f32 %v7869_v26, %v10584_v0  ;;  %v7880_v10 = vmul.f32 %v7869_v26, %v10593_v53  ;;  %v10677_v29 = vmul.f32 %v7869_v26, %v10595_v49  ;;  %v10680_v13 = vmul.f32 %v7869_v26, %v10601_v31 }
 0xb2d   : > { %v10683_v51 = vmul.f32 %v7869_v26, %v10622_v18  ;;  %v10686_v58 = vmul.f32 %v7869_v26, %v10631_v22  ;;  %v10689_v62 = vmul.f32 %v7869_v26, %v10633_v5  ;;  %v10692_v1 = vmul.f32 %v7869_v26, %v10638_v28 }
 0xb2e   : > { %v7871_v0 = vmul.f32 %v7864_v43, %v10572_v54  ;;  %v7872_v53 = vmul.f32 %v7864_v43, %v10576_v4  ;;  %v7873_v49 = vmul.f32 %v7864_v43, %v10578_v39  ;;  %v7874_v31 = vmul.f32 %v7864_v43, %v10586_v47 }
 0xb2f   : > { %v7875_v18 = vmul.f32 %v7864_v43, %v10611_v45  ;;  %v7876_v22 = vmul.f32 %v7864_v43, %v10616_v50  ;;  %v7877_v5 = vmul.f32 %v7864_v43, %v10618_v37  ;;  %v7878_v28 = vmul.f32 %v7864_v43, %v10624_v23  ;;  %v8900_v50 = vld [vmem:[%s9053_s30] sm:$0xff] }
 0xb30   : > { %v7890_v34 = vpop.permute.xlu1 %7889 }
 0xb31   : > { %v7897_v54 = vadd.f32 %v7890_v34, %v7871_v0  ;;  %v7898_v4 = vadd.f32 %v7890_v34, %v7872_v53  ;;  %v7899_v55 = vadd.f32 %v7890_v34, %v7873_v49  ;;  %v7900_v39 = vadd.f32 %v7890_v34, %v7874_v31  ;;  %v8908_v0 = vld [vmem:[%s9053_s30 + $0x40] sm:$0xff]  ;;  %v8909_v49 = vld [vmem:[%s9053_s30 + $0x48] sm:$0xff]  ;;  %v8910_v31 = vld [vmem:[%s9053_s30 + $0x50] sm:$0xff] }
 0xb32   : > { %v7901_v7 = vadd.f32 %v7890_v34, %v7875_v18  ;;  %v7902_v47 = vadd.f32 %v7890_v34, %v7876_v22  ;;  %v7903_v60 = vadd.f32 %v7890_v34, %v7877_v5  ;;  %v7904_v45 = vadd.f32 %v7890_v34, %v7878_v28  ;;  %v8912_v5 = vld [vmem:[%s9053_s30 + $0x60] sm:$0xff]  ;;  %v8913_v34 = vld [vmem:[%s9053_s30 + $0x68] sm:$0xff] }
 0xb33   : > { %v7913_v16 = vadd.f32 %v8900_v50, %v7897_v54  ;;  %v7914_v37 = vadd.f32 %v8901_v14, %v7898_v4  ;;  %v7915_v23 = vadd.f32 %v8902_v15, %v7899_v55  ;;  %v7916_v25 = vadd.f32 %v8903_v30, %v7900_v39  ;;  %v8914_v54 = vld [vmem:[%s9053_s30 + $0x70] sm:$0xff] }
 0xb34   : > { %v7917_v32 = vadd.f32 %v8904_v35, %v7901_v7  ;;  %v7918_v20 = vadd.f32 %v8905_v56, %v7902_v47  ;;  %v7919_v38 = vadd.f32 %v8906_v36, %v7903_v60  ;;  %v7920_v48 = vadd.f32 %v8907_v17, %v7904_v45  ;;  %v7895_v33 = vpop.permute.xlu1 %7894 }
 0xb35   : > { %vm7929_vm0 = vcmp.ge.f32.partialorder %v7913_v16, 0.0  ;;  %vm7930_vm2 = vcmp.ge.f32.partialorder %v7914_v37, 0.0  ;;  %vm7931_vm12 = vcmp.ge.f32.partialorder %v7915_v23, 0.0  ;;  %vm7932_vm8 = vcmp.ge.f32.partialorder %v7916_v25, 0.0 }
 0xb36   : > { %vm7933_vm9 = vcmp.ge.f32.partialorder %v7917_v32, 0.0  ;;  %vm7934_vm10 = vcmp.ge.f32.partialorder %v7918_v20, 0.0  ;;  %vm7935_vm11 = vcmp.ge.f32.partialorder %v7919_v38, 0.0  ;;  %vm7936_vm13 = vcmp.ge.f32.partialorder %v7920_v48, 0.0 }
 0xb37   : > { %v7945_v40 = vmul.f32 0.01, %v7913_v16  ;;  %v7946_v42 = vmul.f32 0.01, %v7914_v37  ;;  %v7947_v41 = vmul.f32 0.01, %v7915_v23  ;;  %v7905_v8 = vadd.f32 %v7895_v33, %v7879_v3 }
 0xb38   : > { %v7948_v46 = vmul.f32 0.01, %v7916_v25  ;;  %v7949_v52 = vmul.f32 0.01, %v7917_v32  ;;  %v7950_v6 = vmul.f32 0.01, %v7918_v20  ;;  %v7906_v44 = vadd.f32 %v7895_v33, %v7880_v10 }
 0xb39   : > { %v7951_v12 = vmul.f32 0.01, %v7919_v38  ;;  %v7952_v9 = vmul.f32 0.01, %v7920_v48  ;;  %v7961_v11 = vsel %vm7929_vm0, %v7913_v16, %v7945_v40  ;;  %v7962_v63 = vsel %vm7930_vm2, %v7914_v37, %v7946_v42 }
 0xb3a   : > { %v7963_v57 = vsel %vm7931_vm12, %v7915_v23, %v7947_v41  ;;  %v7964_v19 = vsel %vm7932_vm8, %v7916_v25, %v7948_v46  ;;  %v7965_v59 = vsel %vm7933_vm9, %v7917_v32, %v7949_v52  ;;  %v7966_v2 = vsel %vm7934_vm10, %v7918_v20, %v7950_v6  ;;  %7977 = vst [vmem:[%s10715_s22] sm:$0xff] %v7961_v11 }
 0xb3b   : > { %7978 = vst [vmem:[%s10715_s22 + $0x8] sm:$0xff] %v7962_v63  ;;  %v7967_v24 = vsel %vm7935_vm11, %v7919_v38, %v7951_v12  ;;  %v7968_v21 = vsel %vm7936_vm13, %v7920_v48, %v7952_v9  ;;  %7979 = vst [vmem:[%s10715_s22 + $0x10] sm:$0xff] %v7963_v57  ;;  %v7907_v61 = vadd.f32 %v7895_v33, %v10677_v29 }
 0xb3c   : > { %7980 = vst [vmem:[%s10715_s22 + $0x18] sm:$0xff] %v7964_v19  ;;  %7981 = vst [vmem:[%s10715_s22 + $0x20] sm:$0xff] %v7965_v59  ;;  %v7908_v27 = vadd.f32 %v7895_v33, %v10680_v13  ;;  %v7909_v26 = vadd.f32 %v7895_v33, %v10683_v51  ;;  %v7910_v43 = vadd.f32 %v7895_v33, %v10686_v58  ;;  %v8911_v13 = vld [vmem:[%s9053_s30 + $0x58] sm:$0xff] }
 0xb3d   : > { %7982 = vst [vmem:[%s10715_s22 + $0x28] sm:$0xff] %v7966_v2  ;;  %7983 = vst [vmem:[%s10715_s22 + $0x30] sm:$0xff] %v7967_v24  ;;  %v7911_v3 = vadd.f32 %v7895_v33, %v10689_v62  ;;  %v7912_v10 = vadd.f32 %v7895_v33, %v10692_v1  ;;  %v7921_v53 = vadd.f32 %v8908_v0, %v7905_v8  ;;  %v8915_v58 = vld [vmem:[%s9053_s30 + $0x78] sm:$0xff] }
 0xb3e   : > { %7984 = vst [vmem:[%s10715_s22 + $0x38] sm:$0xff] %v7968_v21  ;;  %v7922_v29 = vadd.f32 %v8909_v49, %v7906_v44  ;;  %v7923_v18 = vadd.f32 %v8910_v31, %v7907_v61  ;;  %v7924_v22 = vadd.f32 %v8911_v13, %v7908_v27  ;;  %v7925_v28 = vadd.f32 %v8912_v5, %v7909_v26 }
 0xb3f   : > { %v7926_v51 = vadd.f32 %v8913_v34, %v7910_v43  ;;  %v7927_v4 = vadd.f32 %v8914_v54, %v7911_v3  ;;  %v7928_v55 = vadd.f32 %v8915_v58, %v7912_v10  ;;  %vm7937_vm1 = vcmp.ge.f32.partialorder %v7921_v53, 0.0 }
 0xb40   : > { %vm7938_vm14 = vcmp.ge.f32.partialorder %v7922_v29, 0.0  ;;  %vm7939_vm15 = vcmp.ge.f32.partialorder %v7923_v18, 0.0  ;;  %vm7940_vm3 = vcmp.ge.f32.partialorder %v7924_v22, 0.0  ;;  %vm7941_vm4 = vcmp.ge.f32.partialorder %v7925_v28, 0.0 }
 0xb41   : > { %vm7942_vm5 = vcmp.ge.f32.partialorder %v7926_v51, 0.0  ;;  %vm7943_vm6 = vcmp.ge.f32.partialorder %v7927_v4, 0.0  ;;  %vm7944_vm7 = vcmp.ge.f32.partialorder %v7928_v55, 0.0  ;;  %v7953_v62 = vmul.f32 0.01, %v7921_v53 }
 0xb42   : > { %v7954_v1 = vmul.f32 0.01, %v7922_v29  ;;  %v7955_v39 = vmul.f32 0.01, %v7923_v18  ;;  %v7956_v7 = vmul.f32 0.01, %v7924_v22 }
 0xb43   : > { %v7957_v47 = vmul.f32 0.01, %v7925_v28  ;;  %v7958_v60 = vmul.f32 0.01, %v7926_v51  ;;  %v7959_v45 = vmul.f32 0.01, %v7927_v4  ;;  %v7969_v16 = vsel %vm7937_vm1, %v7921_v53, %v7953_v62 }
 0xb44   : > { %v7960_v50 = vmul.f32 0.01, %v7928_v55  ;;  %v7970_v14 = vsel %vm7938_vm14, %v7922_v29, %v7954_v1  ;;  %v7971_v37 = vsel %vm7939_vm15, %v7923_v18, %v7955_v39  ;;  %v7972_v15 = vsel %vm7940_vm3, %v7924_v22, %v7956_v7  ;;  %7985 = vst [vmem:[%s10715_s22 + $0x40] sm:$0xff] %v7969_v16 }
 0xb45   : > { %v7973_v23 = vsel %vm7941_vm4, %v7925_v28, %v7957_v47  ;;  %v7974_v30 = vsel %vm7942_vm5, %v7926_v51, %v7958_v60  ;;  %7986 = vst [vmem:[%s10715_s22 + $0x48] sm:$0xff] %v7970_v14  ;;  %v7975_v25 = vsel %vm7943_vm6, %v7927_v4, %v7959_v45  ;;  %7987 = vst [vmem:[%s10715_s22 + $0x50] sm:$0xff] %v7971_v37 }
 0xb46   : > { %v7976_v35 = vsel %vm7944_vm7, %v7928_v55, %v7960_v50  ;;  %7988 = vst [vmem:[%s10715_s22 + $0x58] sm:$0xff] %v7972_v15  ;;  %7989 = vst [vmem:[%s10715_s22 + $0x60] sm:$0xff] %v7973_v23 }
 0xb47   : > { %7990 = vst [vmem:[%s10715_s22 + $0x68] sm:$0xff] %v7974_v30  ;;  %7991 = vst [vmem:[%s10715_s22 + $0x70] sm:$0xff] %v7975_v25 }
 0xb48   : > { %7992 = vst [vmem:[%s10715_s22 + $0x78] sm:$0xff] %v7976_v35 }
 0xb49 PF: > { %s23_s25 = sadd.s32 1, %s8930_s25  }
 0xb4a   : > { %p20_p4 = scmp.ge.s32.totalorder %s23_s25, 4  }
 0xb4c   :  { %22 = sbr.rel (!%p20_p4) target bundleno = 1 (0x1), region = 128 }

</bundles_post_ra>
